<compile_context>
chip_gen: v7x
topology: tpu7x:2x2x1
jax: 0.10.0
libtpu: 0.0.40
codegen_flags: <defaults>
</compile_context>

<pallas_src>
import numpy as np
import jax
import jax.numpy as jnp
from jax.experimental import pallas as pl
from jax.experimental.pallas import tpu as pltpu

SEQ = 80          # fixed sequence length from the model
_EPS = 1e-5       # BatchNorm1d eps
L1 = SEQ // 2     # 40: sequence length entering the kernel (after pool1)


def _round_up(n, m):
    return ((n + m - 1) // m) * m


def _cdiv(a, b):
    return (a + b - 1) // b


def _pick_tiling():
    """Per-generation batch-tile cap + scoped-VMEM limit.
    128-MiB-VMEM parts (v5e/v6e): bigger M amortizes per-step overhead.
    64-MiB parts (v7x) / unknown: stay conservative for headroom."""
    try:
        info = pltpu.get_tpu_info()
        if getattr(info, "vmem_capacity_bytes", 0) >= 100 * 1024 * 1024:
            return 512, 80 * 1024 * 1024
    except Exception:
        pass
    return 256, 40 * 1024 * 1024


# ----------------------------- kernel helpers ---------------------------------------
def _maxpool2(x):
    """MaxPool1d(kernel=2, stride=2) along the leading (L) axis (floor, like torch)."""
    L, tb, c = x.shape
    lp = L // 2
    xr = x[: lp * 2].reshape(lp, 2, tb, c)
    return jnp.maximum(xr[:, 0], xr[:, 1])


def _conv_layer(h, w_ref, b_ref):
    """Fused conv1d(k=3, pad=1) + folded-BN bias + LeakyReLU(0.2).

    h: (L, TB, Cin) bf16.  w_ref: (3, Cin, Cout) bf16.  b_ref: (1, Cout) f32.
    Three accumulating MXU matmuls over leading-axis slices of ONE zero-padded
    buffer (slices/reshapes are sublane-aligned views; no lane concat).
    """
    L, tb, cin = h.shape
    cout = w_ref.shape[2]
    zero = jnp.zeros((1, tb, cin), h.dtype)
    xp = jnp.concatenate([zero, h, zero], axis=0)            # (L+2, TB, Cin)
    acc = jnp.dot(xp[0:L].reshape(L * tb, cin), w_ref[0],
                  preferred_element_type=jnp.float32)
    acc = acc + jnp.dot(xp[1:L + 1].reshape(L * tb, cin), w_ref[1],
                        preferred_element_type=jnp.float32)
    acc = acc + jnp.dot(xp[2:L + 2].reshape(L * tb, cin), w_ref[2],
                        preferred_element_type=jnp.float32)
    y = acc + b_ref[...]                                     # f32
    y = jnp.where(y > 0.0, y, 0.2 * y)                       # LeakyReLU(0.2)
    return y.reshape(L, tb, cout)


def _noise_net_kernel(h1_ref, *refs):
    o_ref = refs[-1]
    p = refs[:-1]
    conv_w = [p[2 * i] for i in range(5)]        # conv2..conv6 folded weights (3,Cin,Cout) bf16
    conv_b = [p[2 * i + 1] for i in range(5)]    # folded biases (1,Cout) f32
    w7, b7, w8, b8 = p[10], p[11], p[12], p[13]

    h = h1_ref[0]                                # (40, TB, 32) bf16 (pool1 output)

    # ---- conv2..conv6 (+BN, LeakyReLU 0.2), MaxPool1d(2) after conv2..conv5 ----
    for li in range(5):
        y = _conv_layer(h, conv_w[li], conv_b[li])           # f32 (L, TB, Cout)
        if li < 4:
            h = _maxpool2(y).astype(jnp.bfloat16)            # pool2..pool5
        else:
            h = y                                            # conv6 out, L == 2, f32

    # ---- pool6 = AvgPool1d(2) at L == 2, then Flatten -> (TB, 256) ----
    z = (h[0] + h[1]) * 0.5

    # ---- linear7 (+ folded bn7) + LeakyReLU(0.01), linear8 (N padded to 128) ----
    z = jnp.dot(z.astype(jnp.bfloat16), w7[...],
                preferred_element_type=jnp.float32) + b7[...]
    z = jnp.where(z > 0.0, z, 0.01 * z)
    out = jnp.dot(z.astype(jnp.bfloat16), w8[...],
                  preferred_element_type=jnp.float32) + b8[...]
    o_ref[...] = out.astype(o_ref.dtype)


# ----------------------------- host-side wrapper ------------------------------------
def _const_spec(a):
    nd = a.ndim
    return pl.BlockSpec(a.shape, lambda i: (0,) * nd)


def noise_reduction_forward(x, conv_params, dense_params, *, max_tb=None,
                            vmem_limit_bytes=None):
    B, L0 = x.shape
    assert L0 == SEQ

    auto_tb, auto_vmem = _pick_tiling()
    if max_tb is None:
        max_tb = auto_tb
    if vmem_limit_bytes is None:
        vmem_limit_bytes = auto_vmem

    # Batch tiling: G >= 2 (megacore sharding / pipeline overlap), TB multiple of 16
    # (bf16 sublane tile), B_pad = G*TB (minimal padding).
    G = max(2, _cdiv(B, max_tb))
    TB = _round_up(_cdiv(B, G), 16)
    B_pad = G * TB

    # ---- Fold BatchNorm (eval) into conv/linear weights & biases --------------------
    folded = []
    for (w, b, scale, shift) in conv_params:
        folded.append((w * scale, b * scale + shift))        # (3,Cin,Cout), (1,Cout)
    w7, b7, s7, t7, w8, b8 = dense_params
    w7_f, b7_f = w7 * s7, b7 * s7 + t7

    # ---- Block 1 (conv1+bn1+LeakyReLU(0.2)+MaxPool1d(2)) in the wrapper (Cin=1) -----
    w1, b1 = folded[0]                                       # (3,1,32), (1,32)
    xp = jnp.pad(x, ((0, 0), (1, 1)))                        # zero-pad sequence
    y1 = (xp[:, 0:SEQ, None] * w1[0, 0]
          + xp[:, 1:SEQ + 1, None] * w1[1, 0]
          + xp[:, 2:SEQ + 2, None] * w1[2, 0]) + b1
    y1 = jnp.where(y1 > 0.0, y1, 0.2 * y1)
    h1 = jnp.maximum(y1[:, 0::2, :], y1[:, 1::2, :])         # (B, 40, 32)

    if B_pad != B:
        h1 = jnp.pad(h1, ((0, B_pad - B), (0, 0), (0, 0)))
    # (G, 40, TB, 32): batch tile on sublanes, channels on lanes; bf16 matmul operand.
    h1 = h1.reshape(G, TB, L1, 32).transpose(0, 2, 1, 3).astype(jnp.bfloat16)

    # ---- Kernel params: bf16 weights, f32 biases; linear8 padded to 128 lanes -------
    flat = []
    for (w_f, b_f) in folded[1:]:
        flat += [w_f.astype(jnp.bfloat16), b_f.astype(jnp.float32)]
    w8_p = jnp.pad(w8, ((0, 0), (0, 128 - SEQ)))
    b8_p = jnp.pad(b8, ((0, 0), (0, 128 - SEQ)))
    flat += [w7_f.astype(jnp.bfloat16), b7_f.astype(jnp.float32),
             w8_p.astype(jnp.bfloat16), b8_p.astype(jnp.float32)]

    in_specs = [pl.BlockSpec((1, L1, TB, 32), lambda i: (i, 0, 0, 0))]
    in_specs += [_const_spec(a) for a in flat]

    out = pl.pallas_call(
        _noise_net_kernel,
        out_shape=jax.ShapeDtypeStruct((B_pad, 128), jnp.float32),
        grid_spec=pltpu.PrefetchScalarGridSpec(
            num_scalar_prefetch=0,
            grid=(G,),
            in_specs=in_specs,
            out_specs=pl.BlockSpec((TB, 128), lambda i: (i, 0)),
        ),
        compiler_params=pltpu.CompilerParams(
            dimension_semantics=("parallel",),
            vmem_limit_bytes=vmem_limit_bytes),
    )(h1, *flat)
    return out[:B, :SEQ].reshape(1, B, SEQ)


# ----------------------------- deterministic params ---------------------------------
def init_params(key):
    conv_dims = [(1, 32), (32, 64), (64, 64), (64, 128), (128, 128), (128, 256)]
    convs = []
    for cin, cout in conv_dims:
        key, kw, kb, kg, kbe, km, kv = jax.random.split(key, 7)
        w = jax.random.normal(kw, (3, cin, cout), jnp.float32) / float(np.sqrt(3 * cin))
        b = 0.1 * jax.random.normal(kb, (1, cout), jnp.float32)
        gamma = 1.0 + 0.1 * jax.random.normal(kg, (1, cout), jnp.float32)
        beta = 0.1 * jax.random.normal(kbe, (1, cout), jnp.float32)
        mean = 0.1 * jax.random.normal(km, (1, cout), jnp.float32)
        var = jax.random.uniform(kv, (1, cout), jnp.float32, 0.8, 1.2)
        scale = gamma / jnp.sqrt(var + _EPS)
        shift = beta - mean * scale
        convs.append((w, b, scale, shift))

    key, k7w, k7b, k7g, k7be, k7m, k7v, k8w, k8b = jax.random.split(key, 9)
    w7 = jax.random.normal(k7w, (256, 256), jnp.float32) / 16.0
    b7 = 0.1 * jax.random.normal(k7b, (1, 256), jnp.float32)
    gamma7 = 1.0 + 0.1 * jax.random.normal(k7g, (1, 256), jnp.float32)
    beta7 = 0.1 * jax.random.normal(k7be, (1, 256), jnp.float32)
    mean7 = 0.1 * jax.random.normal(k7m, (1, 256), jnp.float32)
    var7 = jax.random.uniform(k7v, (1, 256), jnp.float32, 0.8, 1.2)
    s7 = gamma7 / jnp.sqrt(var7 + _EPS)
    t7 = beta7 - mean7 * s7
    w8 = jax.random.normal(k8w, (256, 80), jnp.float32) / 16.0
    b8 = 0.1 * jax.random.normal(k8b, (1, 80), jnp.float32)
    dense = (w7, b7, s7, t7, w8, b8)
    return convs, dense


# ----------------------------- plain-JAX reference (f32) ----------------------------
def ref_forward(x, conv_params, dense_params):
    w7, b7, s7, t7, w8, b8 = dense_params
    h = x[:, :, None]                                     # (B, 80, 1) channel-last
    for li, (w, b, s, t) in enumerate(conv_params):
        Bb, L, _ = h.shape
        hp = jnp.pad(h, ((0, 0), (1, 1), (0, 0)))
        y = (jnp.einsum('blc,cd->bld', hp[:, :L], w[0])
             + jnp.einsum('blc,cd->bld', hp[:, 1:L + 1], w[1])
             + jnp.einsum('blc,cd->bld', hp[:, 2:L + 2], w[2]))
        y = y + b
        y = y * s + t
        y = jnp.where(y > 0.0, y, 0.2 * y)
        if li < 5:
            lp = y.shape[1] // 2
            y = jnp.max(y[:, :lp * 2].reshape(Bb, lp, 2, -1), axis=2)
        else:
            y = jnp.mean(y, axis=1, keepdims=True)        # AvgPool1d(2), L == 2
        h = y
    h = h[:, 0, :]                                        # Flatten -> (B, 256)
    h = h @ w7 + b7
    h = h * s7 + t7
    h = jnp.where(h > 0.0, h, 0.01 * h)
    out = h @ w8 + b8
    return out.reshape(1, -1, SEQ)


# ----------------------------- main --------------------------------------------------
if __name__ == "__main__":
    # TODO(synk): training utilities (fit / EarlyStopping / MSELoss) are not implemented;
    # BatchNorm is eval-mode (running stats folded into the weights).
    key = jax.random.PRNGKey(0)
    pkey, xkey = jax.random.split(key)
    conv_params, dense_params = init_params(pkey)

    B = 64
    x = jax.random.normal(xkey, (B, SEQ), jnp.float32)

    out = noise_reduction_forward(x, conv_params, dense_params)
    out = jax.block_until_ready(out)
    assert out.shape == (1, B, SEQ) and out.dtype == jnp.float32

    # f32 reference; tolerance 2e-2 accounts for bf16 matmul operands (f32 accumulation).
    ref = ref_forward(x, conv_params, dense_params)
    np.testing.assert_allclose(np.asarray(out), np.asarray(ref), rtol=2e-2, atol=2e-2)

    print("KERNEL_OK")
</pallas_src>

<mosaic_0001>
module attributes {stable_mosaic.version = 11 : i64} {
  func.func @_noise_net_kernel(%arg0: i32, %arg1: memref<1x40x32x32xbf16, #tpu.memory_space<vmem>>, %arg2: memref<3x32x64xbf16, #tpu.memory_space<vmem>>, %arg3: memref<1x64xf32, #tpu.memory_space<vmem>>, %arg4: memref<3x64x64xbf16, #tpu.memory_space<vmem>>, %arg5: memref<1x64xf32, #tpu.memory_space<vmem>>, %arg6: memref<3x64x128xbf16, #tpu.memory_space<vmem>>, %arg7: memref<1x128xf32, #tpu.memory_space<vmem>>, %arg8: memref<3x128x128xbf16, #tpu.memory_space<vmem>>, %arg9: memref<1x128xf32, #tpu.memory_space<vmem>>, %arg10: memref<3x128x256xbf16, #tpu.memory_space<vmem>>, %arg11: memref<1x256xf32, #tpu.memory_space<vmem>>, %arg12: memref<256x256xbf16, #tpu.memory_space<vmem>>, %arg13: memref<1x256xf32, #tpu.memory_space<vmem>>, %arg14: memref<256x128xbf16, #tpu.memory_space<vmem>>, %arg15: memref<1x128xf32, #tpu.memory_space<vmem>>, %arg16: memref<32x128xf32, #tpu.memory_space<vmem>>) attributes {dimension_semantics = [#tpu.dimension_semantics<parallel>], iteration_bounds = array<i64: 2>, scalar_prefetch = 0 : i64, scratch_operands = 0 : i64, tpu.core_type = #tpu.core_type<tc>, window_params = [{transform_indices = @transform_0, window_bounds = array<i64: 1, 40, 32, 32>}, {pipeline_mode = #tpu.pipeline_mode<synchronous>, transform_indices = @transform_1, window_bounds = array<i64: 3, 32, 64>}, {pipeline_mode = #tpu.pipeline_mode<synchronous>, transform_indices = @transform_2, window_bounds = array<i64: 1, 64>}, {pipeline_mode = #tpu.pipeline_mode<synchronous>, transform_indices = @transform_3, window_bounds = array<i64: 3, 64, 64>}, {pipeline_mode = #tpu.pipeline_mode<synchronous>, transform_indices = @transform_4, window_bounds = array<i64: 1, 64>}, {pipeline_mode = #tpu.pipeline_mode<synchronous>, transform_indices = @transform_5, window_bounds = array<i64: 3, 64, 128>}, {pipeline_mode = #tpu.pipeline_mode<synchronous>, transform_indices = @transform_6, window_bounds = array<i64: 1, 128>}, {pipeline_mode = #tpu.pipeline_mode<synchronous>, transform_indices = @transform_7, window_bounds = array<i64: 3, 128, 128>}, {pipeline_mode = #tpu.pipeline_mode<synchronous>, transform_indices = @transform_8, window_bounds = array<i64: 1, 128>}, {pipeline_mode = #tpu.pipeline_mode<synchronous>, transform_indices = @transform_9, window_bounds = array<i64: 3, 128, 256>}, {pipeline_mode = #tpu.pipeline_mode<synchronous>, transform_indices = @transform_10, window_bounds = array<i64: 1, 256>}, {pipeline_mode = #tpu.pipeline_mode<synchronous>, transform_indices = @transform_11, window_bounds = array<i64: 256, 256>}, {pipeline_mode = #tpu.pipeline_mode<synchronous>, transform_indices = @transform_12, window_bounds = array<i64: 1, 256>}, {pipeline_mode = #tpu.pipeline_mode<synchronous>, transform_indices = @transform_13, window_bounds = array<i64: 256, 128>}, {pipeline_mode = #tpu.pipeline_mode<synchronous>, transform_indices = @transform_14, window_bounds = array<i64: 1, 128>}, {transform_indices = @transform_15, window_bounds = array<i64: 32, 128>}]} {
    %c0 = arith.constant 0 : index
    %c0_0 = arith.constant 0 : index
    %c0_1 = arith.constant 0 : index
    %c0_2 = arith.constant 0 : index
    %0 = vector.load %arg1[%c0, %c0_0, %c0_1, %c0_2] : memref<1x40x32x32xbf16, #tpu.memory_space<vmem>>, vector<1x40x32x32xbf16>
    %1 = vector.shape_cast %0 : vector<1x40x32x32xbf16> to vector<40x32x32xbf16>
    %cst = arith.constant 0.000000e+00 : bf16
    %2 = vector.broadcast %cst : bf16 to vector<1x32x32xbf16>
    %3 = tpu.concatenate %2, %1, %2 in 0 : vector<1x32x32xbf16>, vector<40x32x32xbf16>, vector<1x32x32xbf16> -> vector<42x32x32xbf16>
    %4 = vector.extract_strided_slice %3 {offsets = [0, 0, 0], sizes = [40, 32, 32], strides = [1, 1, 1]} : vector<42x32x32xbf16> to vector<40x32x32xbf16>
    %5 = vector.shape_cast %4 : vector<40x32x32xbf16> to vector<1280x32xbf16>
    %c0_3 = arith.constant 0 : index
    %c0_4 = arith.constant 0 : index
    %c0_5 = arith.constant 0 : index
    %6 = vector.load %arg2[%c0_3, %c0_4, %c0_5] : memref<3x32x64xbf16, #tpu.memory_space<vmem>>, vector<1x32x64xbf16>
    %7 = vector.shape_cast %6 : vector<1x32x64xbf16> to vector<32x64xbf16>
    %cst_6 = arith.constant dense<0.000000e+00> : vector<1280x64xf32>
    %8 = tpu.matmul %5, %7, %cst_6 {dimension_numbers = #tpu.dot_dimension_numbers<[1], [0], [0], [1], [0, 0, 1, 1], [], []>} : vector<1280x32xbf16>, vector<32x64xbf16>, vector<1280x64xf32> -> vector<1280x64xf32>
    %9 = vector.extract_strided_slice %3 {offsets = [1, 0, 0], sizes = [40, 32, 32], strides = [1, 1, 1]} : vector<42x32x32xbf16> to vector<40x32x32xbf16>
    %10 = vector.shape_cast %9 : vector<40x32x32xbf16> to vector<1280x32xbf16>
    %c1 = arith.constant 1 : index
    %c0_7 = arith.constant 0 : index
    %c0_8 = arith.constant 0 : index
    %11 = vector.load %arg2[%c1, %c0_7, %c0_8] : memref<3x32x64xbf16, #tpu.memory_space<vmem>>, vector<1x32x64xbf16>
    %12 = vector.shape_cast %11 : vector<1x32x64xbf16> to vector<32x64xbf16>
    %cst_9 = arith.constant dense<0.000000e+00> : vector<1280x64xf32>
    %13 = tpu.matmul %10, %12, %cst_9 {dimension_numbers = #tpu.dot_dimension_numbers<[1], [0], [0], [1], [0, 0, 1, 1], [], []>} : vector<1280x32xbf16>, vector<32x64xbf16>, vector<1280x64xf32> -> vector<1280x64xf32>
    %14 = arith.addf %8, %13 : vector<1280x64xf32>
    %15 = vector.extract_strided_slice %3 {offsets = [2, 0, 0], sizes = [40, 32, 32], strides = [1, 1, 1]} : vector<42x32x32xbf16> to vector<40x32x32xbf16>
    %16 = vector.shape_cast %15 : vector<40x32x32xbf16> to vector<1280x32xbf16>
    %c2 = arith.constant 2 : index
    %c0_10 = arith.constant 0 : index
    %c0_11 = arith.constant 0 : index
    %17 = vector.load %arg2[%c2, %c0_10, %c0_11] : memref<3x32x64xbf16, #tpu.memory_space<vmem>>, vector<1x32x64xbf16>
    %18 = vector.shape_cast %17 : vector<1x32x64xbf16> to vector<32x64xbf16>
    %cst_12 = arith.constant dense<0.000000e+00> : vector<1280x64xf32>
    %19 = tpu.matmul %16, %18, %cst_12 {dimension_numbers = #tpu.dot_dimension_numbers<[1], [0], [0], [1], [0, 0, 1, 1], [], []>} : vector<1280x32xbf16>, vector<32x64xbf16>, vector<1280x64xf32> -> vector<1280x64xf32>
    %20 = arith.addf %14, %19 : vector<1280x64xf32>
    %c0_13 = arith.constant 0 : index
    %c0_14 = arith.constant 0 : index
    %21 = vector.load %arg3[%c0_13, %c0_14] : memref<1x64xf32, #tpu.memory_space<vmem>>, vector<1x64xf32>
    %22 = vector.broadcast %21 : vector<1x64xf32> to vector<1280x64xf32>
    %23 = arith.addf %20, %22 : vector<1280x64xf32>
    %cst_15 = arith.constant 0.000000e+00 : f32
    %24 = vector.broadcast %cst_15 : f32 to vector<1280x64xf32>
    %25 = arith.cmpf ogt, %23, %24 : vector<1280x64xf32>
    %cst_16 = arith.constant 2.000000e-01 : f32
    %26 = vector.broadcast %cst_16 : f32 to vector<1280x64xf32>
    %27 = arith.mulf %26, %23 : vector<1280x64xf32>
    %28 = arith.select %25, %23, %27 : vector<1280x64xi1>, vector<1280x64xf32>
    %29 = vector.shape_cast %28 : vector<1280x64xf32> to vector<40x32x64xf32>
    %30 = vector.shape_cast %29 : vector<40x32x64xf32> to vector<20x2x32x64xf32>
    %31 = vector.extract_strided_slice %30 {offsets = [0, 0, 0, 0], sizes = [20, 1, 32, 64], strides = [1, 1, 1, 1]} : vector<20x2x32x64xf32> to vector<20x1x32x64xf32>
    %32 = vector.shape_cast %31 : vector<20x1x32x64xf32> to vector<20x32x64xf32>
    %33 = vector.extract_strided_slice %30 {offsets = [0, 1, 0, 0], sizes = [20, 1, 32, 64], strides = [1, 1, 1, 1]} : vector<20x2x32x64xf32> to vector<20x1x32x64xf32>
    %34 = vector.shape_cast %33 : vector<20x1x32x64xf32> to vector<20x32x64xf32>
    %35 = arith.maximumf %32, %34 : vector<20x32x64xf32>
    %36 = arith.truncf %35 : vector<20x32x64xf32> to vector<20x32x64xbf16>
    %cst_17 = arith.constant 0.000000e+00 : bf16
    %37 = vector.broadcast %cst_17 : bf16 to vector<1x32x64xbf16>
    %38 = tpu.concatenate %37, %36, %37 in 0 : vector<1x32x64xbf16>, vector<20x32x64xbf16>, vector<1x32x64xbf16> -> vector<22x32x64xbf16>
    %39 = vector.extract_strided_slice %38 {offsets = [0, 0, 0], sizes = [20, 32, 64], strides = [1, 1, 1]} : vector<22x32x64xbf16> to vector<20x32x64xbf16>
    %40 = vector.shape_cast %39 : vector<20x32x64xbf16> to vector<640x64xbf16>
    %c0_18 = arith.constant 0 : index
    %c0_19 = arith.constant 0 : index
    %c0_20 = arith.constant 0 : index
    %41 = vector.load %arg4[%c0_18, %c0_19, %c0_20] : memref<3x64x64xbf16, #tpu.memory_space<vmem>>, vector<1x64x64xbf16>
    %42 = vector.shape_cast %41 : vector<1x64x64xbf16> to vector<64x64xbf16>
    %cst_21 = arith.constant dense<0.000000e+00> : vector<640x64xf32>
    %43 = tpu.matmul %40, %42, %cst_21 {dimension_numbers = #tpu.dot_dimension_numbers<[1], [0], [0], [1], [0, 0, 1, 1], [], []>} : vector<640x64xbf16>, vector<64x64xbf16>, vector<640x64xf32> -> vector<640x64xf32>
    %44 = vector.extract_strided_slice %38 {offsets = [1, 0, 0], sizes = [20, 32, 64], strides = [1, 1, 1]} : vector<22x32x64xbf16> to vector<20x32x64xbf16>
    %45 = vector.shape_cast %44 : vector<20x32x64xbf16> to vector<640x64xbf16>
    %c1_22 = arith.constant 1 : index
    %c0_23 = arith.constant 0 : index
    %c0_24 = arith.constant 0 : index
    %46 = vector.load %arg4[%c1_22, %c0_23, %c0_24] : memref<3x64x64xbf16, #tpu.memory_space<vmem>>, vector<1x64x64xbf16>
    %47 = vector.shape_cast %46 : vector<1x64x64xbf16> to vector<64x64xbf16>
    %cst_25 = arith.constant dense<0.000000e+00> : vector<640x64xf32>
    %48 = tpu.matmul %45, %47, %cst_25 {dimension_numbers = #tpu.dot_dimension_numbers<[1], [0], [0], [1], [0, 0, 1, 1], [], []>} : vector<640x64xbf16>, vector<64x64xbf16>, vector<640x64xf32> -> vector<640x64xf32>
    %49 = arith.addf %43, %48 : vector<640x64xf32>
    %50 = vector.extract_strided_slice %38 {offsets = [2, 0, 0], sizes = [20, 32, 64], strides = [1, 1, 1]} : vector<22x32x64xbf16> to vector<20x32x64xbf16>
    %51 = vector.shape_cast %50 : vector<20x32x64xbf16> to vector<640x64xbf16>
    %c2_26 = arith.constant 2 : index
    %c0_27 = arith.constant 0 : index
    %c0_28 = arith.constant 0 : index
    %52 = vector.load %arg4[%c2_26, %c0_27, %c0_28] : memref<3x64x64xbf16, #tpu.memory_space<vmem>>, vector<1x64x64xbf16>
    %53 = vector.shape_cast %52 : vector<1x64x64xbf16> to vector<64x64xbf16>
    %cst_29 = arith.constant dense<0.000000e+00> : vector<640x64xf32>
    %54 = tpu.matmul %51, %53, %cst_29 {dimension_numbers = #tpu.dot_dimension_numbers<[1], [0], [0], [1], [0, 0, 1, 1], [], []>} : vector<640x64xbf16>, vector<64x64xbf16>, vector<640x64xf32> -> vector<640x64xf32>
    %55 = arith.addf %49, %54 : vector<640x64xf32>
    %c0_30 = arith.constant 0 : index
    %c0_31 = arith.constant 0 : index
    %56 = vector.load %arg5[%c0_30, %c0_31] : memref<1x64xf32, #tpu.memory_space<vmem>>, vector<1x64xf32>
    %57 = vector.broadcast %56 : vector<1x64xf32> to vector<640x64xf32>
    %58 = arith.addf %55, %57 : vector<640x64xf32>
    %cst_32 = arith.constant 0.000000e+00 : f32
    %59 = vector.broadcast %cst_32 : f32 to vector<640x64xf32>
    %60 = arith.cmpf ogt, %58, %59 : vector<640x64xf32>
    %cst_33 = arith.constant 2.000000e-01 : f32
    %61 = vector.broadcast %cst_33 : f32 to vector<640x64xf32>
    %62 = arith.mulf %61, %58 : vector<640x64xf32>
    %63 = arith.select %60, %58, %62 : vector<640x64xi1>, vector<640x64xf32>
    %64 = vector.shape_cast %63 : vector<640x64xf32> to vector<20x32x64xf32>
    %65 = vector.shape_cast %64 : vector<20x32x64xf32> to vector<10x2x32x64xf32>
    %66 = vector.extract_strided_slice %65 {offsets = [0, 0, 0, 0], sizes = [10, 1, 32, 64], strides = [1, 1, 1, 1]} : vector<10x2x32x64xf32> to vector<10x1x32x64xf32>
    %67 = vector.shape_cast %66 : vector<10x1x32x64xf32> to vector<10x32x64xf32>
    %68 = vector.extract_strided_slice %65 {offsets = [0, 1, 0, 0], sizes = [10, 1, 32, 64], strides = [1, 1, 1, 1]} : vector<10x2x32x64xf32> to vector<10x1x32x64xf32>
    %69 = vector.shape_cast %68 : vector<10x1x32x64xf32> to vector<10x32x64xf32>
    %70 = arith.maximumf %67, %69 : vector<10x32x64xf32>
    %71 = arith.truncf %70 : vector<10x32x64xf32> to vector<10x32x64xbf16>
    %cst_34 = arith.constant 0.000000e+00 : bf16
    %72 = vector.broadcast %cst_34 : bf16 to vector<1x32x64xbf16>
    %73 = tpu.concatenate %72, %71, %72 in 0 : vector<1x32x64xbf16>, vector<10x32x64xbf16>, vector<1x32x64xbf16> -> vector<12x32x64xbf16>
    %74 = vector.extract_strided_slice %73 {offsets = [0, 0, 0], sizes = [10, 32, 64], strides = [1, 1, 1]} : vector<12x32x64xbf16> to vector<10x32x64xbf16>
    %75 = vector.shape_cast %74 : vector<10x32x64xbf16> to vector<320x64xbf16>
    %c0_35 = arith.constant 0 : index
    %c0_36 = arith.constant 0 : index
    %c0_37 = arith.constant 0 : index
    %76 = vector.load %arg6[%c0_35, %c0_36, %c0_37] : memref<3x64x128xbf16, #tpu.memory_space<vmem>>, vector<1x64x128xbf16>
    %77 = vector.shape_cast %76 : vector<1x64x128xbf16> to vector<64x128xbf16>
    %cst_38 = arith.constant dense<0.000000e+00> : vector<320x128xf32>
    %78 = tpu.matmul %75, %77, %cst_38 {dimension_numbers = #tpu.dot_dimension_numbers<[1], [0], [0], [1], [0, 0, 1, 1], [], []>} : vector<320x64xbf16>, vector<64x128xbf16>, vector<320x128xf32> -> vector<320x128xf32>
    %79 = vector.extract_strided_slice %73 {offsets = [1, 0, 0], sizes = [10, 32, 64], strides = [1, 1, 1]} : vector<12x32x64xbf16> to vector<10x32x64xbf16>
    %80 = vector.shape_cast %79 : vector<10x32x64xbf16> to vector<320x64xbf16>
    %c1_39 = arith.constant 1 : index
    %c0_40 = arith.constant 0 : index
    %c0_41 = arith.constant 0 : index
    %81 = vector.load %arg6[%c1_39, %c0_40, %c0_41] : memref<3x64x128xbf16, #tpu.memory_space<vmem>>, vector<1x64x128xbf16>
    %82 = vector.shape_cast %81 : vector<1x64x128xbf16> to vector<64x128xbf16>
    %cst_42 = arith.constant dense<0.000000e+00> : vector<320x128xf32>
    %83 = tpu.matmul %80, %82, %cst_42 {dimension_numbers = #tpu.dot_dimension_numbers<[1], [0], [0], [1], [0, 0, 1, 1], [], []>} : vector<320x64xbf16>, vector<64x128xbf16>, vector<320x128xf32> -> vector<320x128xf32>
    %84 = arith.addf %78, %83 : vector<320x128xf32>
    %85 = vector.extract_strided_slice %73 {offsets = [2, 0, 0], sizes = [10, 32, 64], strides = [1, 1, 1]} : vector<12x32x64xbf16> to vector<10x32x64xbf16>
    %86 = vector.shape_cast %85 : vector<10x32x64xbf16> to vector<320x64xbf16>
    %c2_43 = arith.constant 2 : index
    %c0_44 = arith.constant 0 : index
    %c0_45 = arith.constant 0 : index
    %87 = vector.load %arg6[%c2_43, %c0_44, %c0_45] : memref<3x64x128xbf16, #tpu.memory_space<vmem>>, vector<1x64x128xbf16>
    %88 = vector.shape_cast %87 : vector<1x64x128xbf16> to vector<64x128xbf16>
    %cst_46 = arith.constant dense<0.000000e+00> : vector<320x128xf32>
    %89 = tpu.matmul %86, %88, %cst_46 {dimension_numbers = #tpu.dot_dimension_numbers<[1], [0], [0], [1], [0, 0, 1, 1], [], []>} : vector<320x64xbf16>, vector<64x128xbf16>, vector<320x128xf32> -> vector<320x128xf32>
    %90 = arith.addf %84, %89 : vector<320x128xf32>
    %c0_47 = arith.constant 0 : index
    %c0_48 = arith.constant 0 : index
    %91 = vector.load %arg7[%c0_47, %c0_48] : memref<1x128xf32, #tpu.memory_space<vmem>>, vector<1x128xf32>
    %92 = vector.broadcast %91 : vector<1x128xf32> to vector<320x128xf32>
    %93 = arith.addf %90, %92 : vector<320x128xf32>
    %cst_49 = arith.constant 0.000000e+00 : f32
    %94 = vector.broadcast %cst_49 : f32 to vector<320x128xf32>
    %95 = arith.cmpf ogt, %93, %94 : vector<320x128xf32>
    %cst_50 = arith.constant 2.000000e-01 : f32
    %96 = vector.broadcast %cst_50 : f32 to vector<320x128xf32>
    %97 = arith.mulf %96, %93 : vector<320x128xf32>
    %98 = arith.select %95, %93, %97 : vector<320x128xi1>, vector<320x128xf32>
    %99 = vector.shape_cast %98 : vector<320x128xf32> to vector<10x32x128xf32>
    %100 = vector.shape_cast %99 : vector<10x32x128xf32> to vector<5x2x32x128xf32>
    %101 = vector.extract_strided_slice %100 {offsets = [0, 0, 0, 0], sizes = [5, 1, 32, 128], strides = [1, 1, 1, 1]} : vector<5x2x32x128xf32> to vector<5x1x32x128xf32>
    %102 = vector.shape_cast %101 : vector<5x1x32x128xf32> to vector<5x32x128xf32>
    %103 = vector.extract_strided_slice %100 {offsets = [0, 1, 0, 0], sizes = [5, 1, 32, 128], strides = [1, 1, 1, 1]} : vector<5x2x32x128xf32> to vector<5x1x32x128xf32>
    %104 = vector.shape_cast %103 : vector<5x1x32x128xf32> to vector<5x32x128xf32>
    %105 = arith.maximumf %102, %104 : vector<5x32x128xf32>
    %106 = arith.truncf %105 : vector<5x32x128xf32> to vector<5x32x128xbf16>
    %cst_51 = arith.constant 0.000000e+00 : bf16
    %107 = vector.broadcast %cst_51 : bf16 to vector<1x32x128xbf16>
    %108 = tpu.concatenate %107, %106, %107 in 0 : vector<1x32x128xbf16>, vector<5x32x128xbf16>, vector<1x32x128xbf16> -> vector<7x32x128xbf16>
    %109 = vector.extract_strided_slice %108 {offsets = [0, 0, 0], sizes = [5, 32, 128], strides = [1, 1, 1]} : vector<7x32x128xbf16> to vector<5x32x128xbf16>
    %110 = vector.shape_cast %109 : vector<5x32x128xbf16> to vector<160x128xbf16>
    %c0_52 = arith.constant 0 : index
    %c0_53 = arith.constant 0 : index
    %c0_54 = arith.constant 0 : index
    %111 = vector.load %arg8[%c0_52, %c0_53, %c0_54] : memref<3x128x128xbf16, #tpu.memory_space<vmem>>, vector<1x128x128xbf16>
    %112 = vector.shape_cast %111 : vector<1x128x128xbf16> to vector<128x128xbf16>
    %cst_55 = arith.constant dense<0.000000e+00> : vector<160x128xf32>
    %113 = tpu.matmul %110, %112, %cst_55 {dimension_numbers = #tpu.dot_dimension_numbers<[1], [0], [0], [1], [0, 0, 1, 1], [], []>} : vector<160x128xbf16>, vector<128x128xbf16>, vector<160x128xf32> -> vector<160x128xf32>
    %114 = vector.extract_strided_slice %108 {offsets = [1, 0, 0], sizes = [5, 32, 128], strides = [1, 1, 1]} : vector<7x32x128xbf16> to vector<5x32x128xbf16>
    %115 = vector.shape_cast %114 : vector<5x32x128xbf16> to vector<160x128xbf16>
    %c1_56 = arith.constant 1 : index
    %c0_57 = arith.constant 0 : index
    %c0_58 = arith.constant 0 : index
    %116 = vector.load %arg8[%c1_56, %c0_57, %c0_58] : memref<3x128x128xbf16, #tpu.memory_space<vmem>>, vector<1x128x128xbf16>
    %117 = vector.shape_cast %116 : vector<1x128x128xbf16> to vector<128x128xbf16>
    %cst_59 = arith.constant dense<0.000000e+00> : vector<160x128xf32>
    %118 = tpu.matmul %115, %117, %cst_59 {dimension_numbers = #tpu.dot_dimension_numbers<[1], [0], [0], [1], [0, 0, 1, 1], [], []>} : vector<160x128xbf16>, vector<128x128xbf16>, vector<160x128xf32> -> vector<160x128xf32>
    %119 = arith.addf %113, %118 : vector<160x128xf32>
    %120 = vector.extract_strided_slice %108 {offsets = [2, 0, 0], sizes = [5, 32, 128], strides = [1, 1, 1]} : vector<7x32x128xbf16> to vector<5x32x128xbf16>
    %121 = vector.shape_cast %120 : vector<5x32x128xbf16> to vector<160x128xbf16>
    %c2_60 = arith.constant 2 : index
    %c0_61 = arith.constant 0 : index
    %c0_62 = arith.constant 0 : index
    %122 = vector.load %arg8[%c2_60, %c0_61, %c0_62] : memref<3x128x128xbf16, #tpu.memory_space<vmem>>, vector<1x128x128xbf16>
    %123 = vector.shape_cast %122 : vector<1x128x128xbf16> to vector<128x128xbf16>
    %cst_63 = arith.constant dense<0.000000e+00> : vector<160x128xf32>
    %124 = tpu.matmul %121, %123, %cst_63 {dimension_numbers = #tpu.dot_dimension_numbers<[1], [0], [0], [1], [0, 0, 1, 1], [], []>} : vector<160x128xbf16>, vector<128x128xbf16>, vector<160x128xf32> -> vector<160x128xf32>
    %125 = arith.addf %119, %124 : vector<160x128xf32>
    %c0_64 = arith.constant 0 : index
    %c0_65 = arith.constant 0 : index
    %126 = vector.load %arg9[%c0_64, %c0_65] : memref<1x128xf32, #tpu.memory_space<vmem>>, vector<1x128xf32>
    %127 = vector.broadcast %126 : vector<1x128xf32> to vector<160x128xf32>
    %128 = arith.addf %125, %127 : vector<160x128xf32>
    %cst_66 = arith.constant 0.000000e+00 : f32
    %129 = vector.broadcast %cst_66 : f32 to vector<160x128xf32>
    %130 = arith.cmpf ogt, %128, %129 : vector<160x128xf32>
    %cst_67 = arith.constant 2.000000e-01 : f32
    %131 = vector.broadcast %cst_67 : f32 to vector<160x128xf32>
    %132 = arith.mulf %131, %128 : vector<160x128xf32>
    %133 = arith.select %130, %128, %132 : vector<160x128xi1>, vector<160x128xf32>
    %134 = vector.shape_cast %133 : vector<160x128xf32> to vector<5x32x128xf32>
    %135 = vector.extract_strided_slice %134 {offsets = [0, 0, 0], sizes = [4, 32, 128], strides = [1, 1, 1]} : vector<5x32x128xf32> to vector<4x32x128xf32>
    %136 = vector.shape_cast %135 : vector<4x32x128xf32> to vector<2x2x32x128xf32>
    %137 = vector.extract_strided_slice %136 {offsets = [0, 0, 0, 0], sizes = [2, 1, 32, 128], strides = [1, 1, 1, 1]} : vector<2x2x32x128xf32> to vector<2x1x32x128xf32>
    %138 = vector.shape_cast %137 : vector<2x1x32x128xf32> to vector<2x32x128xf32>
    %139 = vector.extract_strided_slice %136 {offsets = [0, 1, 0, 0], sizes = [2, 1, 32, 128], strides = [1, 1, 1, 1]} : vector<2x2x32x128xf32> to vector<2x1x32x128xf32>
    %140 = vector.shape_cast %139 : vector<2x1x32x128xf32> to vector<2x32x128xf32>
    %141 = arith.maximumf %138, %140 : vector<2x32x128xf32>
    %142 = arith.truncf %141 : vector<2x32x128xf32> to vector<2x32x128xbf16>
    %cst_68 = arith.constant 0.000000e+00 : bf16
    %143 = vector.broadcast %cst_68 : bf16 to vector<1x32x128xbf16>
    %144 = tpu.concatenate %143, %142, %143 in 0 : vector<1x32x128xbf16>, vector<2x32x128xbf16>, vector<1x32x128xbf16> -> vector<4x32x128xbf16>
    %145 = vector.extract_strided_slice %144 {offsets = [0, 0, 0], sizes = [2, 32, 128], strides = [1, 1, 1]} : vector<4x32x128xbf16> to vector<2x32x128xbf16>
    %146 = vector.shape_cast %145 : vector<2x32x128xbf16> to vector<64x128xbf16>
    %c0_69 = arith.constant 0 : index
    %c0_70 = arith.constant 0 : index
    %c0_71 = arith.constant 0 : index
    %147 = vector.load %arg10[%c0_69, %c0_70, %c0_71] : memref<3x128x256xbf16, #tpu.memory_space<vmem>>, vector<1x128x256xbf16>
    %148 = vector.shape_cast %147 : vector<1x128x256xbf16> to vector<128x256xbf16>
    %cst_72 = arith.constant dense<0.000000e+00> : vector<64x256xf32>
    %149 = tpu.matmul %146, %148, %cst_72 {dimension_numbers = #tpu.dot_dimension_numbers<[1], [0], [0], [1], [0, 0, 1, 1], [], []>} : vector<64x128xbf16>, vector<128x256xbf16>, vector<64x256xf32> -> vector<64x256xf32>
    %150 = vector.extract_strided_slice %144 {offsets = [1, 0, 0], sizes = [2, 32, 128], strides = [1, 1, 1]} : vector<4x32x128xbf16> to vector<2x32x128xbf16>
    %151 = vector.shape_cast %150 : vector<2x32x128xbf16> to vector<64x128xbf16>
    %c1_73 = arith.constant 1 : index
    %c0_74 = arith.constant 0 : index
    %c0_75 = arith.constant 0 : index
    %152 = vector.load %arg10[%c1_73, %c0_74, %c0_75] : memref<3x128x256xbf16, #tpu.memory_space<vmem>>, vector<1x128x256xbf16>
    %153 = vector.shape_cast %152 : vector<1x128x256xbf16> to vector<128x256xbf16>
    %cst_76 = arith.constant dense<0.000000e+00> : vector<64x256xf32>
    %154 = tpu.matmul %151, %153, %cst_76 {dimension_numbers = #tpu.dot_dimension_numbers<[1], [0], [0], [1], [0, 0, 1, 1], [], []>} : vector<64x128xbf16>, vector<128x256xbf16>, vector<64x256xf32> -> vector<64x256xf32>
    %155 = arith.addf %149, %154 : vector<64x256xf32>
    %156 = vector.extract_strided_slice %144 {offsets = [2, 0, 0], sizes = [2, 32, 128], strides = [1, 1, 1]} : vector<4x32x128xbf16> to vector<2x32x128xbf16>
    %157 = vector.shape_cast %156 : vector<2x32x128xbf16> to vector<64x128xbf16>
    %c2_77 = arith.constant 2 : index
    %c0_78 = arith.constant 0 : index
    %c0_79 = arith.constant 0 : index
    %158 = vector.load %arg10[%c2_77, %c0_78, %c0_79] : memref<3x128x256xbf16, #tpu.memory_space<vmem>>, vector<1x128x256xbf16>
    %159 = vector.shape_cast %158 : vector<1x128x256xbf16> to vector<128x256xbf16>
    %cst_80 = arith.constant dense<0.000000e+00> : vector<64x256xf32>
    %160 = tpu.matmul %157, %159, %cst_80 {dimension_numbers = #tpu.dot_dimension_numbers<[1], [0], [0], [1], [0, 0, 1, 1], [], []>} : vector<64x128xbf16>, vector<128x256xbf16>, vector<64x256xf32> -> vector<64x256xf32>
    %161 = arith.addf %155, %160 : vector<64x256xf32>
    %c0_81 = arith.constant 0 : index
    %c0_82 = arith.constant 0 : index
    %162 = vector.load %arg11[%c0_81, %c0_82] : memref<1x256xf32, #tpu.memory_space<vmem>>, vector<1x256xf32>
    %163 = vector.broadcast %162 : vector<1x256xf32> to vector<64x256xf32>
    %164 = arith.addf %161, %163 : vector<64x256xf32>
    %cst_83 = arith.constant 0.000000e+00 : f32
    %165 = vector.broadcast %cst_83 : f32 to vector<64x256xf32>
    %166 = arith.cmpf ogt, %164, %165 : vector<64x256xf32>
    %cst_84 = arith.constant 2.000000e-01 : f32
    %167 = vector.broadcast %cst_84 : f32 to vector<64x256xf32>
    %168 = arith.mulf %167, %164 : vector<64x256xf32>
    %169 = arith.select %166, %164, %168 : vector<64x256xi1>, vector<64x256xf32>
    %170 = vector.shape_cast %169 : vector<64x256xf32> to vector<2x32x256xf32>
    %171 = vector.extract_strided_slice %170 {offsets = [0, 0, 0], sizes = [1, 32, 256], strides = [1, 1, 1]} : vector<2x32x256xf32> to vector<1x32x256xf32>
    %172 = vector.shape_cast %171 : vector<1x32x256xf32> to vector<32x256xf32>
    %173 = vector.extract_strided_slice %170 {offsets = [1, 0, 0], sizes = [1, 32, 256], strides = [1, 1, 1]} : vector<2x32x256xf32> to vector<1x32x256xf32>
    %174 = vector.shape_cast %173 : vector<1x32x256xf32> to vector<32x256xf32>
    %175 = arith.addf %172, %174 : vector<32x256xf32>
    %cst_85 = arith.constant 5.000000e-01 : f32
    %176 = vector.broadcast %cst_85 : f32 to vector<32x256xf32>
    %177 = arith.mulf %175, %176 : vector<32x256xf32>
    %178 = arith.truncf %177 : vector<32x256xf32> to vector<32x256xbf16>
    %c0_86 = arith.constant 0 : index
    %c0_87 = arith.constant 0 : index
    %179 = vector.load %arg12[%c0_86, %c0_87] : memref<256x256xbf16, #tpu.memory_space<vmem>>, vector<256x256xbf16>
    %cst_88 = arith.constant dense<0.000000e+00> : vector<32x256xf32>
    %180 = tpu.matmul %178, %179, %cst_88 {dimension_numbers = #tpu.dot_dimension_numbers<[1], [0], [0], [1], [0, 0, 1, 1], [], []>} : vector<32x256xbf16>, vector<256x256xbf16>, vector<32x256xf32> -> vector<32x256xf32>
    %c0_89 = arith.constant 0 : index
    %c0_90 = arith.constant 0 : index
    %181 = vector.load %arg13[%c0_89, %c0_90] : memref<1x256xf32, #tpu.memory_space<vmem>>, vector<1x256xf32>
    %182 = vector.broadcast %181 : vector<1x256xf32> to vector<32x256xf32>
    %183 = arith.addf %180, %182 : vector<32x256xf32>
    %cst_91 = arith.constant 0.000000e+00 : f32
    %184 = vector.broadcast %cst_91 : f32 to vector<32x256xf32>
    %185 = arith.cmpf ogt, %183, %184 : vector<32x256xf32>
    %cst_92 = arith.constant 0.00999999977 : f32
    %186 = vector.broadcast %cst_92 : f32 to vector<32x256xf32>
    %187 = arith.mulf %186, %183 : vector<32x256xf32>
    %188 = arith.select %185, %183, %187 : vector<32x256xi1>, vector<32x256xf32>
    %189 = arith.truncf %188 : vector<32x256xf32> to vector<32x256xbf16>
    %c0_93 = arith.constant 0 : index
    %c0_94 = arith.constant 0 : index
    %190 = vector.load %arg14[%c0_93, %c0_94] : memref<256x128xbf16, #tpu.memory_space<vmem>>, vector<256x128xbf16>
    %cst_95 = arith.constant dense<0.000000e+00> : vector<32x128xf32>
    %191 = tpu.matmul %189, %190, %cst_95 {dimension_numbers = #tpu.dot_dimension_numbers<[1], [0], [0], [1], [0, 0, 1, 1], [], []>} : vector<32x256xbf16>, vector<256x128xbf16>, vector<32x128xf32> -> vector<32x128xf32>
    %c0_96 = arith.constant 0 : index
    %c0_97 = arith.constant 0 : index
    %192 = vector.load %arg15[%c0_96, %c0_97] : memref<1x128xf32, #tpu.memory_space<vmem>>, vector<1x128xf32>
    %193 = vector.broadcast %192 : vector<1x128xf32> to vector<32x128xf32>
    %194 = arith.addf %191, %193 : vector<32x128xf32>
    %c0_98 = arith.constant 0 : index
    %c0_99 = arith.constant 0 : index
    %195 = vector.load %arg16[%c0_98, %c0_99] : memref<32x128xf32, #tpu.memory_space<vmem>>, vector<32x128xf32>
    tpu.vector_store %arg16[%c0_98, %c0_99], %194 {strides = array<i32>} : memref<32x128xf32, #tpu.memory_space<vmem>>, vector<32x128xf32>,
    return
  }
  func.func @transform_0(%arg0: i32) -> (i32, i32, i32, i32) {
    %c0_i32 = arith.constant 0 : i32
    %c0_i32_0 = arith.constant 0 : i32
    %c0_i32_1 = arith.constant 0 : i32
    %c0_i32_2 = arith.constant 0 : i32
    return %arg0, %c0_i32, %c0_i32_0, %c0_i32_1 : i32, i32, i32, i32
  }
  func.func @transform_1(%arg0: i32) -> (i32, i32, i32) {
    %c0_i32 = arith.constant 0 : i32
    %c0_i32_0 = arith.constant 0 : i32
    %c0_i32_1 = arith.constant 0 : i32
    %c0_i32_2 = arith.constant 0 : i32
    return %c0_i32, %c0_i32_0, %c0_i32_1 : i32, i32, i32
  }
  func.func @transform_2(%arg0: i32) -> (i32, i32) {
    %c0_i32 = arith.constant 0 : i32
    %c0_i32_0 = arith.constant 0 : i32
    %c0_i32_1 = arith.constant 0 : i32
    return %c0_i32, %c0_i32_0 : i32, i32
  }
  func.func @transform_3(%arg0: i32) -> (i32, i32, i32) {
    %c0_i32 = arith.constant 0 : i32
    %c0_i32_0 = arith.constant 0 : i32
    %c0_i32_1 = arith.constant 0 : i32
    %c0_i32_2 = arith.constant 0 : i32
    return %c0_i32, %c0_i32_0, %c0_i32_1 : i32, i32, i32
  }
  func.func @transform_4(%arg0: i32) -> (i32, i32) {
    %c0_i32 = arith.constant 0 : i32
    %c0_i32_0 = arith.constant 0 : i32
    %c0_i32_1 = arith.constant 0 : i32
    return %c0_i32, %c0_i32_0 : i32, i32
  }
  func.func @transform_5(%arg0: i32) -> (i32, i32, i32) {
    %c0_i32 = arith.constant 0 : i32
    %c0_i32_0 = arith.constant 0 : i32
    %c0_i32_1 = arith.constant 0 : i32
    %c0_i32_2 = arith.constant 0 : i32
    return %c0_i32, %c0_i32_0, %c0_i32_1 : i32, i32, i32
  }
  func.func @transform_6(%arg0: i32) -> (i32, i32) {
    %c0_i32 = arith.constant 0 : i32
    %c0_i32_0 = arith.constant 0 : i32
    %c0_i32_1 = arith.constant 0 : i32
    return %c0_i32, %c0_i32_0 : i32, i32
  }
  func.func @transform_7(%arg0: i32) -> (i32, i32, i32) {
    %c0_i32 = arith.constant 0 : i32
    %c0_i32_0 = arith.constant 0 : i32
    %c0_i32_1 = arith.constant 0 : i32
    %c0_i32_2 = arith.constant 0 : i32
    return %c0_i32, %c0_i32_0, %c0_i32_1 : i32, i32, i32
  }
  func.func @transform_8(%arg0: i32) -> (i32, i32) {
    %c0_i32 = arith.constant 0 : i32
    %c0_i32_0 = arith.constant 0 : i32
    %c0_i32_1 = arith.constant 0 : i32
    return %c0_i32, %c0_i32_0 : i32, i32
  }
  func.func @transform_9(%arg0: i32) -> (i32, i32, i32) {
    %c0_i32 = arith.constant 0 : i32
    %c0_i32_0 = arith.constant 0 : i32
    %c0_i32_1 = arith.constant 0 : i32
    %c0_i32_2 = arith.constant 0 : i32
    return %c0_i32, %c0_i32_0, %c0_i32_1 : i32, i32, i32
  }
  func.func @transform_10(%arg0: i32) -> (i32, i32) {
    %c0_i32 = arith.constant 0 : i32
    %c0_i32_0 = arith.constant 0 : i32
    %c0_i32_1 = arith.constant 0 : i32
    return %c0_i32, %c0_i32_0 : i32, i32
  }
  func.func @transform_11(%arg0: i32) -> (i32, i32) {
    %c0_i32 = arith.constant 0 : i32
    %c0_i32_0 = arith.constant 0 : i32
    %c0_i32_1 = arith.constant 0 : i32
    return %c0_i32, %c0_i32_0 : i32, i32
  }
  func.func @transform_12(%arg0: i32) -> (i32, i32) {
    %c0_i32 = arith.constant 0 : i32
    %c0_i32_0 = arith.constant 0 : i32
    %c0_i32_1 = arith.constant 0 : i32
    return %c0_i32, %c0_i32_0 : i32, i32
  }
  func.func @transform_13(%arg0: i32) -> (i32, i32) {
    %c0_i32 = arith.constant 0 : i32
    %c0_i32_0 = arith.constant 0 : i32
    %c0_i32_1 = arith.constant 0 : i32
    return %c0_i32, %c0_i32_0 : i32, i32
  }
  func.func @transform_14(%arg0: i32) -> (i32, i32) {
    %c0_i32 = arith.constant 0 : i32
    %c0_i32_0 = arith.constant 0 : i32
    %c0_i32_1 = arith.constant 0 : i32
    return %c0_i32, %c0_i32_0 : i32, i32
  }
  func.func @transform_15(%arg0: i32) -> (i32, i32) {
    %c0_i32 = arith.constant 0 : i32
    %c0_i32_0 = arith.constant 0 : i32
    return %arg0, %c0_i32 : i32, i32
  }
}

</mosaic_0001>

<bundles_post_ra>
// kernel: tpu_custom_call.1
= control target key start
LH: loop header
LB: loop body
LE: loop exit
PB: predicated region body
PF: predicated region fallthrough
CT: control target
= control target key end

     0   :  { %s14425_s0 = inlined_call_operand.vmem [shape: bf16[2,40,32,32], index: 0, kind: input, shape index: {}]   ;;  %s14426_s1 = inlined_call_operand.vmem [shape: bf16[3,32,64], index: 1, kind: input, shape index: {}]   ;;  %s14427_s2 = inlined_call_operand.vmem [shape: f32[1,64], index: 2, kind: input, shape index: {}]   ;;  %s14428_s3 = inlined_call_operand.vmem [shape: bf16[3,64,64], index: 3, kind: input, shape index: {}]   ;;  %s14429_s4 = inlined_call_operand.vmem [shape: f32[1,64], index: 4, kind: input, shape index: {}]   ;;  %s14430_s5 = inlined_call_operand.vmem [shape: bf16[3,64,128], index: 5, kind: input, shape index: {}]   ;;  %s14431_s6 = inlined_call_operand.vmem [shape: f32[1,128], index: 6, kind: input, shape index: {}]   ;;  %s14432_s7 = inlined_call_operand.vmem [shape: bf16[3,128,128], index: 7, kind: input, shape index: {}]   ;;  %s14433_s8 = inlined_call_operand.vmem [shape: f32[1,128], index: 8, kind: input, shape index: {}]   ;;  %s14434_s9 = inlined_call_operand.vmem [shape: bf16[3,128,256], index: 9, kind: input, shape index: {}]   ;;  %s14435_s10 = inlined_call_operand.vmem [shape: f32[1,256], index: 10, kind: input, shape index: {}]   ;;  %s14436_s11 = inlined_call_operand.vmem [shape: bf16[256,256], index: 11, kind: input, shape index: {}]   ;;  %s14437_s12 = inlined_call_operand.vmem [shape: f32[1,256], index: 12, kind: input, shape index: {}]   ;;  %s14438_s13 = inlined_call_operand.vmem [shape: bf16[256,128], index: 13, kind: input, shape index: {}]   ;;  %s14439_s14 = inlined_call_operand.vmem [shape: f32[1,128], index: 14, kind: input, shape index: {}]   ;;  %s14440_s15 = inlined_call_operand.hbm [shape: f32[64,128], index: 15, kind: output, shape index: {}]  }
   0x1   :  { %14488 = sst [smem:[#allocation26_spill]] %s14425_s0 }
   0x2   :  { %14489 = sst [smem:[#allocation27_spill]] %s14426_s1 }
   0x3   :  { %20 = vsyncpa [#allocation3], 0 }
   0x4   :  { %22 = vsyncpa [#allocation3 + $0x1], 0  ;;  %s12204_s18 = smov 0   ;;  %s12206_s19 = smov 0  }
   0x5   :  { %s12208_s20 = smov 0   ;;  %s12210_s21 = smov 0  }
   0x6 LB: > { %14490 = sst [smem:[#allocation5_spill]] %s12114_s20  ;;  %s12225_s22 = sadd.s32 4294967295, %s12118_s21   ;;  %s12118_s21 = sphi %s12210_s21, %s14551_s21   ;;  %s12114_s20 = sphi %s12208_s20, %s14553_s20   ;;  %s12110_s19 = sphi %s12206_s19, %s14555_s19   ;;  %s12106_s18 = sphi %s12204_s18, %s14554_s18  }
   0x7   : > { %s8806_s23 = sadd.s32 4294967294, %s12118_s21   ;;  %s12229_s24 = sadd.s32 1, %s12118_s21  }
   0x8   : > { %14491 = sst [smem:[#allocation6_spill]] %s12229_s24  ;;  %s355_s25 = sadd.s32 1, %s12114_s20 }
   0x9   : > { %s352_s26 = ssub.s32 %s12118_s21, %s12229_s24  ;;  %p365_p0 = scmp.ne.s32.totalorder %s12114_s20, %s12110_s19 }
   0xa   : > { %p353_p1 = scmp.eq.s32.totalorder %s352_s26, 0  ;;  %p366_p2 = scmp.eq.s32.totalorder %s12225_s22, 1 }
   0xb   : > { %p371_p3 = scmp.ne.s32.totalorder %s12110_s19, %s12106_s18  ;;  %p372_p4 = scmp.eq.s32.totalorder %s8806_s23, 1 }
   0xc   : > { %s12240_s27 = scalar_select %p353_p1, %s12114_s20, %s355_s25  }
   0xd   : > { %p12242_p5 = por %p366_p2, %p365_p0  ;;  %p12246_p6 = por %p372_p4, %p371_p3 }
   0xe   : > { %14492 = sst [smem:[#allocation7_spill]] %s12240_s27  ;;  %p8809_p7 = scmp.ge.s32.totalorder %s12118_s21, 1 }
   0xf   : > { %p440_p8 = scmp.lt.s32.totalorder %s12118_s21, 3 }
  0x11   : > { %p441_p9 = pnand %p8809_p7, %p440_p8 }
  0x13   : > { %444 = sbr.rel (%p441_p9) target bundleno = 3200 (0xc80), region = 80 }
  0x1a   : > { %s14495_s1 = sld [smem:[#allocation27_spill]]  ;;  %p488_p10 = scmp.lt.s32.totalorder %s12225_s22, 1  ;;  %vm1076_vm0 = vcmask 261120   ;;  %vm4336_vm9 = vcmask 523264  }
  0x1b   : > { %s14496_s0 = sld [smem:[#allocation26_spill]]  ;;  %s9564_s26 = sshll.u32 %s12225_s22, 9 }
  0x1c   : > { %s489_s25 = scalar_select %p488_p10, %s12225_s22, 1 }
  0x1d   : > { %s12121_s22 = smov [#allocation2]  }
  0x1e   : > { %s11729_s20 = smul.u32 640, %s489_s25  ;;  %s12060_s17 = sshll.u32 %s12121_s22, 4  ;;  %s12061_s17 = int_to_ptr.vmem [resolvable:$false] %s12060_s17 }
  0x20   : > { %v11772_v0 = vld [vmem:[%s14495_s1 + $0x10] sm:$0xff]   ;;  %v11773_v1 = vld [vmem:[%s14495_s1 + $0x18] sm:$0xff]   ;;  %v11776_v2 = vld [vmem:[%s14495_s1] sm:$0xff]  }
  0x21   : > { %10097 = vmatprep.subr.bf16.mxu0 %v11772_v0  ;;  %s12266_s16 = scalar_lea.vmem %s14496_s0, %s11729_s20  ;;  %v11817_v16 = vld [vmem:[%s14495_s1 + $0x8] sm:$0xff]   ;;  %v12512_v55 = vld [vmem:[%s14495_s1 + $0x20] sm:$0xff]   ;;  %s485_s20 = sand.u32 1, %s12110_s19  }
  0x22   : > { %10098 = vmatpush3.bf16.msra.mxu0 %v11772_v0  ;;  %v11774_v3 = vld [vmem:[%s12266_s16] sm:$0xff]   ;;  %v11775_v4 = vld [vmem:[%s12266_s16 + $0x8] sm:$0xff]   ;;  %v11777_v5 = vld [vmem:[%s12266_s16 + $0x10] sm:$0xff]   ;;  %s8810_s24 = sshll.u32 %s485_s20, 5  ;;  %s14382_s0 = scalar_lea.hbm %s14440_s15, %s9564_s26 }
  0x23   : > { %10099 = vmatprep.subr.bf16.mxu0 %v11773_v1  ;;  %10101 = vmatprep.mubr.msk.bf16.mxu0 %vm1076_vm0, %v11774_v3  ;;  %v11778_v6 = vld [vmem:[%s12266_s16 + $0x18] sm:$0xff]   ;;  %v11779_v7 = vld [vmem:[%s12266_s16 + $0x20] sm:$0xff]   ;;  %v12279_v8 = vld [vmem:[%s12266_s16 + $0x28] sm:$0xff]   ;;  %s487_s23 = scalar_lea.vmem [#allocation2], %s8810_s24  ;;  %s14384_s24 = scalar_lea.sflag [#allocation3], %s485_s20 }
  0x24   : > { %v12282_v9 = vld [vmem:[%s12266_s16 + $0x30] sm:$0xff]   ;;  %v12289_v10 = vld [vmem:[%s12266_s16 + $0x38] sm:$0xff]   ;;  %v12292_v11 = vld [vmem:[%s12266_s16 + $0x40] sm:$0xff]   ;;  %s8744_s25 = sshll.u32 %s487_s23, 4  ;;  %s14377_s25 = int_to_ptr.vmem [resolvable:$true] %s8744_s25 }
  0x25   : > { %v12299_v12 = vld [vmem:[%s12266_s16 + $0x48] sm:$0xff]   ;;  %v12302_v13 = vld [vmem:[%s12266_s16 + $0x50] sm:$0xff]   ;;  %v12309_v14 = vld [vmem:[%s12266_s16 + $0x58] sm:$0xff]   ;;  %s12056_s27 = scalar_lea.vmem %s14377_s25, 512  ;;  %p12063_p0 = scmp.lt.s32.totalorder %s14377_s25, %s12061_s17 }
  0x26   : > { %10100 = vmatpush3.bf16.msra.mxu0 %v11773_v1  ;;  %v12312_v15 = vld [vmem:[%s12266_s16 + $0x60] sm:$0xff]   ;;  %v12322_v17 = vld [vmem:[%s12266_s16 + $0x68] sm:$0xff]   ;;  %v12325_v18 = vld [vmem:[%s12266_s16 + $0x70] sm:$0xff]   ;;  %p12057_p11 = scmp.ne.s32.totalorder %s14377_s25, %s12056_s27 }
  0x27   : > { %10261 = vmatprep.subr.bf16.mxu0 %v11776_v2  ;;  %v12332_v19 = vld [vmem:[%s12266_s16 + $0x78] sm:$0xff]   ;;  %v12335_v20 = vld [vmem:[%s12266_s16 + $0x80] sm:$0xff]   ;;  %v12342_v21 = vld [vmem:[%s12266_s16 + $0x88] sm:$0xff]  }
  0x28   : > { %v12345_v22 = vld [vmem:[%s12266_s16 + $0x90] sm:$0xff]   ;;  %v12352_v23 = vld [vmem:[%s12266_s16 + $0x98] sm:$0xff]   ;;  %v12355_v24 = vld [vmem:[%s12266_s16 + $0xa0] sm:$0xff]   ;;  %p12058_p12 = pnand %p12057_p11, %p12242_p5 }
  0x29   : > { %10102 = vmatmul.mubr.msk.bf16.vlgmr.msra.gmra.mrb[0].mxu0 %vm1076_vm0, %v11775_v4  ;;  %v12362_v25 = vld [vmem:[%s12266_s16 + $0xa8] sm:$0xff]   ;;  %v12365_v26 = vld [vmem:[%s12266_s16 + $0xb0] sm:$0xff]   ;;  %v12372_v27 = vld [vmem:[%s12266_s16 + $0xb8] sm:$0xff]  }
  0x2a   : > { %10262 = vmatpush3.bf16.msra.mxu0 %v11776_v2  ;;  %10105 = vmatprep.mubr.msk.bf16.mxu0 %vm1076_vm0, %v11777_v5  ;;  %v12375_v28 = vld [vmem:[%s12266_s16 + $0xc0] sm:$0xff]   ;;  %v12382_v29 = vld [vmem:[%s12266_s16 + $0xc8] sm:$0xff]   ;;  %v12385_v30 = vld [vmem:[%s12266_s16 + $0xd0] sm:$0xff]   ;;  %p12059_p13 = pneg %p12058_p12 }
  0x2b   : > { %10263 = vmatprep.subr.bf16.mxu0 %v11817_v16  ;;  %v12392_v31 = vld [vmem:[%s12266_s16 + $0xd8] sm:$0xff]   ;;  %v12395_v32 = vld [vmem:[%s12266_s16 + $0xe0] sm:$0xff]   ;;  %v12402_v33 = vld [vmem:[%s12266_s16 + $0xe8] sm:$0xff]  }
  0x2c   : > { %v12405_v34 = vld [vmem:[%s12266_s16 + $0xf0] sm:$0xff]   ;;  %v12412_v35 = vld [vmem:[%s12266_s16 + $0xf8] sm:$0xff]   ;;  %v12415_v36 = vld [vmem:[%s12266_s16 + $0x100] sm:$0xff]  }
  0x2d   : > { %v12422_v37 = vld [vmem:[%s12266_s16 + $0x108] sm:$0xff]   ;;  %v12425_v38 = vld [vmem:[%s12266_s16 + $0x110] sm:$0xff]   ;;  %v12432_v39 = vld [vmem:[%s12266_s16 + $0x118] sm:$0xff]  }
  0x2e   : > { %10264 = vmatpush3.bf16.msra.mxu0 %v11817_v16  ;;  %v12435_v40 = vld [vmem:[%s12266_s16 + $0x120] sm:$0xff]   ;;  %v12442_v41 = vld [vmem:[%s12266_s16 + $0x128] sm:$0xff]   ;;  %v12445_v42 = vld [vmem:[%s12266_s16 + $0x130] sm:$0xff]  }
  0x2f   : > { %v12452_v43 = vld [vmem:[%s12266_s16 + $0x138] sm:$0xff]   ;;  %v12455_v44 = vld [vmem:[%s12266_s16 + $0x140] sm:$0xff]   ;;  %v12462_v45 = vld [vmem:[%s12266_s16 + $0x148] sm:$0xff]   ;;  %10425 = vmatprep.subr.bf16.mxu0 %v12512_v55 }
  0x30   : > { %v12465_v46 = vld [vmem:[%s12266_s16 + $0x150] sm:$0xff]   ;;  %v12472_v47 = vld [vmem:[%s12266_s16 + $0x158] sm:$0xff]   ;;  %v12475_v48 = vld [vmem:[%s12266_s16 + $0x160] sm:$0xff]  }
  0x31   : > { %10106 = vmatmul.mubr.msk.bf16.gmra.mrb[4].mxu0 %vm1076_vm0, %v11778_v6  ;;  %v12482_v49 = vld [vmem:[%s12266_s16 + $0x168] sm:$0xff]   ;;  %v12485_v50 = vld [vmem:[%s12266_s16 + $0x170] sm:$0xff]   ;;  %v12492_v51 = vld [vmem:[%s12266_s16 + $0x178] sm:$0xff]  }
  0x32   : > { %10109 = vmatprep.mubr.msk.bf16.mxu0 %vm1076_vm0, %v11779_v7  ;;  %v12495_v52 = vld [vmem:[%s12266_s16 + $0x180] sm:$0xff]   ;;  %v12502_v53 = vld [vmem:[%s12266_s16 + $0x188] sm:$0xff]   ;;  %v12505_v54 = vld [vmem:[%s12266_s16 + $0x190] sm:$0xff]  }
  0x33   : > { %v12518_v56 = vld [vmem:[%s12266_s16 + $0x198] sm:$0xff]   ;;  %v12521_v57 = vld [vmem:[%s12266_s16 + $0x1a0] sm:$0xff]   ;;  %v12528_v58 = vld [vmem:[%s12266_s16 + $0x1a8] sm:$0xff]  }
  0x34   : > { %v12531_v59 = vld [vmem:[%s12266_s16 + $0x1b0] sm:$0xff]   ;;  %v12538_v60 = vld [vmem:[%s12266_s16 + $0x1b8] sm:$0xff]   ;;  %v12541_v61 = vld [vmem:[%s12266_s16 + $0x1c0] sm:$0xff]  }
  0x35   : > { %v12548_v62 = vld [vmem:[%s12266_s16 + $0x1c8] sm:$0xff]   ;;  %v12551_v63 = vld [vmem:[%s12266_s16 + $0x1d0] sm:$0xff]   ;;  %v12558_v0 = vld [vmem:[%s12266_s16 + $0x1d8] sm:$0xff]  }
  0x36   : > { %v12561_v1 = vld [vmem:[%s12266_s16 + $0x1e0] sm:$0xff]   ;;  %v12568_v2 = vld [vmem:[%s12266_s16 + $0x1e8] sm:$0xff]   ;;  %v12571_v3 = vld [vmem:[%s12266_s16 + $0x1f0] sm:$0xff]  }
  0x37   : > { %14497 = vst [vmem:[#allocation8_spill] sm:$0xff] %v12571_v3  ;;  %v12578_v4 = vld [vmem:[%s12266_s16 + $0x1f8] sm:$0xff]   ;;  %v12581_v5 = vld [vmem:[%s12266_s16 + $0x200] sm:$0xff]   ;;  %v12588_v6 = vld [vmem:[%s12266_s16 + $0x208] sm:$0xff]  }
  0x38   : > { %14498 = vst [vmem:[#allocation9_spill] sm:$0xff] %v12578_v4  ;;  %14499 = vst [vmem:[#allocation10_spill] sm:$0xff] %v12581_v5  ;;  %v12591_v7 = vld [vmem:[%s12266_s16 + $0x210] sm:$0xff]   ;;  %v12598_v16 = vld [vmem:[%s12266_s16 + $0x218] sm:$0xff]  }
  0x39   : > { %10110 = vmatmul.mubr.msk.bf16.gmra.mrb[8].mxu0 %vm1076_vm0, %v12279_v8  ;;  %14500 = vst [vmem:[#allocation11_spill] sm:$0xff] %v12588_v6  ;;  %14501 = vst [vmem:[#allocation12_spill] sm:$0xff] %v12591_v7 }
  0x3a   : > { %10113 = vmatprep.mubr.msk.bf16.mxu0 %vm1076_vm0, %v12282_v9  ;;  %14502 = vst [vmem:[#allocation13_spill] sm:$0xff] %v12598_v16 }
  0x41   : > { %10114 = vmatmul.mubr.msk.bf16.gmra.mrb[12].mxu0 %vm1076_vm0, %v12289_v10 }
  0x42   : > { %10117 = vmatprep.mubr.msk.bf16.mxu0 %vm1076_vm0, %v12292_v11 }
  0x49   : > { %10118 = vmatmul.mubr.msk.bf16.gmra.mrb[16].mxu0 %vm1076_vm0, %v12299_v12 }
  0x4a   : > { %10121 = vmatprep.mubr.msk.bf16.mxu0 %vm1076_vm0, %v12302_v13 }
  0x51   : > { %10122 = vmatmul.mubr.msk.bf16.gmra.mrb[20].mxu0 %vm1076_vm0, %v12309_v14 }
  0x52   : > { %10125 = vmatprep.mubr.msk.bf16.mxu0 %vm1076_vm0, %v12312_v15 }
  0x59   : > { %10126 = vmatmul.mubr.msk.bf16.gmra.mrb[24].mxu0 %vm1076_vm0, %v12322_v17 }
  0x5a   : > { %10129 = vmatprep.mubr.msk.bf16.mxu0 %vm1076_vm0, %v12325_v18 }
  0x61   : > { %10130 = vmatmul.mubr.msk.bf16.gmra.mrb[28].mxu0 %vm1076_vm0, %v12332_v19 }
  0x62   : > { %10133 = vmatprep.mubr.msk.bf16.mxu0 %vm1076_vm0, %v12335_v20 }
  0x69   : > { %10134 = vmatmul.mubr.msk.bf16.gmra.mrb[32].mxu0 %vm1076_vm0, %v12342_v21 }
  0x6a   : > { %10137 = vmatprep.mubr.msk.bf16.mxu0 %vm1076_vm0, %v12345_v22 }
  0x71   : > { %10138 = vmatmul.mubr.msk.bf16.gmra.mrb[36].mxu0 %vm1076_vm0, %v12352_v23 }
  0x72   : > { %10141 = vmatprep.mubr.msk.bf16.mxu0 %vm1076_vm0, %v12355_v24 }
  0x79   : > { %10142 = vmatmul.mubr.msk.bf16.gmra.mrb[40].mxu0 %vm1076_vm0, %v12362_v25 }
  0x7a   : > { %10145 = vmatprep.mubr.msk.bf16.mxu0 %vm1076_vm0, %v12365_v26 }
  0x81   : > { %10146 = vmatmul.mubr.msk.bf16.gmra.mrb[44].mxu0 %vm1076_vm0, %v12372_v27 }
  0x82   : > { %10149 = vmatprep.mubr.msk.bf16.mxu0 %vm1076_vm0, %v12375_v28 }
  0x89   : > { %10150 = vmatmul.mubr.msk.bf16.gmra.mrb[48].mxu0 %vm1076_vm0, %v12382_v29 }
  0x8a   : > { %10153 = vmatprep.mubr.msk.bf16.mxu0 %vm1076_vm0, %v12385_v30 }
  0x91   : > { %10154 = vmatmul.mubr.msk.bf16.gmra.mrb[52].mxu0 %vm1076_vm0, %v12392_v31 }
  0x92   : > { %10157 = vmatprep.mubr.msk.bf16.mxu0 %vm1076_vm0, %v12395_v32 }
  0x99   : > { %10158 = vmatmul.mubr.msk.bf16.gmra.mrb[56].mxu0 %vm1076_vm0, %v12402_v33 }
  0x9a   : > { %10161 = vmatprep.mubr.msk.bf16.mxu0 %vm1076_vm0, %v12405_v34 }
  0xa1   : > { %10162 = vmatmul.mubr.msk.bf16.gmra.mrb[60].mxu0 %vm1076_vm0, %v12412_v35 }
  0xa2   : > { %10165 = vmatprep.mubr.msk.bf16.mxu0 %vm1076_vm0, %v12415_v36 }
  0xa9   : > { %10166 = vmatmul.mubr.msk.bf16.gmra.mrb[64].mxu0 %vm1076_vm0, %v12422_v37 }
  0xaa   : > { %10169 = vmatprep.mubr.msk.bf16.mxu0 %vm1076_vm0, %v12425_v38 }
  0xb1   : > { %10170 = vmatmul.mubr.msk.bf16.gmra.mrb[68].mxu0 %vm1076_vm0, %v12432_v39 }
  0xb2   : > { %10173 = vmatprep.mubr.msk.bf16.mxu0 %vm1076_vm0, %v12435_v40 }
  0xb9   : > { %10174 = vmatmul.mubr.msk.bf16.gmra.mrb[72].mxu0 %vm1076_vm0, %v12442_v41 }
  0xba   : > { %10177 = vmatprep.mubr.msk.bf16.mxu0 %vm1076_vm0, %v12445_v42 }
  0xc1   : > { %10178 = vmatmul.mubr.msk.bf16.gmra.mrb[76].mxu0 %vm1076_vm0, %v12452_v43 }
  0xc2   : > { %10181 = vmatprep.mubr.msk.bf16.mxu0 %vm1076_vm0, %v12455_v44 }
  0xc9   : > { %10182 = vmatmul.mubr.msk.bf16.gmra.mrb[80].mxu0 %vm1076_vm0, %v12462_v45 }
  0xca   : > { %10185 = vmatprep.mubr.msk.bf16.mxu0 %vm1076_vm0, %v12465_v46 }
  0xd1   : > { %10186 = vmatmul.mubr.msk.bf16.gmra.mrb[84].mxu0 %vm1076_vm0, %v12472_v47 }
  0xd2   : > { %10189 = vmatprep.mubr.msk.bf16.mxu0 %vm1076_vm0, %v12475_v48 }
  0xd9   : > { %10190 = vmatmul.mubr.msk.bf16.gmra.mrb[88].mxu0 %vm1076_vm0, %v12482_v49 }
  0xda   : > { %10193 = vmatprep.mubr.msk.bf16.mxu0 %vm1076_vm0, %v12485_v50 }
  0xe1   : > { %10194 = vmatmul.mubr.msk.bf16.gmra.mrb[92].mxu0 %vm1076_vm0, %v12492_v51 }
  0xe2   : > { %10197 = vmatprep.mubr.msk.bf16.mxu0 %vm1076_vm0, %v12495_v52 }
  0xe9   : > { %10198 = vmatmul.mubr.msk.bf16.gmra.mrb[96].mxu0 %vm1076_vm0, %v12502_v53 }
  0xea   : > { %10201 = vmatprep.mubr.msk.bf16.mxu0 %vm1076_vm0, %v12505_v54 }
  0xf1   : > { %10202 = vmatmul.mubr.msk.bf16.gmra.mrb[100].mxu0 %vm1076_vm0, %v12518_v56 }
  0xf2   : > { %10205 = vmatprep.mubr.msk.bf16.mxu0 %vm1076_vm0, %v12521_v57 }
  0xf9   : > { %10206 = vmatmul.mubr.msk.bf16.gmra.mrb[104].mxu0 %vm1076_vm0, %v12528_v58 }
  0xfa   : > { %10209 = vmatprep.mubr.msk.bf16.mxu0 %vm1076_vm0, %v12531_v59 }
 0x101   : > { %10210 = vmatmul.mubr.msk.bf16.gmra.mrb[108].mxu0 %vm1076_vm0, %v12538_v60 }
 0x102   : > { %10213 = vmatprep.mubr.msk.bf16.mxu0 %vm1076_vm0, %v12541_v61 }
 0x109   : > { %10214 = vmatmul.mubr.msk.bf16.gmra.mrb[112].mxu0 %vm1076_vm0, %v12548_v62 }
 0x10a   : > { %10217 = vmatprep.mubr.msk.bf16.mxu0 %vm1076_vm0, %v12551_v63 }
 0x111   : > { %10218 = vmatmul.mubr.msk.bf16.gmra.mrb[116].mxu0 %vm1076_vm0, %v12558_v0 }
 0x112   : > { %10221 = vmatprep.mubr.msk.bf16.mxu0 %vm1076_vm0, %v12561_v1 }
 0x119   : > { %10222 = vmatmul.mubr.msk.bf16.gmra.mrb[120].mxu0 %vm1076_vm0, %v12568_v2 }
 0x11a   : > { %10225 = vmatprep.mubr.msk.bf16.mxu0 %vm1076_vm0, %v12571_v3  ;;  %v12601_v3 = vld [vmem:[%s12266_s16 + $0x220] sm:$0xff]  }
 0x11b   : > { %14503 = vst [vmem:[#allocation14_spill] sm:$0xff] %v12601_v3 }
 0x121   : > { %10226 = vmatmul.mubr.msk.bf16.gmra.mrb[124].mxu0 %vm1076_vm0, %v12578_v4  ;;  %v12611_v4 = vld [vmem:[%s12266_s16 + $0x230] sm:$0xff]  }
 0x122   : > { %10229 = vmatprep.mubr.msk.bf16.mxu0 %vm1076_vm0, %v12581_v5  ;;  %v12608_v5 = vld [vmem:[%s12266_s16 + $0x228] sm:$0xff]   ;;  %14505 = vst [vmem:[#allocation16_spill] sm:$0xff] %v12611_v4 }
 0x123   : > { %14504 = vst [vmem:[#allocation15_spill] sm:$0xff] %v12608_v5 }
 0x129   : > { %10230 = vmatmul.mubr.msk.bf16.gmra.mrb[128].mxu0 %vm1076_vm0, %v12588_v6  ;;  %v12621_v6 = vld [vmem:[%s12266_s16 + $0x240] sm:$0xff]  }
 0x12a   : > { %10233 = vmatprep.mubr.msk.bf16.mxu0 %vm1076_vm0, %v12591_v7  ;;  %v12618_v7 = vld [vmem:[%s12266_s16 + $0x238] sm:$0xff]   ;;  %14507 = vst [vmem:[#allocation18_spill] sm:$0xff] %v12621_v6 }
 0x12b   : > { %14506 = vst [vmem:[#allocation17_spill] sm:$0xff] %v12618_v7 }
 0x131   : > { %10234 = vmatmul.mubr.msk.bf16.gmra.mrb[132].mxu0 %vm1076_vm0, %v12598_v16  ;;  %v12631_v16 = vld [vmem:[%s12266_s16 + $0x250] sm:$0xff]  }
 0x132   : > { %10237 = vmatprep.mubr.msk.bf16.mxu0 %vm1076_vm0, %v12601_v3  ;;  %v12628_v3 = vld [vmem:[%s12266_s16 + $0x248] sm:$0xff]   ;;  %14509 = vst [vmem:[#allocation20_spill] sm:$0xff] %v12631_v16 }
 0x133   : > { %14508 = vst [vmem:[#allocation19_spill] sm:$0xff] %v12628_v3 }
 0x139   : > { %10238 = vmatmul.mubr.msk.bf16.gmra.mrb[136].mxu0 %vm1076_vm0, %v12608_v5  ;;  %v12641_v5 = vld [vmem:[%s12266_s16 + $0x260] sm:$0xff]  }
 0x13a   : > { %10241 = vmatprep.mubr.msk.bf16.mxu0 %vm1076_vm0, %v12611_v4  ;;  %v12638_v4 = vld [vmem:[%s12266_s16 + $0x258] sm:$0xff]   ;;  %14511 = vst [vmem:[#allocation22_spill] sm:$0xff] %v12641_v5 }
 0x13b   : > { %14510 = vst [vmem:[#allocation21_spill] sm:$0xff] %v12638_v4 }
 0x141   : > { %10242 = vmatmul.mubr.msk.bf16.gmra.mrb[140].mxu0 %vm1076_vm0, %v12618_v7  ;;  %v12670_v7 = vld [vmem:[%s12266_s16 + $0x10] sm:$0xff]  }
 0x142   : > { %10245 = vmatprep.mubr.msk.bf16.mxu0 %vm1076_vm0, %v12621_v6  ;;  %v12648_v6 = vld [vmem:[%s12266_s16 + $0x268] sm:$0xff]  }
 0x143   : > { %14512 = vst [vmem:[#allocation23_spill] sm:$0xff] %v12648_v6 }
 0x149   : > { %10246 = vmatmul.mubr.msk.bf16.gmra.mrb[144].mxu0 %vm1076_vm0, %v12628_v3  ;;  %v12651_v3 = vld [vmem:[%s12266_s16 + $0x270] sm:$0xff]  }
 0x14a   : > { %10249 = vmatprep.mubr.msk.bf16.mxu0 %vm1076_vm0, %v12631_v16  ;;  %14513 = vst [vmem:[#allocation24_spill] sm:$0xff] %v12651_v3  ;;  %v12658_v16 = vld [vmem:[%s12266_s16 + $0x278] sm:$0xff]  }
 0x14b   : > { %14514 = vst [vmem:[#allocation25_spill] sm:$0xff] %v12658_v16 }
 0x151   : > { %10250 = vmatmul.mubr.msk.bf16.gmra.mrb[148].mxu0 %vm1076_vm0, %v12638_v4  ;;  %v14478_v4 = vmov 0  }
 0x152   : > { %10253 = vmatprep.mubr.msk.bf16.mxu0 %vm1076_vm0, %v12641_v5  ;;  %v12042_v5 = vld [vmem:[%s12266_s16] sm:$0xff]  }
 0x159   : > { %10254 = vmatmul.mubr.msk.bf16.gmra.mrb[152].mxu0 %vm1076_vm0, %v12648_v6  ;;  %v12043_v6 = vld [vmem:[%s12266_s16 + $0x8] sm:$0xff]  }
 0x15a   : > { %10257 = vmatprep.mubr.msk.bf16.mxu0 %vm1076_vm0, %v12651_v3  ;;  %v12675_v3 = vld [vmem:[%s12266_s16 + $0x18] sm:$0xff]  }
 0x161   : > { %10258 = vmatmul.mubr.msk.bf16.gmra.mrb[156].mxu0 %vm1076_vm0, %v12658_v16  ;;  %v12680_v16 = vld [vmem:[%s12266_s16 + $0x20] sm:$0xff]  }
 0x162   : > { %10265 = vmatprep.mubr.bf16.mxu0 %v14478_v4 }
 0x169   : > { %10266 = vmatmul.mubr.bf16.vlgmr.msra.gmra.mrb[0].mxu0 %v14478_v4  ;;  %v14526_v4 = vld [vmem:[#allocation19_spill] sm:$0xff] }
 0x16a   : > { %10426 = vmatpush3.bf16.msra.mxu0 %v12512_v55  ;;  %10269 = vmatprep.mubr.msk.bf16.mxu0 %vm1076_vm0, %v12042_v5  ;;  %v11857_v55 = vld [vmem:[%s14495_s1 + $0x28] sm:$0xff]   ;;  %v14523_v5 = vld [vmem:[#allocation16_spill] sm:$0xff]  ;;  %s12062_s1 = scalar_lea.vmem %s12061_s17, 1024 }
 0x16b   : > { %10427 = vmatprep.subr.bf16.mxu0 %v11857_v55  ;;  %p12064_p1 = scmp.lt.s32.totalorder %s12062_s1, %s12056_s27 }
 0x16d   : > { %p12065_p2 = por %p12064_p1, %p12063_p0 }
 0x16e   : > { %10428 = vmatpush3.bf16.msra.mxu0 %v11857_v55  ;;  %v14525_v55 = vld [vmem:[#allocation18_spill] sm:$0xff] }
 0x16f   : > { %p12066_p3 = pnand %p12065_p2, %p12059_p13 }
 0x171   : > { %10270 = vmatmul.mubr.msk.bf16.gmra.mrb[4].mxu0 %vm1076_vm0, %v12043_v6  ;;  %v14524_v6 = vld [vmem:[#allocation17_spill] sm:$0xff] }
 0x172   : > { %10273 = vmatprep.mubr.msk.bf16.mxu0 %vm1076_vm0, %v12670_v7 }
 0x179   : > { %10274 = vmatmul.mubr.msk.bf16.gmra.mrb[8].mxu0 %vm1076_vm0, %v12675_v3 }
 0x17a   : > { %10277 = vmatprep.mubr.msk.bf16.mxu0 %vm1076_vm0, %v12680_v16 }
 0x181   : > { %10278 = vmatmul.mubr.msk.bf16.gmra.mrb[12].mxu0 %vm1076_vm0, %v12279_v8  ;;  %v14515_v8 = vld [vmem:[#allocation8_spill] sm:$0xff] }
 0x182   : > { %10281 = vmatprep.mubr.msk.bf16.mxu0 %vm1076_vm0, %v12282_v9  ;;  %v14516_v9 = vld [vmem:[#allocation9_spill] sm:$0xff] }
 0x189   : > { %10282 = vmatmul.mubr.msk.bf16.gmra.mrb[16].mxu0 %vm1076_vm0, %v12289_v10  ;;  %v14517_v10 = vld [vmem:[#allocation10_spill] sm:$0xff] }
 0x18a   : > { %10285 = vmatprep.mubr.msk.bf16.mxu0 %vm1076_vm0, %v12292_v11  ;;  %v14518_v11 = vld [vmem:[#allocation11_spill] sm:$0xff] }
 0x191   : > { %10286 = vmatmul.mubr.msk.bf16.gmra.mrb[20].mxu0 %vm1076_vm0, %v12299_v12  ;;  %v14519_v12 = vld [vmem:[#allocation12_spill] sm:$0xff] }
 0x192   : > { %10289 = vmatprep.mubr.msk.bf16.mxu0 %vm1076_vm0, %v12302_v13  ;;  %v14520_v13 = vld [vmem:[#allocation13_spill] sm:$0xff] }
 0x199   : > { %10290 = vmatmul.mubr.msk.bf16.gmra.mrb[24].mxu0 %vm1076_vm0, %v12309_v14  ;;  %v14521_v14 = vld [vmem:[#allocation14_spill] sm:$0xff] }
 0x19a   : > { %10293 = vmatprep.mubr.msk.bf16.mxu0 %vm1076_vm0, %v12312_v15  ;;  %v14522_v15 = vld [vmem:[#allocation15_spill] sm:$0xff] }
 0x1a1   : > { %10294 = vmatmul.mubr.msk.bf16.gmra.mrb[28].mxu0 %vm1076_vm0, %v12322_v17 }
 0x1a2   : > { %10297 = vmatprep.mubr.msk.bf16.mxu0 %vm1076_vm0, %v12325_v18 }
 0x1a9   : > { %10298 = vmatmul.mubr.msk.bf16.gmra.mrb[32].mxu0 %vm1076_vm0, %v12332_v19 }
 0x1aa   : > { %10301 = vmatprep.mubr.msk.bf16.mxu0 %vm1076_vm0, %v12335_v20 }
 0x1b1   : > { %10302 = vmatmul.mubr.msk.bf16.gmra.mrb[36].mxu0 %vm1076_vm0, %v12342_v21 }
 0x1b2   : > { %10305 = vmatprep.mubr.msk.bf16.mxu0 %vm1076_vm0, %v12345_v22 }
 0x1b9   : > { %10306 = vmatmul.mubr.msk.bf16.gmra.mrb[40].mxu0 %vm1076_vm0, %v12352_v23 }
 0x1ba   : > { %10309 = vmatprep.mubr.msk.bf16.mxu0 %vm1076_vm0, %v12355_v24 }
 0x1c1   : > { %10310 = vmatmul.mubr.msk.bf16.gmra.mrb[44].mxu0 %vm1076_vm0, %v12362_v25 }
 0x1c2   : > { %10313 = vmatprep.mubr.msk.bf16.mxu0 %vm1076_vm0, %v12365_v26 }
 0x1c9   : > { %10314 = vmatmul.mubr.msk.bf16.gmra.mrb[48].mxu0 %vm1076_vm0, %v12372_v27 }
 0x1ca   : > { %10317 = vmatprep.mubr.msk.bf16.mxu0 %vm1076_vm0, %v12375_v28 }
 0x1d1   : > { %10318 = vmatmul.mubr.msk.bf16.gmra.mrb[52].mxu0 %vm1076_vm0, %v12382_v29 }
 0x1d2   : > { %10321 = vmatprep.mubr.msk.bf16.mxu0 %vm1076_vm0, %v12385_v30 }
 0x1d9   : > { %10322 = vmatmul.mubr.msk.bf16.gmra.mrb[56].mxu0 %vm1076_vm0, %v12392_v31 }
 0x1da   : > { %10325 = vmatprep.mubr.msk.bf16.mxu0 %vm1076_vm0, %v12395_v32 }
 0x1e1   : > { %10326 = vmatmul.mubr.msk.bf16.gmra.mrb[60].mxu0 %vm1076_vm0, %v12402_v33 }
 0x1e2   : > { %10329 = vmatprep.mubr.msk.bf16.mxu0 %vm1076_vm0, %v12405_v34 }
 0x1e9   : > { %10330 = vmatmul.mubr.msk.bf16.gmra.mrb[64].mxu0 %vm1076_vm0, %v12412_v35 }
 0x1ea   : > { %10333 = vmatprep.mubr.msk.bf16.mxu0 %vm1076_vm0, %v12415_v36 }
 0x1f1   : > { %10334 = vmatmul.mubr.msk.bf16.gmra.mrb[68].mxu0 %vm1076_vm0, %v12422_v37 }
 0x1f2   : > { %10337 = vmatprep.mubr.msk.bf16.mxu0 %vm1076_vm0, %v12425_v38 }
 0x1f9   : > { %10338 = vmatmul.mubr.msk.bf16.gmra.mrb[72].mxu0 %vm1076_vm0, %v12432_v39 }
 0x1fa   : > { %10341 = vmatprep.mubr.msk.bf16.mxu0 %vm1076_vm0, %v12435_v40 }
 0x201   : > { %10342 = vmatmul.mubr.msk.bf16.gmra.mrb[76].mxu0 %vm1076_vm0, %v12442_v41 }
 0x202   : > { %10345 = vmatprep.mubr.msk.bf16.mxu0 %vm1076_vm0, %v12445_v42 }
 0x209   : > { %10346 = vmatmul.mubr.msk.bf16.gmra.mrb[80].mxu0 %vm1076_vm0, %v12452_v43 }
 0x20a   : > { %10349 = vmatprep.mubr.msk.bf16.mxu0 %vm1076_vm0, %v12455_v44 }
 0x211   : > { %10350 = vmatmul.mubr.msk.bf16.gmra.mrb[84].mxu0 %vm1076_vm0, %v12462_v45 }
 0x212   : > { %10353 = vmatprep.mubr.msk.bf16.mxu0 %vm1076_vm0, %v12465_v46 }
 0x219   : > { %10354 = vmatmul.mubr.msk.bf16.gmra.mrb[88].mxu0 %vm1076_vm0, %v12472_v47 }
 0x21a   : > { %10357 = vmatprep.mubr.msk.bf16.mxu0 %vm1076_vm0, %v12475_v48 }
 0x221   : > { %10358 = vmatmul.mubr.msk.bf16.gmra.mrb[92].mxu0 %vm1076_vm0, %v12482_v49 }
 0x222   : > { %10361 = vmatprep.mubr.msk.bf16.mxu0 %vm1076_vm0, %v12485_v50 }
 0x229   : > { %10362 = vmatmul.mubr.msk.bf16.gmra.mrb[96].mxu0 %vm1076_vm0, %v12492_v51 }
 0x22a   : > { %10365 = vmatprep.mubr.msk.bf16.mxu0 %vm1076_vm0, %v12495_v52 }
 0x231   : > { %10366 = vmatmul.mubr.msk.bf16.gmra.mrb[100].mxu0 %vm1076_vm0, %v12502_v53 }
 0x232   : > { %10369 = vmatprep.mubr.msk.bf16.mxu0 %vm1076_vm0, %v12505_v54 }
 0x239   : > { %10370 = vmatmul.mubr.msk.bf16.gmra.mrb[104].mxu0 %vm1076_vm0, %v12518_v56 }
 0x23a   : > { %10373 = vmatprep.mubr.msk.bf16.mxu0 %vm1076_vm0, %v12521_v57 }
 0x241   : > { %10374 = vmatmul.mubr.msk.bf16.gmra.mrb[108].mxu0 %vm1076_vm0, %v12528_v58 }
 0x242   : > { %10377 = vmatprep.mubr.msk.bf16.mxu0 %vm1076_vm0, %v12531_v59 }
 0x249   : > { %10378 = vmatmul.mubr.msk.bf16.gmra.mrb[112].mxu0 %vm1076_vm0, %v12538_v60 }
 0x24a   : > { %10381 = vmatprep.mubr.msk.bf16.mxu0 %vm1076_vm0, %v12541_v61 }
 0x251   : > { %10382 = vmatmul.mubr.msk.bf16.gmra.mrb[116].mxu0 %vm1076_vm0, %v12548_v62 }
 0x252   : > { %10385 = vmatprep.mubr.msk.bf16.mxu0 %vm1076_vm0, %v12551_v63 }
 0x259   : > { %10386 = vmatmul.mubr.msk.bf16.gmra.mrb[120].mxu0 %vm1076_vm0, %v12558_v0 }
 0x25a   : > { %10389 = vmatprep.mubr.msk.bf16.mxu0 %vm1076_vm0, %v12561_v1 }
 0x261   : > { %10390 = vmatmul.mubr.msk.bf16.gmra.mrb[124].mxu0 %vm1076_vm0, %v12568_v2 }
 0x262   : > { %10393 = vmatprep.mubr.msk.bf16.mxu0 %vm1076_vm0, %v14515_v8 }
 0x269   : > { %10394 = vmatmul.mubr.msk.bf16.gmra.mrb[128].mxu0 %vm1076_vm0, %v14516_v9 }
 0x26a   : > { %10397 = vmatprep.mubr.msk.bf16.mxu0 %vm1076_vm0, %v14517_v10 }
 0x271   : > { %10398 = vmatmul.mubr.msk.bf16.gmra.mrb[132].mxu0 %vm1076_vm0, %v14518_v11 }
 0x272   : > { %10401 = vmatprep.mubr.msk.bf16.mxu0 %vm1076_vm0, %v14519_v12 }
 0x279   : > { %10402 = vmatmul.mubr.msk.bf16.gmra.mrb[136].mxu0 %vm1076_vm0, %v14520_v13  ;;  %v14527_v13 = vld [vmem:[#allocation20_spill] sm:$0xff] }
 0x27a   : > { %10405 = vmatprep.mubr.msk.bf16.mxu0 %vm1076_vm0, %v14521_v14  ;;  %v14528_v14 = vld [vmem:[#allocation21_spill] sm:$0xff] }
 0x281   : > { %10406 = vmatmul.mubr.msk.bf16.gmra.mrb[140].mxu0 %vm1076_vm0, %v14522_v15  ;;  %v14529_v15 = vld [vmem:[#allocation22_spill] sm:$0xff] }
 0x282   : > { %10409 = vmatprep.mubr.msk.bf16.mxu0 %vm1076_vm0, %v14523_v5  ;;  %v14530_v5 = vld [vmem:[#allocation23_spill] sm:$0xff] }
 0x289   : > { %10410 = vmatmul.mubr.msk.bf16.gmra.mrb[144].mxu0 %vm1076_vm0, %v14524_v6 }
 0x28a   : > { %10413 = vmatprep.mubr.msk.bf16.mxu0 %vm1076_vm0, %v14525_v55 }
 0x291   : > { %10414 = vmatmul.mubr.msk.bf16.gmra.mrb[148].mxu0 %vm1076_vm0, %v14526_v4  ;;  %v12053_v4 = vld [vmem:[%s12266_s16 + $0x58] sm:$0xff]  }
 0x292   : > { %10417 = vmatprep.mubr.msk.bf16.mxu0 %vm1076_vm0, %v14527_v13  ;;  %v12047_v13 = vld [vmem:[%s12266_s16 + $0x28] sm:$0xff]  }
 0x299   : > { %10418 = vmatmul.mubr.msk.bf16.gmra.mrb[152].mxu0 %vm1076_vm0, %v14528_v14  ;;  %v12048_v14 = vld [vmem:[%s12266_s16 + $0x30] sm:$0xff]  }
 0x29a   : > { %10421 = vmatprep.mubr.msk.bf16.mxu0 %vm1076_vm0, %v14529_v15  ;;  %v12049_v15 = vld [vmem:[%s12266_s16 + $0x38] sm:$0xff]  }
 0x2a1   : > { %10422 = vmatmul.mubr.msk.bf16.gmra.mrb[156].mxu0 %vm1076_vm0, %v14530_v5  ;;  %v12050_v5 = vld [vmem:[%s12266_s16 + $0x40] sm:$0xff]  }
 0x2a2   : > { %10429 = vmatprep.mubr.msk.bf16.mxu0 %vm1076_vm0, %v12670_v7  ;;  %v12051_v7 = vld [vmem:[%s12266_s16 + $0x48] sm:$0xff]  }
 0x2a9   : > { %10430 = vmatmul.mubr.msk.bf16.vlgmr.msra.gmra.mrb[0].mxu0 %vm1076_vm0, %v12675_v3  ;;  %v12052_v3 = vld [vmem:[%s12266_s16 + $0x50] sm:$0xff]  }
 0x2aa   : > { %10433 = vmatprep.mubr.msk.bf16.mxu0 %vm1076_vm0, %v12680_v16  ;;  %v12054_v16 = vld [vmem:[%s12266_s16 + $0x60] sm:$0xff]  }
 0x2b1   : > { %10434 = vmatmul.mubr.msk.bf16.gmra.mrb[4].mxu0 %vm1076_vm0, %v12047_v13 }
 0x2b2   : > { %10437 = vmatprep.mubr.msk.bf16.mxu0 %vm1076_vm0, %v12048_v14 }
 0x2b9   : > { %10438 = vmatmul.mubr.msk.bf16.gmra.mrb[8].mxu0 %vm1076_vm0, %v12049_v15 }
 0x2ba   : > { %10441 = vmatprep.mubr.msk.bf16.mxu0 %vm1076_vm0, %v12050_v5 }
 0x2c1   : > { %10442 = vmatmul.mubr.msk.bf16.gmra.mrb[12].mxu0 %vm1076_vm0, %v12051_v7 }
 0x2c2   : > { %10445 = vmatprep.mubr.msk.bf16.mxu0 %vm1076_vm0, %v12052_v3 }
 0x2c9   : > { %10446 = vmatmul.mubr.msk.bf16.gmra.mrb[16].mxu0 %vm1076_vm0, %v12053_v4 }
 0x2ca   : > { %10449 = vmatprep.mubr.msk.bf16.mxu0 %vm1076_vm0, %v12054_v16 }
 0x2d1   : > { %10450 = vmatmul.mubr.msk.bf16.gmra.mrb[20].mxu0 %vm1076_vm0, %v12322_v17  ;;  %v11858_v17 = vld [vmem:[%s14428_s3 + $0x20] sm:$0xff]  }
 0x2d2   : > { %10453 = vmatprep.mubr.msk.bf16.mxu0 %vm1076_vm0, %v12325_v18  ;;  %10589 = vmatprep.subr.bf16.mxu1 %v11858_v17  ;;  %v11859_v18 = vld [vmem:[%s14428_s3 + $0x28] sm:$0xff]  }
 0x2d3   : > { %10590 = vmatpush3.bf16.msra.mxu1 %v11858_v17 }
 0x2d4   : > { %10591 = vmatprep.subr.bf16.mxu1 %v11859_v18 }
 0x2d7   : > { %10592 = vmatpush3.bf16.msra.mxu1 %v11859_v18 }
 0x2d9   : > { %10454 = vmatmul.mubr.msk.bf16.gmra.mrb[24].mxu0 %vm1076_vm0, %v12332_v19  ;;  %v11860_v19 = vld [vmem:[%s14428_s3 + $0x30] sm:$0xff]  }
 0x2da   : > { %10457 = vmatprep.mubr.msk.bf16.mxu0 %vm1076_vm0, %v12335_v20  ;;  %10593 = vmatprep.subr.bf16.mxu1 %v11860_v19  ;;  %v11861_v20 = vld [vmem:[%s14428_s3 + $0x38] sm:$0xff]  }
 0x2db   : > { %10594 = vmatpush3.bf16.msra.mxu1 %v11860_v19 }
 0x2dc   : > { %10595 = vmatprep.subr.bf16.mxu1 %v11861_v20 }
 0x2df   : > { %10596 = vmatpush3.bf16.msra.mxu1 %v11861_v20 }
 0x2e1   : > { %10458 = vmatmul.mubr.msk.bf16.gmra.mrb[28].mxu0 %vm1076_vm0, %v12342_v21  ;;  %v12958_v21 = vld [vmem:[%s14427_s2] ss:$0 sm:$0xff] }
 0x2e2   : > { %10461 = vmatprep.mubr.msk.bf16.mxu0 %vm1076_vm0, %v12345_v22 }
 0x2e9   : > { %10462 = vmatmul.mubr.msk.bf16.gmra.mrb[32].mxu0 %vm1076_vm0, %v12352_v23 }
 0x2ea   : > { %10465 = vmatprep.mubr.msk.bf16.mxu0 %vm1076_vm0, %v12355_v24 }
 0x2f1   : > { %10466 = vmatmul.mubr.msk.bf16.gmra.mrb[36].mxu0 %vm1076_vm0, %v12362_v25 }
 0x2f2   : > { %10469 = vmatprep.mubr.msk.bf16.mxu0 %vm1076_vm0, %v12365_v26 }
 0x2f9   : > { %10470 = vmatmul.mubr.msk.bf16.gmra.mrb[40].mxu0 %vm1076_vm0, %v12372_v27 }
 0x2fa   : > { %10473 = vmatprep.mubr.msk.bf16.mxu0 %vm1076_vm0, %v12375_v28 }
 0x301   : > { %10474 = vmatmul.mubr.msk.bf16.gmra.mrb[44].mxu0 %vm1076_vm0, %v12382_v29 }
 0x302   : > { %10477 = vmatprep.mubr.msk.bf16.mxu0 %vm1076_vm0, %v12385_v30 }
 0x309   : > { %10478 = vmatmul.mubr.msk.bf16.gmra.mrb[48].mxu0 %vm1076_vm0, %v12392_v31 }
 0x30a   : > { %10481 = vmatprep.mubr.msk.bf16.mxu0 %vm1076_vm0, %v12395_v32 }
 0x311   : > { %10482 = vmatmul.mubr.msk.bf16.gmra.mrb[52].mxu0 %vm1076_vm0, %v12402_v33 }
 0x312   : > { %10485 = vmatprep.mubr.msk.bf16.mxu0 %vm1076_vm0, %v12405_v34 }
 0x319   : > { %10486 = vmatmul.mubr.msk.bf16.gmra.mrb[56].mxu0 %vm1076_vm0, %v12412_v35 }
 0x31a   : > { %10489 = vmatprep.mubr.msk.bf16.mxu0 %vm1076_vm0, %v12415_v36 }
 0x321   : > { %10490 = vmatmul.mubr.msk.bf16.gmra.mrb[60].mxu0 %vm1076_vm0, %v12422_v37 }
 0x322   : > { %10493 = vmatprep.mubr.msk.bf16.mxu0 %vm1076_vm0, %v12425_v38 }
 0x329   : > { %10494 = vmatmul.mubr.msk.bf16.gmra.mrb[64].mxu0 %vm1076_vm0, %v12432_v39 }
 0x32a   : > { %10497 = vmatprep.mubr.msk.bf16.mxu0 %vm1076_vm0, %v12435_v40 }
 0x331   : > { %10498 = vmatmul.mubr.msk.bf16.gmra.mrb[68].mxu0 %vm1076_vm0, %v12442_v41 }
 0x332   : > { %10501 = vmatprep.mubr.msk.bf16.mxu0 %vm1076_vm0, %v12445_v42 }
 0x339   : > { %10502 = vmatmul.mubr.msk.bf16.gmra.mrb[72].mxu0 %vm1076_vm0, %v12452_v43 }
 0x33a   : > { %10505 = vmatprep.mubr.msk.bf16.mxu0 %vm1076_vm0, %v12455_v44 }
 0x341   : > { %10506 = vmatmul.mubr.msk.bf16.gmra.mrb[76].mxu0 %vm1076_vm0, %v12462_v45 }
 0x342   : > { %10509 = vmatprep.mubr.msk.bf16.mxu0 %vm1076_vm0, %v12465_v46 }
 0x349   : > { %10510 = vmatmul.mubr.msk.bf16.gmra.mrb[80].mxu0 %vm1076_vm0, %v12472_v47 }
 0x34a   : > { %10513 = vmatprep.mubr.msk.bf16.mxu0 %vm1076_vm0, %v12475_v48 }
 0x351   : > { %10514 = vmatmul.mubr.msk.bf16.gmra.mrb[84].mxu0 %vm1076_vm0, %v12482_v49 }
 0x352   : > { %10517 = vmatprep.mubr.msk.bf16.mxu0 %vm1076_vm0, %v12485_v50 }
 0x359   : > { %10518 = vmatmul.mubr.msk.bf16.gmra.mrb[88].mxu0 %vm1076_vm0, %v12492_v51 }
 0x35a   : > { %10521 = vmatprep.mubr.msk.bf16.mxu0 %vm1076_vm0, %v12495_v52 }
 0x361   : > { %10522 = vmatmul.mubr.msk.bf16.gmra.mrb[92].mxu0 %vm1076_vm0, %v12502_v53 }
 0x362   : > { %10525 = vmatprep.mubr.msk.bf16.mxu0 %vm1076_vm0, %v12505_v54 }
 0x369   : > { %10526 = vmatmul.mubr.msk.bf16.gmra.mrb[96].mxu0 %vm1076_vm0, %v12518_v56 }
 0x36a   : > { %10529 = vmatprep.mubr.msk.bf16.mxu0 %vm1076_vm0, %v12521_v57 }
 0x371   : > { %10530 = vmatmul.mubr.msk.bf16.gmra.mrb[100].mxu0 %vm1076_vm0, %v12528_v58 }
 0x372   : > { %10533 = vmatprep.mubr.msk.bf16.mxu0 %vm1076_vm0, %v12531_v59 }
 0x379   : > { %10534 = vmatmul.mubr.msk.bf16.gmra.mrb[104].mxu0 %vm1076_vm0, %v12538_v60 }
 0x37a   : > { %10537 = vmatprep.mubr.msk.bf16.mxu0 %vm1076_vm0, %v12541_v61 }
 0x37c   : > { %v10431_v22 = vpop.f32.mrb[0].mxu0 }
 0x37d   : > { %v2729_v23 = vpop.f32.mrb[1].mxu0  ;;  %v3537_v24 = vadd.f32 %v10431_v22, %v12958_v21 }
 0x37e   : > { %v10432_v25 = vpop.f32.mrb[2].mxu0  ;;  %v3535_v27 = vadd.f32 %v12958_v21, %v2729_v23 }
 0x37f   : > { %v2732_v26 = vpop.f32.mrb[3].mxu0  ;;  %v3857_v28 = vmul.f32 0.2, %v3537_v24  ;;  %v3538_v29 = vadd.f32 %v10432_v25, %v12958_v21  ;;  %vm3697_vm1 = vcmp.gt.f32.partialorder %v3537_v24, 0.0 }
 0x380   : > { %v3536_v30 = vadd.f32 %v12958_v21, %v2732_v26  ;;  %vm3695_vm2 = vcmp.gt.f32.partialorder %v3535_v27, 0.0  ;;  %v3855_v32 = vmul.f32 0.2, %v3535_v27 }
 0x381   : > { %10538 = vmatmul.mubr.msk.bf16.gmra.mrb[108].mxu0 %vm1076_vm0, %v12548_v62  ;;  %v4017_v35 = vsel %vm3697_vm1, %v3537_v24, %v3857_v28  ;;  %vm3698_vm3 = vcmp.gt.f32.partialorder %v3538_v29, 0.0  ;;  %v3858_v36 = vmul.f32 0.2, %v3538_v29 }
 0x382   : > { %10541 = vmatprep.mubr.msk.bf16.mxu0 %vm1076_vm0, %v12551_v63  ;;  %vm3696_vm4 = vcmp.gt.f32.partialorder %v3536_v30, 0.0  ;;  %v3856_v42 = vmul.f32 0.2, %v3536_v30  ;;  %v4015_v47 = vsel %vm3695_vm2, %v3535_v27, %v3855_v32 }
 0x383   : > { %v4018_v51 = vsel %vm3698_vm3, %v3538_v29, %v3858_v36 }
 0x384   : > { %v10435_v31 = vpop.f32.mrb[4].mxu0  ;;  %v4016_v57 = vsel %vm3696_vm4, %v3536_v30, %v3856_v42 }
 0x385   : > { %v3541_v33 = vadd.f32 %v10435_v31, %v12958_v21  ;;  %v2745_v34 = vpop.f32.mrb[5].mxu0 }
 0x386   : > { %v3539_v37 = vadd.f32 %v12958_v21, %v2745_v34  ;;  %v10436_v38 = vpop.f32.mrb[6].mxu0 }
 0x387   : > { %vm3701_vm5 = vcmp.gt.f32.partialorder %v3541_v33, 0.0  ;;  %v3861_v39 = vmul.f32 0.2, %v3541_v33  ;;  %v3542_v40 = vadd.f32 %v10436_v38, %v12958_v21  ;;  %v2748_v41 = vpop.f32.mrb[7].mxu0 }
 0x388   : > { %vm3699_vm6 = vcmp.gt.f32.partialorder %v3539_v37, 0.0  ;;  %v3859_v43 = vmul.f32 0.2, %v3539_v37  ;;  %v3540_v44 = vadd.f32 %v12958_v21, %v2748_v41 }
 0x389   : > { %v4021_v45 = vsel %vm3701_vm5, %v3541_v33, %v3861_v39  ;;  %vm3702_vm7 = vcmp.gt.f32.partialorder %v3542_v40, 0.0  ;;  %v3862_v46 = vmul.f32 0.2, %v3542_v40  ;;  %10542 = vmatmul.mubr.msk.bf16.gmra.mrb[112].mxu0 %vm1076_vm0, %v12558_v0 }
 0x38a   : > { %v4177_v48 = vmax.f32 %v4017_v35, %v4021_v45  ;;  %vm3700_vm8 = vcmp.gt.f32.partialorder %v3540_v44, 0.0  ;;  %v3860_v49 = vmul.f32 0.2, %v3540_v44  ;;  %10545 = vmatprep.mubr.msk.bf16.mxu0 %vm1076_vm0, %v12561_v1  ;;  %v4019_v50 = vsel %vm3699_vm6, %v3539_v37, %v3859_v43 }
 0x38b   : > { %v4022_v52 = vsel %vm3702_vm7, %v3542_v40, %v3862_v46  ;;  %v4175_v53 = vmax.f32 %v4015_v47, %v4019_v50 }
 0x38c   : > { %v4178_v54 = vmax.f32 %v4018_v51, %v4022_v52  ;;  %v10439_v56 = vpop.f32.mrb[8].mxu0  ;;  %v4020_v58 = vsel %vm3700_vm8, %v3540_v44, %v3860_v49 }
 0x38d   : > { %v2761_v59 = vpop.f32.mrb[9].mxu0  ;;  %v4176_v60 = vmax.f32 %v4016_v57, %v4020_v58  ;;  %v3545_v61 = vadd.f32 %v10439_v56, %v12958_v21 }
 0x38e   : > { %v10440_v62 = vpop.f32.mrb[10].mxu0  ;;  %v12980_v63 = vpack.c.bf16 %v4178_v54, %v4177_v48  ;;  %v3543_v0 = vadd.f32 %v12958_v21, %v2761_v59 }
 0x38f   : > { %v2764_v1 = vpop.f32.mrb[11].mxu0  ;;  %v12983_v4 = vpack.c.bf16 %v4176_v60, %v4175_v53  ;;  %v3865_v13 = vmul.f32 0.2, %v3545_v61  ;;  %v3546_v14 = vadd.f32 %v10440_v62, %v12958_v21  ;;  %vm3705_vm10 = vcmp.gt.f32.partialorder %v3545_v61, 0.0 }
 0x390   : > { %v3863_v15 = vmul.f32 0.2, %v3543_v0  ;;  %vm3703_vm11 = vcmp.gt.f32.partialorder %v3543_v0, 0.0  ;;  %v3544_v5 = vadd.f32 %v12958_v21, %v2764_v1  ;;  %v14531_v1 = vld [vmem:[#allocation13_spill] sm:$0xff] }
 0x391   : > { %10546 = vmatmul.mubr.msk.bf16.gmra.mrb[116].mxu0 %vm1076_vm0, %v12568_v2  ;;  %10597 = vmatprep.mubr.msk.bf16.mxu1 %vm4336_vm9, %v12983_v4  ;;  %v4025_v16 = vsel %vm3705_vm10, %v3545_v61, %v3865_v13  ;;  %vm3706_vm12 = vcmp.gt.f32.partialorder %v3546_v14, 0.0  ;;  %v3866_v17 = vmul.f32 0.2, %v3546_v14 }
 0x392   : > { %10598 = vmatmul.mubr.msk.bf16.vlgmr.msra.gmra.mrb[0].mxu1 %vm4336_vm9, %v12980_v63  ;;  %10549 = vmatprep.mubr.msk.bf16.mxu0 %vm1076_vm0, %v14515_v8  ;;  %v4023_v20 = vsel %vm3703_vm11, %v3543_v0, %v3863_v15  ;;  %v3864_v24 = vmul.f32 0.2, %v3544_v5  ;;  %vm3704_vm15 = vcmp.gt.f32.partialorder %v3544_v5, 0.0 }
 0x393   : > { %v4026_v32 = vsel %vm3706_vm12, %v3546_v14, %v3866_v17 }
 0x394   : > { %v10443_v7 = vpop.f32.mrb[12].mxu0  ;;  %v4024_v35 = vsel %vm3704_vm15, %v3544_v5, %v3864_v24  ;;  %v14532_v5 = vld [vmem:[#allocation14_spill] sm:$0xff] }
 0x395   : > { %v3549_v2 = vadd.f32 %v10443_v7, %v12958_v21  ;;  %v2777_v3 = vpop.f32.mrb[13].mxu0 }
 0x396   : > { %v3547_v18 = vadd.f32 %v12958_v21, %v2777_v3  ;;  %v10444_v19 = vpop.f32.mrb[14].mxu0 }
 0x397   : > { %vm3709_vm13 = vcmp.gt.f32.partialorder %v3549_v2, 0.0  ;;  %v3869_v22 = vmul.f32 0.2, %v3549_v2  ;;  %v3550_v8 = vadd.f32 %v10444_v19, %v12958_v21  ;;  %v2780_v23 = vpop.f32.mrb[15].mxu0 }
 0x398   : > { %vm3707_vm14 = vcmp.gt.f32.partialorder %v3547_v18, 0.0  ;;  %v3867_v25 = vmul.f32 0.2, %v3547_v18  ;;  %v3548_v26 = vadd.f32 %v12958_v21, %v2780_v23 }
 0x399   : > { %v4029_v27 = vsel %vm3709_vm13, %v3549_v2, %v3869_v22  ;;  %vm3710_vm1 = vcmp.gt.f32.partialorder %v3550_v8, 0.0  ;;  %v3870_v28 = vmul.f32 0.2, %v3550_v8  ;;  %10550 = vmatmul.mubr.msk.bf16.gmra.mrb[120].mxu0 %vm1076_vm0, %v14516_v9 }
 0x39a   : > { %v4181_v29 = vmax.f32 %v4025_v16, %v4029_v27  ;;  %v4027_v30 = vsel %vm3707_vm14, %v3547_v18, %v3867_v25  ;;  %vm3708_vm2 = vcmp.gt.f32.partialorder %v3548_v26, 0.0  ;;  %v3868_v31 = vmul.f32 0.2, %v3548_v26  ;;  %10553 = vmatprep.mubr.msk.bf16.mxu0 %vm1076_vm0, %v14517_v10 }
 0x39b   : > { %v4179_v33 = vmax.f32 %v4023_v20, %v4027_v30  ;;  %v4030_v34 = vsel %vm3710_vm1, %v3550_v8, %v3870_v28  ;;  %v11862_v8 = vld [vmem:[%s14428_s3] sm:$0xff]  }
 0x39c   : > { %v4182_v36 = vmax.f32 %v4026_v32, %v4030_v34  ;;  %v4028_v37 = vsel %vm3708_vm2, %v3548_v26, %v3868_v31  ;;  %v10447_v38 = vpop.f32.mrb[16].mxu0  ;;  %10677 = vmatprep.subr.bf16.mxu1 %v11862_v8  ;;  %v14534_v32 = vld [vmem:[#allocation16_spill] sm:$0xff] }
 0x39d   : > { %v4180_v39 = vmax.f32 %v4024_v35, %v4028_v37  ;;  %v2793_v40 = vpop.f32.mrb[17].mxu0  ;;  %v3553_v41 = vadd.f32 %v10447_v38, %v12958_v21  ;;  %10678 = vmatpush3.bf16.msra.mxu1 %v11862_v8 }
 0x39e   : > { %v10448_v9 = vpop.f32.mrb[18].mxu0  ;;  %v13005_v42 = vpack.c.bf16 %v4182_v36, %v4181_v29  ;;  %v3551_v43 = vadd.f32 %v12958_v21, %v2793_v40  ;;  %v14533_v29 = vld [vmem:[#allocation15_spill] sm:$0xff] }
 0x39f   : > { %v2796_v44 = vpop.f32.mrb[19].mxu0  ;;  %v13008_v45 = vpack.c.bf16 %v4180_v39, %v4179_v33  ;;  %v3873_v10 = vmul.f32 0.2, %v3553_v41  ;;  %v3554_v46 = vadd.f32 %v10448_v9, %v12958_v21  ;;  %vm3713_vm3 = vcmp.gt.f32.partialorder %v3553_v41, 0.0 }
 0x3a0   : > { %v3871_v47 = vmul.f32 0.2, %v3551_v43  ;;  %vm3711_vm4 = vcmp.gt.f32.partialorder %v3551_v43, 0.0  ;;  %v3552_v48 = vadd.f32 %v12958_v21, %v2796_v44 }
 0x3a1   : > { %10554 = vmatmul.mubr.msk.bf16.gmra.mrb[124].mxu0 %vm1076_vm0, %v14518_v11  ;;  %10601 = vmatprep.mubr.msk.bf16.mxu1 %vm4336_vm9, %v13008_v45  ;;  %v4033_v51 = vsel %vm3713_vm3, %v3553_v41, %v3873_v10  ;;  %vm3714_vm5 = vcmp.gt.f32.partialorder %v3554_v46, 0.0  ;;  %v3874_v52 = vmul.f32 0.2, %v3554_v46 }
 0x3a2   : > { %10602 = vmatmul.mubr.msk.bf16.gmra.mrb[4].mxu1 %vm4336_vm9, %v13005_v42  ;;  %10557 = vmatprep.mubr.msk.bf16.mxu0 %vm1076_vm0, %v14519_v12  ;;  %v4031_v56 = vsel %vm3711_vm4, %v3551_v43, %v3871_v47  ;;  %v3872_v59 = vmul.f32 0.2, %v3552_v48  ;;  %vm3712_vm8 = vcmp.gt.f32.partialorder %v3552_v48, 0.0 }
 0x3a3   : > { %v4034_v7 = vsel %vm3714_vm5, %v3554_v46, %v3874_v52 }
 0x3a4   : > { %v10451_v49 = vpop.f32.mrb[20].mxu0  ;;  %v4032_v16 = vsel %vm3712_vm8, %v3552_v48, %v3872_v59 }
 0x3a5   : > { %v3557_v11 = vadd.f32 %v10451_v49, %v12958_v21  ;;  %v2809_v50 = vpop.f32.mrb[21].mxu0 }
 0x3a6   : > { %v3555_v53 = vadd.f32 %v12958_v21, %v2809_v50  ;;  %v10452_v54 = vpop.f32.mrb[22].mxu0 }
 0x3a7   : > { %vm3717_vm6 = vcmp.gt.f32.partialorder %v3557_v11, 0.0  ;;  %v3877_v57 = vmul.f32 0.2, %v3557_v11  ;;  %v3558_v12 = vadd.f32 %v10452_v54, %v12958_v21  ;;  %v2812_v58 = vpop.f32.mrb[23].mxu0 }
 0x3a8   : > { %vm3715_vm7 = vcmp.gt.f32.partialorder %v3555_v53, 0.0  ;;  %v3875_v60 = vmul.f32 0.2, %v3555_v53  ;;  %v3556_v61 = vadd.f32 %v12958_v21, %v2812_v58 }
 0x3a9   : > { %v4037_v62 = vsel %vm3717_vm6, %v3557_v11, %v3877_v57  ;;  %vm3718_vm10 = vcmp.gt.f32.partialorder %v3558_v12, 0.0  ;;  %v3878_v0 = vmul.f32 0.2, %v3558_v12  ;;  %10558 = vmatmul.mubr.msk.bf16.gmra.mrb[128].mxu0 %vm1076_vm0, %v14531_v1 }
 0x3aa   : > { %v4185_v13 = vmax.f32 %v4033_v51, %v4037_v62  ;;  %v4035_v14 = vsel %vm3715_vm7, %v3555_v53, %v3875_v60  ;;  %vm3716_vm11 = vcmp.gt.f32.partialorder %v3556_v61, 0.0  ;;  %v3876_v15 = vmul.f32 0.2, %v3556_v61  ;;  %10561 = vmatprep.mubr.msk.bf16.mxu0 %vm1076_vm0, %v14532_v5 }
 0x3ab   : > { %v4183_v2 = vmax.f32 %v4031_v56, %v4035_v14  ;;  %v4038_v3 = vsel %vm3718_vm10, %v3558_v12, %v3878_v0 }
 0x3ac   : > { %v4186_v17 = vmax.f32 %v4034_v7, %v4038_v3  ;;  %v4036_v18 = vsel %vm3716_vm11, %v3556_v61, %v3876_v15  ;;  %v10455_v19 = vpop.f32.mrb[24].mxu0  ;;  %v14536_v7 = vld [vmem:[#allocation20_spill] sm:$0xff] }
 0x3ad   : > { %v4184_v20 = vmax.f32 %v4032_v16, %v4036_v18  ;;  %v2825_v22 = vpop.f32.mrb[25].mxu0  ;;  %v3561_v23 = vadd.f32 %v10455_v19, %v12958_v21 }
 0x3ae   : > { %v10456_v24 = vpop.f32.mrb[26].mxu0  ;;  %v13033_v25 = vpack.c.bf16 %v4186_v17, %v4185_v13  ;;  %v3559_v26 = vadd.f32 %v12958_v21, %v2825_v22 }
 0x3af   : > { %v2828_v27 = vpop.f32.mrb[27].mxu0  ;;  %v13036_v28 = vpack.c.bf16 %v4184_v20, %v4183_v2  ;;  %v3881_v30 = vmul.f32 0.2, %v3561_v23  ;;  %v3562_v31 = vadd.f32 %v10456_v24, %v12958_v21  ;;  %vm3721_vm12 = vcmp.gt.f32.partialorder %v3561_v23, 0.0 }
 0x3b0   : > { %v3879_v33 = vmul.f32 0.2, %v3559_v26  ;;  %vm3719_vm13 = vcmp.gt.f32.partialorder %v3559_v26, 0.0  ;;  %v3560_v34 = vadd.f32 %v12958_v21, %v2828_v27 }
 0x3b1   : > { %10562 = vmatmul.mubr.msk.bf16.gmra.mrb[132].mxu0 %vm1076_vm0, %v14533_v29  ;;  %10605 = vmatprep.mubr.msk.bf16.mxu1 %vm4336_vm9, %v13036_v28  ;;  %v4041_v38 = vsel %vm3721_vm12, %v3561_v23, %v3881_v30  ;;  %vm3722_vm14 = vcmp.gt.f32.partialorder %v3562_v31, 0.0  ;;  %v3882_v39 = vmul.f32 0.2, %v3562_v31 }
 0x3b2   : > { %10606 = vmatmul.mubr.msk.bf16.gmra.mrb[8].mxu1 %vm4336_vm9, %v13033_v25  ;;  %10565 = vmatprep.mubr.msk.bf16.mxu0 %vm1076_vm0, %v14534_v32  ;;  %v4039_v9 = vsel %vm3719_vm13, %v3559_v26, %v3879_v33  ;;  %v3880_v46 = vmul.f32 0.2, %v3560_v34  ;;  %vm3720_vm2 = vcmp.gt.f32.partialorder %v3560_v34, 0.0 }
 0x3b3   : > { %v4042_v53 = vsel %vm3722_vm14, %v3562_v31, %v3882_v39 }
 0x3b4   : > { %v10459_v35 = vpop.f32.mrb[28].mxu0  ;;  %v4040_v57 = vsel %vm3720_vm2, %v3560_v34, %v3880_v46  ;;  %v14537_v34 = vld [vmem:[#allocation21_spill] sm:$0xff] }
 0x3b5   : > { %v3565_v36 = vadd.f32 %v10459_v35, %v12958_v21  ;;  %v2841_v37 = vpop.f32.mrb[29].mxu0 }
 0x3b6   : > { %v3563_v40 = vadd.f32 %v12958_v21, %v2841_v37  ;;  %v10460_v41 = vpop.f32.mrb[30].mxu0 }
 0x3b7   : > { %vm3725_vm15 = vcmp.gt.f32.partialorder %v3565_v36, 0.0  ;;  %v3885_v43 = vmul.f32 0.2, %v3565_v36  ;;  %v3566_v44 = vadd.f32 %v10460_v41, %v12958_v21  ;;  %v2844_v10 = vpop.f32.mrb[31].mxu0 }
 0x3b8   : > { %vm3723_vm1 = vcmp.gt.f32.partialorder %v3563_v40, 0.0  ;;  %v3883_v47 = vmul.f32 0.2, %v3563_v40  ;;  %v3564_v48 = vadd.f32 %v12958_v21, %v2844_v10 }
 0x3b9   : > { %v4045_v49 = vsel %vm3725_vm15, %v3565_v36, %v3885_v43  ;;  %vm3726_vm3 = vcmp.gt.f32.partialorder %v3566_v44, 0.0  ;;  %v3886_v11 = vmul.f32 0.2, %v3566_v44  ;;  %10566 = vmatmul.mubr.msk.bf16.gmra.mrb[136].mxu0 %vm1076_vm0, %v14524_v6 }
 0x3ba   : > { %v4189_v50 = vmax.f32 %v4041_v38, %v4045_v49  ;;  %v4043_v51 = vsel %vm3723_vm1, %v3563_v40, %v3883_v47  ;;  %vm3724_vm4 = vcmp.gt.f32.partialorder %v3564_v48, 0.0  ;;  %v3884_v52 = vmul.f32 0.2, %v3564_v48  ;;  %10569 = vmatprep.mubr.msk.bf16.mxu0 %vm1076_vm0, %v14525_v55  ;;  %v14535_v55 = vld [vmem:[#allocation19_spill] sm:$0xff]  ;;  %v14538_v38 = vld [vmem:[#allocation22_spill] sm:$0xff] }
 0x3bb   : > { %v4187_v54 = vmax.f32 %v4039_v9, %v4043_v51  ;;  %v4046_v56 = vsel %vm3726_vm3, %v3566_v44, %v3886_v11 }
 0x3bc   : > { %v4190_v12 = vmax.f32 %v4042_v53, %v4046_v56  ;;  %v4044_v58 = vsel %vm3724_vm4, %v3564_v48, %v3884_v52  ;;  %v10463_v59 = vpop.f32.mrb[32].mxu0  ;;  %v14539_v53 = vld [vmem:[#allocation23_spill] sm:$0xff] }
 0x3bd   : > { %v4188_v60 = vmax.f32 %v4040_v57, %v4044_v58  ;;  %v2857_v61 = vpop.f32.mrb[33].mxu0  ;;  %v3569_v62 = vadd.f32 %v10463_v59, %v12958_v21  ;;  %v14540_v57 = vld [vmem:[#allocation24_spill] sm:$0xff] }
 0x3be   : > { %v10464_v6 = vpop.f32.mrb[34].mxu0  ;;  %v13058_v0 = vpack.c.bf16 %v4190_v12, %v4189_v50  ;;  %v3567_v1 = vadd.f32 %v12958_v21, %v2857_v61 }
 0x3bf   : > { %v2860_v13 = vpop.f32.mrb[35].mxu0  ;;  %v13061_v14 = vpack.c.bf16 %v4188_v60, %v4187_v54  ;;  %v3889_v15 = vmul.f32 0.2, %v3569_v62  ;;  %v3570_v5 = vadd.f32 %v10464_v6, %v12958_v21  ;;  %vm3729_vm5 = vcmp.gt.f32.partialorder %v3569_v62, 0.0  ;;  %v11863_v60 = vld [vmem:[%s14428_s3 + $0x8] sm:$0xff]  }
 0x3c0   : > { %v3887_v2 = vmul.f32 0.2, %v3567_v1  ;;  %vm3727_vm6 = vcmp.gt.f32.partialorder %v3567_v1, 0.0  ;;  %v3568_v3 = vadd.f32 %v12958_v21, %v2860_v13  ;;  %10679 = vmatprep.subr.bf16.mxu1 %v11863_v60 }
 0x3c1   : > { %10570 = vmatmul.mubr.msk.bf16.gmra.mrb[140].mxu0 %vm1076_vm0, %v14535_v55  ;;  %10609 = vmatprep.mubr.msk.bf16.mxu1 %vm4336_vm9, %v13061_v14  ;;  %v4049_v19 = vsel %vm3729_vm5, %v3569_v62, %v3889_v15  ;;  %vm3730_vm7 = vcmp.gt.f32.partialorder %v3570_v5, 0.0  ;;  %v3890_v20 = vmul.f32 0.2, %v3570_v5 }
 0x3c2   : > { %10610 = vmatmul.mubr.msk.bf16.gmra.mrb[12].mxu1 %vm4336_vm9, %v13058_v0  ;;  %10573 = vmatprep.mubr.msk.bf16.mxu0 %vm1076_vm0, %v14536_v7  ;;  %v4047_v23 = vsel %vm3727_vm6, %v3567_v1, %v3887_v2  ;;  %v3888_v29 = vmul.f32 0.2, %v3568_v3  ;;  %vm3728_vm11 = vcmp.gt.f32.partialorder %v3568_v3, 0.0 }
 0x3c3   : > { %v4050_v39 = vsel %vm3730_vm7, %v3570_v5, %v3890_v20  ;;  %10680 = vmatpush3.bf16.msra.mxu1 %v11863_v60  ;;  %v14541_v20 = vld [vmem:[#allocation25_spill] sm:$0xff] }
 0x3c4   : > { %v10467_v16 = vpop.f32.mrb[36].mxu0  ;;  %v4048_v9 = vsel %vm3728_vm11, %v3568_v3, %v3888_v29 }
 0x3c5   : > { %v3573_v17 = vadd.f32 %v10467_v16, %v12958_v21  ;;  %v2873_v18 = vpop.f32.mrb[37].mxu0 }
 0x3c6   : > { %v3571_v22 = vadd.f32 %v12958_v21, %v2873_v18  ;;  %v10468_v8 = vpop.f32.mrb[38].mxu0 }
 0x3c7   : > { %vm3733_vm8 = vcmp.gt.f32.partialorder %v3573_v17, 0.0  ;;  %v3893_v24 = vmul.f32 0.2, %v3573_v17  ;;  %v3574_v26 = vadd.f32 %v10468_v8, %v12958_v21  ;;  %v2876_v27 = vpop.f32.mrb[39].mxu0 }
 0x3c8   : > { %vm3731_vm10 = vcmp.gt.f32.partialorder %v3571_v22, 0.0  ;;  %v3891_v30 = vmul.f32 0.2, %v3571_v22  ;;  %v3572_v31 = vadd.f32 %v12958_v21, %v2876_v27 }
 0x3c9   : > { %v4053_v32 = vsel %vm3733_vm8, %v3573_v17, %v3893_v24  ;;  %vm3734_vm12 = vcmp.gt.f32.partialorder %v3574_v26, 0.0  ;;  %v3894_v33 = vmul.f32 0.2, %v3574_v26  ;;  %10574 = vmatmul.mubr.msk.bf16.gmra.mrb[144].mxu0 %vm1076_vm0, %v14537_v34  ;;  %v14542_v24 = vmov 0  }
 0x3ca   : > { %v4193_v35 = vmax.f32 %v4049_v19, %v4053_v32  ;;  %v4051_v36 = vsel %vm3731_vm10, %v3571_v22, %v3891_v30  ;;  %vm3732_vm13 = vcmp.gt.f32.partialorder %v3572_v31, 0.0  ;;  %v3892_v37 = vmul.f32 0.2, %v3572_v31  ;;  %10577 = vmatprep.mubr.msk.bf16.mxu0 %vm1076_vm0, %v14538_v38 }
 0x3cb   : > { %v4191_v40 = vmax.f32 %v4047_v23, %v4051_v36  ;;  %v4054_v41 = vsel %vm3734_vm12, %v3574_v26, %v3894_v33 }
 0x3cc   : > { %v4194_v43 = vmax.f32 %v4050_v39, %v4054_v41  ;;  %v4052_v44 = vsel %vm3732_vm13, %v3572_v31, %v3892_v37  ;;  %v10471_v10 = vpop.f32.mrb[40].mxu0 }
 0x3cd   : > { %v4192_v46 = vmax.f32 %v4048_v9, %v4052_v44  ;;  %v2889_v47 = vpop.f32.mrb[41].mxu0  ;;  %v3577_v48 = vadd.f32 %v10471_v10, %v12958_v21 }
 0x3ce   : > { %v10472_v49 = vpop.f32.mrb[42].mxu0  ;;  %v13083_v11 = vpack.c.bf16 %v4194_v43, %v4193_v35  ;;  %v3575_v50 = vadd.f32 %v12958_v21, %v2889_v47 }
 0x3cf   : > { %v2892_v51 = vpop.f32.mrb[43].mxu0  ;;  %v13086_v52 = vpack.c.bf16 %v4192_v46, %v4191_v40  ;;  %v3897_v54 = vmul.f32 0.2, %v3577_v48  ;;  %v3578_v56 = vadd.f32 %v10472_v49, %v12958_v21  ;;  %vm3737_vm14 = vcmp.gt.f32.partialorder %v3577_v48, 0.0 }
 0x3d0   : > { %v3895_v12 = vmul.f32 0.2, %v3575_v50  ;;  %vm3735_vm15 = vcmp.gt.f32.partialorder %v3575_v50, 0.0  ;;  %v3576_v58 = vadd.f32 %v12958_v21, %v2892_v51 }
 0x3d1   : > { %10578 = vmatmul.mubr.msk.bf16.gmra.mrb[148].mxu0 %vm1076_vm0, %v14539_v53  ;;  %10613 = vmatprep.mubr.msk.bf16.mxu1 %vm4336_vm9, %v13086_v52  ;;  %v4057_v6 = vsel %vm3737_vm14, %v3577_v48, %v3897_v54  ;;  %vm3738_vm1 = vcmp.gt.f32.partialorder %v3578_v56, 0.0  ;;  %v3898_v1 = vmul.f32 0.2, %v3578_v56 }
 0x3d2   : > { %10614 = vmatmul.mubr.msk.bf16.gmra.mrb[16].mxu1 %vm4336_vm9, %v13083_v11  ;;  %10581 = vmatprep.mubr.msk.bf16.mxu0 %vm1076_vm0, %v14540_v57  ;;  %v4055_v15 = vsel %vm3735_vm15, %v3575_v50, %v3895_v12  ;;  %v3896_v3 = vmul.f32 0.2, %v3576_v58  ;;  %vm3736_vm4 = vcmp.gt.f32.partialorder %v3576_v58, 0.0 }
 0x3d3   : > { %v4058_v26 = vsel %vm3738_vm1, %v3578_v56, %v3898_v1 }
 0x3d4   : > { %v10475_v59 = vpop.f32.mrb[44].mxu0  ;;  %v4056_v30 = vsel %vm3736_vm4, %v3576_v58, %v3896_v3 }
 0x3d5   : > { %v3581_v61 = vadd.f32 %v10475_v59, %v12958_v21  ;;  %v2905_v62 = vpop.f32.mrb[45].mxu0 }
 0x3d6   : > { %v3579_v13 = vadd.f32 %v12958_v21, %v2905_v62  ;;  %v10476_v55 = vpop.f32.mrb[46].mxu0 }
 0x3d7   : > { %vm3741_vm2 = vcmp.gt.f32.partialorder %v3581_v61, 0.0  ;;  %v3901_v5 = vmul.f32 0.2, %v3581_v61  ;;  %v3582_v7 = vadd.f32 %v10476_v55, %v12958_v21  ;;  %v2908_v2 = vpop.f32.mrb[47].mxu0 }
 0x3d8   : > { %vm3739_vm3 = vcmp.gt.f32.partialorder %v3579_v13, 0.0  ;;  %v3899_v16 = vmul.f32 0.2, %v3579_v13  ;;  %v3580_v17 = vadd.f32 %v12958_v21, %v2908_v2 }
 0x3d9   : > { %v4061_v18 = vsel %vm3741_vm2, %v3581_v61, %v3901_v5  ;;  %vm3742_vm5 = vcmp.gt.f32.partialorder %v3582_v7, 0.0  ;;  %v3902_v19 = vmul.f32 0.2, %v3582_v7  ;;  %10582 = vmatmul.mubr.msk.bf16.gmra.mrb[152].mxu0 %vm1076_vm0, %v14541_v20 }
 0x3da   : > { %v4197_v22 = vmax.f32 %v4057_v6, %v4061_v18  ;;  %v4059_v8 = vsel %vm3739_vm3, %v3579_v13, %v3899_v16  ;;  %vm3740_vm6 = vcmp.gt.f32.partialorder %v3580_v17, 0.0  ;;  %v3900_v23 = vmul.f32 0.2, %v3580_v17  ;;  %10585 = vmatprep.mubr.bf16.mxu0 %v14542_v24 }
 0x3db   : > { %v4195_v27 = vmax.f32 %v4055_v15, %v4059_v8  ;;  %v4062_v29 = vsel %vm3742_vm5, %v3582_v7, %v3902_v19 }
 0x3dc   : > { %v4198_v31 = vmax.f32 %v4058_v26, %v4062_v29  ;;  %v4060_v32 = vsel %vm3740_vm6, %v3580_v17, %v3900_v23  ;;  %v10479_v33 = vpop.f32.mrb[48].mxu0 }
 0x3dd   : > { %v4196_v34 = vmax.f32 %v4056_v30, %v4060_v32  ;;  %v2921_v35 = vpop.f32.mrb[49].mxu0  ;;  %v3585_v36 = vadd.f32 %v10479_v33, %v12958_v21 }
 0x3de   : > { %v10480_v37 = vpop.f32.mrb[50].mxu0  ;;  %v13110_v38 = vpack.c.bf16 %v4198_v31, %v4197_v22  ;;  %v3583_v39 = vadd.f32 %v12958_v21, %v2921_v35 }
 0x3df   : > { %v2924_v40 = vpop.f32.mrb[51].mxu0  ;;  %v13113_v41 = vpack.c.bf16 %v4196_v34, %v4195_v27  ;;  %v3905_v9 = vmul.f32 0.2, %v3585_v36  ;;  %v3586_v43 = vadd.f32 %v10480_v37, %v12958_v21  ;;  %vm3745_vm0 = vcmp.gt.f32.partialorder %v3585_v36, 0.0 }
 0x3e0   : > { %v3903_v44 = vmul.f32 0.2, %v3583_v39  ;;  %vm3743_vm7 = vcmp.gt.f32.partialorder %v3583_v39, 0.0  ;;  %v3584_v10 = vadd.f32 %v12958_v21, %v2924_v40 }
 0x3e1   : > { %10586 = vmatmul.mubr.bf16.gmra.mrb[156].mxu0 %v14542_v24  ;;  %10617 = vmatprep.mubr.msk.bf16.mxu1 %vm4336_vm9, %v13113_v41  ;;  %v4065_v49 = vsel %vm3745_vm0, %v3585_v36, %v3905_v9  ;;  %vm3746_vm8 = vcmp.gt.f32.partialorder %v3586_v43, 0.0  ;;  %v3906_v50 = vmul.f32 0.2, %v3586_v43 }
 0x3e2   : > { %10618 = vmatmul.mubr.msk.bf16.gmra.mrb[20].mxu1 %vm4336_vm9, %v13110_v38  ;;  %v4063_v54 = vsel %vm3743_vm7, %v3583_v39, %v3903_v44  ;;  %v3904_v58 = vmul.f32 0.2, %v3584_v10  ;;  %vm3744_vm12 = vcmp.gt.f32.partialorder %v3584_v10, 0.0 }
 0x3e3   : > { %v4066_v55 = vsel %vm3746_vm8, %v3586_v43, %v3906_v50 }
 0x3e4   : > { %v10483_v46 = vpop.f32.mrb[52].mxu0  ;;  %v4064_v7 = vsel %vm3744_vm12, %v3584_v10, %v3904_v58 }
 0x3e5   : > { %v3589_v47 = vadd.f32 %v10483_v46, %v12958_v21  ;;  %v2937_v48 = vpop.f32.mrb[53].mxu0 }
 0x3e6   : > { %v3587_v51 = vadd.f32 %v12958_v21, %v2937_v48  ;;  %v10484_v53 = vpop.f32.mrb[54].mxu0 }
 0x3e7   : > { %vm3749_vm10 = vcmp.gt.f32.partialorder %v3589_v47, 0.0  ;;  %v3909_v56 = vmul.f32 0.2, %v3589_v47  ;;  %v3590_v57 = vadd.f32 %v10484_v53, %v12958_v21  ;;  %v2940_v12 = vpop.f32.mrb[55].mxu0 }
 0x3e8   : > { %vm3747_vm11 = vcmp.gt.f32.partialorder %v3587_v51, 0.0  ;;  %v3907_v59 = vmul.f32 0.2, %v3587_v51  ;;  %v3588_v60 = vadd.f32 %v12958_v21, %v2940_v12 }
 0x3e9   : > { %v4069_v61 = vsel %vm3749_vm10, %v3589_v47, %v3909_v56  ;;  %vm3750_vm13 = vcmp.gt.f32.partialorder %v3590_v57, 0.0  ;;  %v3910_v62 = vmul.f32 0.2, %v3590_v57 }
 0x3ea   : > { %v4201_v6 = vmax.f32 %v4065_v49, %v4069_v61  ;;  %v4067_v1 = vsel %vm3747_vm11, %v3587_v51, %v3907_v59  ;;  %vm3748_vm14 = vcmp.gt.f32.partialorder %v3588_v60, 0.0  ;;  %v3908_v13 = vmul.f32 0.2, %v3588_v60 }
 0x3eb   : > { %v4199_v15 = vmax.f32 %v4063_v54, %v4067_v1  ;;  %v4070_v5 = vsel %vm3750_vm13, %v3590_v57, %v3910_v62 }
 0x3ec   : > { %v4202_v2 = vmax.f32 %v4066_v55, %v4070_v5  ;;  %v4068_v3 = vsel %vm3748_vm14, %v3588_v60, %v3908_v13  ;;  %v10487_v16 = vpop.f32.mrb[56].mxu0 }
 0x3ed   : > { %v4200_v17 = vmax.f32 %v4064_v7, %v4068_v3  ;;  %v2953_v18 = vpop.f32.mrb[57].mxu0  ;;  %v3593_v19 = vadd.f32 %v10487_v16, %v12958_v21 }
 0x3ee   : > { %v10488_v20 = vpop.f32.mrb[58].mxu0  ;;  %v13128_v22 = vpack.c.bf16 %v4202_v2, %v4201_v6  ;;  %v3591_v8 = vadd.f32 %v12958_v21, %v2953_v18  ;;  %v11864_v6 = vld [vmem:[%s14428_s3 + $0x10] sm:$0xff]  }
 0x3ef   : > { %v2956_v23 = vpop.f32.mrb[59].mxu0  ;;  %v13131_v26 = vpack.c.bf16 %v4200_v17, %v4199_v15  ;;  %v3913_v27 = vmul.f32 0.2, %v3593_v19  ;;  %v3594_v29 = vadd.f32 %v10488_v20, %v12958_v21  ;;  %vm3753_vm15 = vcmp.gt.f32.partialorder %v3593_v19, 0.0  ;;  %10681 = vmatprep.subr.bf16.mxu1 %v11864_v6 }
 0x3f0   : > { %v3911_v30 = vmul.f32 0.2, %v3591_v8  ;;  %vm3751_vm1 = vcmp.gt.f32.partialorder %v3591_v8, 0.0  ;;  %v3592_v31 = vadd.f32 %v12958_v21, %v2956_v23  ;;  %10682 = vmatpush3.bf16.msra.mxu1 %v11864_v6 }
 0x3f1   : > { %10621 = vmatprep.mubr.msk.bf16.mxu1 %vm4336_vm9, %v13131_v26  ;;  %v4073_v35 = vsel %vm3753_vm15, %v3593_v19, %v3913_v27  ;;  %vm3754_vm2 = vcmp.gt.f32.partialorder %v3594_v29, 0.0  ;;  %v3914_v36 = vmul.f32 0.2, %v3594_v29 }
 0x3f2   : > { %10622 = vmatmul.mubr.msk.bf16.gmra.mrb[24].mxu1 %vm4336_vm9, %v13128_v22  ;;  %v4071_v40 = vsel %vm3751_vm1, %v3591_v8, %v3911_v30  ;;  %v3912_v10 = vmul.f32 0.2, %v3592_v31  ;;  %vm3752_vm5 = vcmp.gt.f32.partialorder %v3592_v31, 0.0 }
 0x3f3   : > { %v4074_v54 = vsel %vm3754_vm2, %v3594_v29, %v3914_v36 }
 0x3f4   : > { %v10491_v32 = vpop.f32.mrb[60].mxu0  ;;  %v4072_v12 = vsel %vm3752_vm5, %v3592_v31, %v3912_v10 }
 0x3f5   : > { %v3597_v33 = vadd.f32 %v10491_v32, %v12958_v21  ;;  %v2969_v34 = vpop.f32.mrb[61].mxu0 }
 0x3f6   : > { %v3595_v37 = vadd.f32 %v12958_v21, %v2969_v34  ;;  %v10492_v39 = vpop.f32.mrb[62].mxu0 }
 0x3f7   : > { %vm3757_vm3 = vcmp.gt.f32.partialorder %v3597_v33, 0.0  ;;  %v3917_v9 = vmul.f32 0.2, %v3597_v33  ;;  %v3598_v43 = vadd.f32 %v10492_v39, %v12958_v21  ;;  %v2972_v44 = vpop.f32.mrb[63].mxu0 }
 0x3f8   : > { %vm3755_vm4 = vcmp.gt.f32.partialorder %v3595_v37, 0.0  ;;  %v3915_v46 = vmul.f32 0.2, %v3595_v37  ;;  %v3596_v47 = vadd.f32 %v12958_v21, %v2972_v44 }
 0x3f9   : > { %v4077_v48 = vsel %vm3757_vm3, %v3597_v33, %v3917_v9  ;;  %vm3758_vm6 = vcmp.gt.f32.partialorder %v3598_v43, 0.0  ;;  %v3918_v49 = vmul.f32 0.2, %v3598_v43 }
 0x3fa   : > { %v4205_v50 = vmax.f32 %v4073_v35, %v4077_v48  ;;  %v4075_v51 = vsel %vm3755_vm4, %v3595_v37, %v3915_v46  ;;  %vm3756_vm0 = vcmp.gt.f32.partialorder %v3596_v47, 0.0  ;;  %v3916_v53 = vmul.f32 0.2, %v3596_v47 }
 0x3fb   : > { %v4203_v56 = vmax.f32 %v4071_v40, %v4075_v51  ;;  %v4078_v57 = vsel %vm3758_vm6, %v3598_v43, %v3918_v49 }
 0x3fc   : > { %v4206_v58 = vmax.f32 %v4074_v54, %v4078_v57  ;;  %v4076_v59 = vsel %vm3756_vm0, %v3596_v47, %v3916_v53  ;;  %v10495_v60 = vpop.f32.mrb[64].mxu0 }
 0x3fd   : > { %v4204_v61 = vmax.f32 %v4072_v12, %v4076_v59  ;;  %v2985_v62 = vpop.f32.mrb[65].mxu0  ;;  %v3601_v1 = vadd.f32 %v10495_v60, %v12958_v21 }
 0x3fe   : > { %v10496_v13 = vpop.f32.mrb[66].mxu0  ;;  %v13148_v55 = vpack.c.bf16 %v4206_v58, %v4205_v50  ;;  %v3599_v15 = vadd.f32 %v12958_v21, %v2985_v62 }
 0x3ff   : > { %v2988_v5 = vpop.f32.mrb[67].mxu0  ;;  %v13151_v7 = vpack.c.bf16 %v4204_v61, %v4203_v56  ;;  %v3921_v2 = vmul.f32 0.2, %v3601_v1  ;;  %v3602_v3 = vadd.f32 %v10496_v13, %v12958_v21  ;;  %vm3761_vm7 = vcmp.gt.f32.partialorder %v3601_v1, 0.0 }
 0x400   : > { %v3919_v16 = vmul.f32 0.2, %v3599_v15  ;;  %vm3759_vm8 = vcmp.gt.f32.partialorder %v3599_v15, 0.0  ;;  %v3600_v17 = vadd.f32 %v12958_v21, %v2988_v5 }
 0x401   : > { %10625 = vmatprep.mubr.msk.bf16.mxu1 %vm4336_vm9, %v13151_v7  ;;  %v4081_v8 = vsel %vm3761_vm7, %v3601_v1, %v3921_v2  ;;  %vm3762_vm10 = vcmp.gt.f32.partialorder %v3602_v3, 0.0  ;;  %v3922_v23 = vmul.f32 0.2, %v3602_v3 }
 0x402   : > { %10626 = vmatmul.mubr.msk.bf16.gmra.mrb[28].mxu1 %vm4336_vm9, %v13148_v55  ;;  %v4079_v30 = vsel %vm3759_vm8, %v3599_v15, %v3919_v16  ;;  %v3920_v34 = vmul.f32 0.2, %v3600_v17  ;;  %vm3760_vm13 = vcmp.gt.f32.partialorder %v3600_v17, 0.0 }
 0x403   : > { %v4082_v44 = vsel %vm3762_vm10, %v3602_v3, %v3922_v23 }
 0x404   : > { %v10499_v18 = vpop.f32.mrb[68].mxu0  ;;  %v4080_v47 = vsel %vm3760_vm13, %v3600_v17, %v3920_v34 }
 0x405   : > { %v3605_v19 = vadd.f32 %v10499_v18, %v12958_v21  ;;  %v3001_v20 = vpop.f32.mrb[69].mxu0 }
 0x406   : > { %v3603_v27 = vadd.f32 %v12958_v21, %v3001_v20  ;;  %v10500_v29 = vpop.f32.mrb[70].mxu0 }
 0x407   : > { %vm3765_vm11 = vcmp.gt.f32.partialorder %v3605_v19, 0.0  ;;  %v3925_v31 = vmul.f32 0.2, %v3605_v19  ;;  %v3606_v32 = vadd.f32 %v10500_v29, %v12958_v21  ;;  %v3004_v33 = vpop.f32.mrb[71].mxu0 }
 0x408   : > { %vm3763_vm12 = vcmp.gt.f32.partialorder %v3603_v27, 0.0  ;;  %v3923_v35 = vmul.f32 0.2, %v3603_v27  ;;  %v3604_v36 = vadd.f32 %v12958_v21, %v3004_v33 }
 0x409   : > { %v4085_v37 = vsel %vm3765_vm11, %v3605_v19, %v3925_v31  ;;  %vm3766_vm14 = vcmp.gt.f32.partialorder %v3606_v32, 0.0  ;;  %v3926_v39 = vmul.f32 0.2, %v3606_v32 }
 0x40a   : > { %v4209_v40 = vmax.f32 %v4081_v8, %v4085_v37  ;;  %v4083_v9 = vsel %vm3763_vm12, %v3603_v27, %v3923_v35  ;;  %vm3764_vm15 = vcmp.gt.f32.partialorder %v3604_v36, 0.0  ;;  %v3924_v43 = vmul.f32 0.2, %v3604_v36 }
 0x40b   : > { %v4207_v10 = vmax.f32 %v4079_v30, %v4083_v9  ;;  %v4086_v46 = vsel %vm3766_vm14, %v3606_v32, %v3926_v39 }
 0x40c   : > { %v4210_v48 = vmax.f32 %v4082_v44, %v4086_v46  ;;  %v4084_v49 = vsel %vm3764_vm15, %v3604_v36, %v3924_v43  ;;  %v10503_v50 = vpop.f32.mrb[72].mxu0 }
 0x40d   : > { %v4208_v51 = vmax.f32 %v4080_v47, %v4084_v49  ;;  %v3017_v53 = vpop.f32.mrb[73].mxu0  ;;  %v3609_v54 = vadd.f32 %v10503_v50, %v12958_v21 }
 0x40e   : > { %v10504_v56 = vpop.f32.mrb[74].mxu0  ;;  %v13165_v57 = vpack.c.bf16 %v4210_v48, %v4209_v40  ;;  %v3607_v12 = vadd.f32 %v12958_v21, %v3017_v53 }
 0x40f   : > { %v3020_v58 = vpop.f32.mrb[75].mxu0  ;;  %v13168_v59 = vpack.c.bf16 %v4208_v51, %v4207_v10  ;;  %v3929_v60 = vmul.f32 0.2, %v3609_v54  ;;  %v3610_v61 = vadd.f32 %v10504_v56, %v12958_v21  ;;  %vm3769_vm1 = vcmp.gt.f32.partialorder %v3609_v54, 0.0 }
 0x410   : > { %v3927_v62 = vmul.f32 0.2, %v3607_v12  ;;  %vm3767_vm2 = vcmp.gt.f32.partialorder %v3607_v12, 0.0  ;;  %v3608_v6 = vadd.f32 %v12958_v21, %v3020_v58  ;;  %v11865_v58 = vld [vmem:[%s14428_s3 + $0x18] sm:$0xff]  }
 0x411   : > { %10629 = vmatprep.mubr.msk.bf16.mxu1 %vm4336_vm9, %v13168_v59  ;;  %v4089_v5 = vsel %vm3769_vm1, %v3609_v54, %v3929_v60  ;;  %vm3770_vm3 = vcmp.gt.f32.partialorder %v3610_v61, 0.0  ;;  %v3930_v2 = vmul.f32 0.2, %v3610_v61  ;;  %10683 = vmatprep.subr.bf16.mxu1 %v11865_v58 }
 0x412   : > { %10630 = vmatmul.mubr.msk.bf16.gmra.mrb[32].mxu1 %vm4336_vm9, %v13165_v57  ;;  %v4087_v17 = vsel %vm3767_vm2, %v3607_v12, %v3927_v62  ;;  %v3928_v8 = vmul.f32 0.2, %v3608_v6  ;;  %vm3768_vm6 = vcmp.gt.f32.partialorder %v3608_v6, 0.0 }
 0x413   : > { %v4090_v34 = vsel %vm3770_vm3, %v3610_v61, %v3930_v2  ;;  %10684 = vmatpush3.bf16.msra.mxu1 %v11865_v58 }
 0x414   : > { %v10507_v1 = vpop.f32.mrb[76].mxu0  ;;  %v4088_v37 = vsel %vm3768_vm6, %v3608_v6, %v3928_v8 }
 0x415   : > { %v3613_v13 = vadd.f32 %v10507_v1, %v12958_v21  ;;  %v3033_v15 = vpop.f32.mrb[77].mxu0 }
 0x416   : > { %v3611_v3 = vadd.f32 %v12958_v21, %v3033_v15  ;;  %v10508_v16 = vpop.f32.mrb[78].mxu0 }
 0x417   : > { %vm3773_vm4 = vcmp.gt.f32.partialorder %v3613_v13, 0.0  ;;  %v3933_v18 = vmul.f32 0.2, %v3613_v13  ;;  %v3614_v19 = vadd.f32 %v10508_v16, %v12958_v21  ;;  %v3036_v20 = vpop.f32.mrb[79].mxu0 }
 0x418   : > { %vm3771_vm5 = vcmp.gt.f32.partialorder %v3611_v3, 0.0  ;;  %v3931_v23 = vmul.f32 0.2, %v3611_v3  ;;  %v3612_v27 = vadd.f32 %v12958_v21, %v3036_v20  ;;  %v13184_v21 = vld [vmem:[%s14427_s2] ss:$0 sm:$0xff] }
 0x419   : > { %v4093_v29 = vsel %vm3773_vm4, %v3613_v13, %v3933_v18  ;;  %vm3774_vm0 = vcmp.gt.f32.partialorder %v3614_v19, 0.0  ;;  %v3934_v30 = vmul.f32 0.2, %v3614_v19 }
 0x41a   : > { %v4213_v31 = vmax.f32 %v4089_v5, %v4093_v29  ;;  %v4091_v32 = vsel %vm3771_vm5, %v3611_v3, %v3931_v23  ;;  %vm3772_vm7 = vcmp.gt.f32.partialorder %v3612_v27, 0.0  ;;  %v3932_v33 = vmul.f32 0.2, %v3612_v27 }
 0x41b   : > { %v4211_v35 = vmax.f32 %v4087_v17, %v4091_v32  ;;  %v4094_v36 = vsel %vm3774_vm0, %v3614_v19, %v3934_v30 }
 0x41c   : > { %v4214_v39 = vmax.f32 %v4090_v34, %v4094_v36  ;;  %v4092_v40 = vsel %vm3772_vm7, %v3612_v27, %v3932_v33  ;;  %v10511_v9 = vpop.f32.mrb[80].mxu0 }
 0x41d   : > { %v4212_v43 = vmax.f32 %v4088_v37, %v4092_v40  ;;  %v3049_v44 = vpop.f32.mrb[81].mxu0  ;;  %v3617_v10 = vadd.f32 %v13184_v21, %v10511_v9 }
 0x41e   : > { %v10512_v46 = vpop.f32.mrb[82].mxu0  ;;  %v13187_v47 = vpack.c.bf16 %v4214_v39, %v4213_v31  ;;  %v3615_v48 = vadd.f32 %v13184_v21, %v3049_v44 }
 0x41f   : > { %v3052_v49 = vpop.f32.mrb[83].mxu0  ;;  %v13190_v50 = vpack.c.bf16 %v4212_v43, %v4211_v35  ;;  %v3937_v51 = vmul.f32 0.2, %v3617_v10  ;;  %v3618_v53 = vadd.f32 %v13184_v21, %v10512_v46  ;;  %vm3777_vm8 = vcmp.gt.f32.partialorder %v3617_v10, 0.0 }
 0x420   : > { %v3935_v54 = vmul.f32 0.2, %v3615_v48  ;;  %vm3775_vm10 = vcmp.gt.f32.partialorder %v3615_v48, 0.0  ;;  %v3616_v56 = vadd.f32 %v13184_v21, %v3052_v49 }
 0x421   : > { %10633 = vmatprep.mubr.msk.bf16.mxu1 %vm4336_vm9, %v13190_v50  ;;  %v4097_v62 = vsel %vm3777_vm8, %v3617_v10, %v3937_v51  ;;  %vm3778_vm11 = vcmp.gt.f32.partialorder %v3618_v53, 0.0  ;;  %v3938_v6 = vmul.f32 0.2, %v3618_v53 }
 0x422   : > { %10634 = vmatmul.mubr.msk.bf16.gmra.mrb[36].mxu1 %vm4336_vm9, %v13187_v47  ;;  %v4095_v15 = vsel %vm3775_vm10, %v3615_v48, %v3935_v54  ;;  %v3936_v16 = vmul.f32 0.2, %v3616_v56  ;;  %vm3776_vm14 = vcmp.gt.f32.partialorder %v3616_v56, 0.0 }
 0x423   : > { %v4098_v29 = vsel %vm3778_vm11, %v3618_v53, %v3938_v6 }
 0x424   : > { %v10515_v12 = vpop.f32.mrb[84].mxu0  ;;  %v4096_v32 = vsel %vm3776_vm14, %v3616_v56, %v3936_v16 }
 0x425   : > { %v3621_v60 = vadd.f32 %v13184_v21, %v10515_v12  ;;  %v3065_v61 = vpop.f32.mrb[85].mxu0 }
 0x426   : > { %v3619_v1 = vadd.f32 %v13184_v21, %v3065_v61  ;;  %v10516_v13 = vpop.f32.mrb[86].mxu0 }
 0x427   : > { %vm3781_vm12 = vcmp.gt.f32.partialorder %v3621_v60, 0.0  ;;  %v3941_v5 = vmul.f32 0.2, %v3621_v60  ;;  %v3622_v2 = vadd.f32 %v13184_v21, %v10516_v13  ;;  %v3068_v3 = vpop.f32.mrb[87].mxu0 }
 0x428   : > { %vm3779_vm13 = vcmp.gt.f32.partialorder %v3619_v1, 0.0  ;;  %v3939_v17 = vmul.f32 0.2, %v3619_v1  ;;  %v3620_v18 = vadd.f32 %v13184_v21, %v3068_v3 }
 0x429   : > { %v4101_v19 = vsel %vm3781_vm12, %v3621_v60, %v3941_v5  ;;  %vm3782_vm15 = vcmp.gt.f32.partialorder %v3622_v2, 0.0  ;;  %v3942_v20 = vmul.f32 0.2, %v3622_v2 }
 0x42a   : > { %v4217_v8 = vmax.f32 %v4097_v62, %v4101_v19  ;;  %v4099_v23 = vsel %vm3779_vm13, %v3619_v1, %v3939_v17  ;;  %vm3780_vm1 = vcmp.gt.f32.partialorder %v3620_v18, 0.0  ;;  %v3940_v27 = vmul.f32 0.2, %v3620_v18 }
 0x42b   : > { %v4215_v30 = vmax.f32 %v4095_v15, %v4099_v23  ;;  %v4102_v31 = vsel %vm3782_vm15, %v3622_v2, %v3942_v20 }
 0x42c   : > { %v4218_v33 = vmax.f32 %v4098_v29, %v4102_v31  ;;  %v4100_v34 = vsel %vm3780_vm1, %v3620_v18, %v3940_v27  ;;  %v10519_v35 = vpop.f32.mrb[88].mxu0 }
 0x42d   : > { %v4216_v36 = vmax.f32 %v4096_v32, %v4100_v34  ;;  %v3081_v37 = vpop.f32.mrb[89].mxu0  ;;  %v3625_v39 = vadd.f32 %v13184_v21, %v10519_v35 }
 0x42e   : > { %v10520_v40 = vpop.f32.mrb[90].mxu0  ;;  %v13207_v9 = vpack.c.bf16 %v4218_v33, %v4217_v8  ;;  %v3623_v43 = vadd.f32 %v13184_v21, %v3081_v37 }
 0x42f   : > { %v3084_v44 = vpop.f32.mrb[91].mxu0  ;;  %v13210_v10 = vpack.c.bf16 %v4216_v36, %v4215_v30  ;;  %v3945_v46 = vmul.f32 0.2, %v3625_v39  ;;  %v3626_v48 = vadd.f32 %v13184_v21, %v10520_v40  ;;  %vm3785_vm2 = vcmp.gt.f32.partialorder %v3625_v39, 0.0 }
 0x430   : > { %v3943_v49 = vmul.f32 0.2, %v3623_v43  ;;  %vm3783_vm3 = vcmp.gt.f32.partialorder %v3623_v43, 0.0  ;;  %v3624_v51 = vadd.f32 %v13184_v21, %v3084_v44 }
 0x431   : > { %10637 = vmatprep.mubr.msk.bf16.mxu1 %vm4336_vm9, %v13210_v10  ;;  %v4105_v12 = vsel %vm3785_vm2, %v3625_v39, %v3945_v46  ;;  %vm3786_vm4 = vcmp.gt.f32.partialorder %v3626_v48, 0.0  ;;  %v3946_v58 = vmul.f32 0.2, %v3626_v48 }
 0x432   : > { %10638 = vmatmul.mubr.msk.bf16.gmra.mrb[40].mxu1 %vm4336_vm9, %v13207_v9  ;;  %v4103_v62 = vsel %vm3783_vm3, %v3623_v43, %v3943_v49  ;;  %v3944_v15 = vmul.f32 0.2, %v3624_v51  ;;  %vm3784_vm0 = vcmp.gt.f32.partialorder %v3624_v51, 0.0 }
 0x433   : > { %v4106_v20 = vsel %vm3786_vm4, %v3626_v48, %v3946_v58 }
 0x434   : > { %v10523_v53 = vpop.f32.mrb[92].mxu0  ;;  %v4104_v27 = vsel %vm3784_vm0, %v3624_v51, %v3944_v15 }
 0x435   : > { %v3629_v54 = vadd.f32 %v13184_v21, %v10523_v53  ;;  %v3097_v56 = vpop.f32.mrb[93].mxu0 }
 0x436   : > { %v3627_v60 = vadd.f32 %v13184_v21, %v3097_v56  ;;  %v10524_v61 = vpop.f32.mrb[94].mxu0 }
 0x437   : > { %vm3789_vm5 = vcmp.gt.f32.partialorder %v3629_v54, 0.0  ;;  %v3949_v6 = vmul.f32 0.2, %v3629_v54  ;;  %v3630_v1 = vadd.f32 %v13184_v21, %v10524_v61  ;;  %v3100_v13 = vpop.f32.mrb[95].mxu0 }
 0x438   : > { %vm3787_vm6 = vcmp.gt.f32.partialorder %v3627_v60, 0.0  ;;  %v3947_v5 = vmul.f32 0.2, %v3627_v60  ;;  %v3628_v2 = vadd.f32 %v13184_v21, %v3100_v13 }
 0x439   : > { %v4109_v3 = vsel %vm3789_vm5, %v3629_v54, %v3949_v6  ;;  %vm3790_vm7 = vcmp.gt.f32.partialorder %v3630_v1, 0.0  ;;  %v3950_v16 = vmul.f32 0.2, %v3630_v1 }
 0x43a   : > { %v4221_v17 = vmax.f32 %v4105_v12, %v4109_v3  ;;  %v4107_v18 = vsel %vm3787_vm6, %v3627_v60, %v3947_v5  ;;  %vm3788_vm8 = vcmp.gt.f32.partialorder %v3628_v2, 0.0  ;;  %v3948_v19 = vmul.f32 0.2, %v3628_v2 }
 0x43b   : > { %v4219_v8 = vmax.f32 %v4103_v62, %v4107_v18  ;;  %v4110_v23 = vsel %vm3790_vm7, %v3630_v1, %v3950_v16  ;;  %v13242_v18 = vld [vmem:[%s14428_s3 + $0x40] sm:$0xff]  }
 0x43c   : > { %v4222_v29 = vmax.f32 %v4106_v20, %v4110_v23  ;;  %v4108_v30 = vsel %vm3788_vm8, %v3628_v2, %v3948_v19  ;;  %v10527_v31 = vpop.f32.mrb[96].mxu0  ;;  %10765 = vmatprep.subr.bf16.mxu1 %v13242_v18 }
 0x43d   : > { %v4220_v32 = vmax.f32 %v4104_v27, %v4108_v30  ;;  %v3113_v33 = vpop.f32.mrb[97].mxu0  ;;  %v3633_v34 = vadd.f32 %v13184_v21, %v10527_v31 }
 0x43e   : > { %v10528_v35 = vpop.f32.mrb[98].mxu0  ;;  %v13224_v36 = vpack.c.bf16 %v4222_v29, %v4221_v17  ;;  %v3631_v37 = vadd.f32 %v13184_v21, %v3113_v33 }
 0x43f   : > { %v3116_v39 = vpop.f32.mrb[99].mxu0  ;;  %v13227_v40 = vpack.c.bf16 %v4220_v32, %v4219_v8  ;;  %v3953_v43 = vmul.f32 0.2, %v3633_v34  ;;  %v3634_v44 = vadd.f32 %v13184_v21, %v10528_v35  ;;  %vm3793_vm10 = vcmp.gt.f32.partialorder %v3633_v34, 0.0 }
 0x440   : > { %v3951_v46 = vmul.f32 0.2, %v3631_v37  ;;  %vm3791_vm11 = vcmp.gt.f32.partialorder %v3631_v37, 0.0  ;;  %v3632_v48 = vadd.f32 %v13184_v21, %v3116_v39 }
 0x441   : > { %10641 = vmatprep.mubr.msk.bf16.mxu1 %vm4336_vm9, %v13227_v40  ;;  %v4113_v54 = vsel %vm3793_vm10, %v3633_v34, %v3953_v43  ;;  %vm3794_vm12 = vcmp.gt.f32.partialorder %v3634_v44, 0.0  ;;  %v3954_v56 = vmul.f32 0.2, %v3634_v44 }
 0x442   : > { %10642 = vmatmul.mubr.msk.bf16.gmra.mrb[44].mxu1 %vm4336_vm9, %v13224_v36  ;;  %v4111_v60 = vsel %vm3791_vm11, %v3631_v37, %v3951_v46  ;;  %v3952_v1 = vmul.f32 0.2, %v3632_v48  ;;  %vm3792_vm15 = vcmp.gt.f32.partialorder %v3632_v48, 0.0 }
 0x443   : > { %v4114_v19 = vsel %vm3794_vm12, %v3634_v44, %v3954_v56 }
 0x444   : > { %v10531_v49 = vpop.f32.mrb[100].mxu0  ;;  %v4112_v23 = vsel %vm3792_vm15, %v3632_v48, %v3952_v1 }
 0x445   : > { %v3637_v51 = vadd.f32 %v13184_v21, %v10531_v49  ;;  %v3129_v53 = vpop.f32.mrb[101].mxu0 }
 0x446   : > { %v3635_v12 = vadd.f32 %v13184_v21, %v3129_v53  ;;  %v10532_v58 = vpop.f32.mrb[102].mxu0 }
 0x447   : > { %vm3797_vm13 = vcmp.gt.f32.partialorder %v3637_v51, 0.0  ;;  %v3957_v61 = vmul.f32 0.2, %v3637_v51  ;;  %v3638_v62 = vadd.f32 %v13184_v21, %v10532_v58  ;;  %v3132_v6 = vpop.f32.mrb[103].mxu0 }
 0x448   : > { %vm3795_vm14 = vcmp.gt.f32.partialorder %v3635_v12, 0.0  ;;  %v3955_v13 = vmul.f32 0.2, %v3635_v12  ;;  %v3636_v15 = vadd.f32 %v13184_v21, %v3132_v6 }
 0x449   : > { %v4117_v5 = vsel %vm3797_vm13, %v3637_v51, %v3957_v61  ;;  %vm3798_vm1 = vcmp.gt.f32.partialorder %v3638_v62, 0.0  ;;  %v3958_v2 = vmul.f32 0.2, %v3638_v62 }
 0x44a   : > { %v4225_v3 = vmax.f32 %v4113_v54, %v4117_v5  ;;  %v4115_v16 = vsel %vm3795_vm14, %v3635_v12, %v3955_v13  ;;  %vm3796_vm2 = vcmp.gt.f32.partialorder %v3636_v15, 0.0  ;;  %v3956_v17 = vmul.f32 0.2, %v3636_v15 }
 0x44b   : > { %v4223_v20 = vmax.f32 %v4111_v60, %v4115_v16  ;;  %v4118_v8 = vsel %vm3798_vm1, %v3638_v62, %v3958_v2 }
 0x44c   : > { %v4226_v27 = vmax.f32 %v4114_v19, %v4118_v8  ;;  %v4116_v29 = vsel %vm3796_vm2, %v3636_v15, %v3956_v17  ;;  %v10535_v30 = vpop.f32.mrb[104].mxu0 }
 0x44d   : > { %v4224_v31 = vmax.f32 %v4112_v23, %v4116_v29  ;;  %v3145_v32 = vpop.f32.mrb[105].mxu0  ;;  %v3641_v33 = vadd.f32 %v13184_v21, %v10535_v30 }
 0x44e   : > { %v10536_v34 = vpop.f32.mrb[106].mxu0  ;;  %v13247_v35 = vpack.c.bf16 %v4226_v27, %v4225_v3  ;;  %v3639_v37 = vadd.f32 %v13184_v21, %v3145_v32 }
 0x44f   : > { %v3148_v39 = vpop.f32.mrb[107].mxu0  ;;  %v13250_v43 = vpack.c.bf16 %v4224_v31, %v4223_v20  ;;  %v3961_v44 = vmul.f32 0.2, %v3641_v33  ;;  %v3642_v46 = vadd.f32 %v13184_v21, %v10536_v34  ;;  %vm3801_vm3 = vcmp.gt.f32.partialorder %v3641_v33, 0.0 }
 0x450   : > { %v3959_v48 = vmul.f32 0.2, %v3639_v37  ;;  %vm3799_vm4 = vcmp.gt.f32.partialorder %v3639_v37, 0.0  ;;  %v3640_v49 = vadd.f32 %v13184_v21, %v3148_v39 }
 0x451   : > { %10645 = vmatprep.mubr.msk.bf16.mxu1 %vm4336_vm9, %v13250_v43  ;;  %v4121_v56 = vsel %vm3801_vm3, %v3641_v33, %v3961_v44  ;;  %vm3802_vm5 = vcmp.gt.f32.partialorder %v3642_v46, 0.0  ;;  %v3962_v12 = vmul.f32 0.2, %v3642_v46 }
 0x452   : > { %10646 = vmatmul.mubr.msk.bf16.gmra.mrb[48].mxu1 %vm4336_vm9, %v13247_v35  ;;  %v4119_v61 = vsel %vm3799_vm4, %v3639_v37, %v3959_v48  ;;  %v3960_v13 = vmul.f32 0.2, %v3640_v49  ;;  %vm3800_vm7 = vcmp.gt.f32.partialorder %v3640_v49, 0.0 }
 0x453   : > { %v4122_v20 = vsel %vm3802_vm5, %v3642_v46, %v3962_v12 }
 0x454   : > { %v10539_v51 = vpop.f32.mrb[108].mxu0  ;;  %v4120_v27 = vsel %vm3800_vm7, %v3640_v49, %v3960_v13 }
 0x455   : > { %v3645_v53 = vadd.f32 %v13184_v21, %v10539_v51  ;;  %v3161_v54 = vpop.f32.mrb[109].mxu0 }
 0x456   : > { %v3643_v58 = vadd.f32 %v13184_v21, %v3161_v54  ;;  %v10540_v60 = vpop.f32.mrb[110].mxu0 }
 0x457   : > { %vm3805_vm6 = vcmp.gt.f32.partialorder %v3645_v53, 0.0  ;;  %v3965_v62 = vmul.f32 0.2, %v3645_v53  ;;  %v3646_v6 = vadd.f32 %v13184_v21, %v10540_v60  ;;  %v3164_v1 = vpop.f32.mrb[111].mxu0 }
 0x458   : > { %vm3803_vm0 = vcmp.gt.f32.partialorder %v3643_v58, 0.0  ;;  %v3963_v15 = vmul.f32 0.2, %v3643_v58  ;;  %v3644_v5 = vadd.f32 %v13184_v21, %v3164_v1 }
 0x459   : > { %v4125_v2 = vsel %vm3805_vm6, %v3645_v53, %v3965_v62  ;;  %vm3806_vm8 = vcmp.gt.f32.partialorder %v3646_v6, 0.0  ;;  %v3966_v3 = vmul.f32 0.2, %v3646_v6 }
 0x45a   : > { %v4229_v16 = vmax.f32 %v4121_v56, %v4125_v2  ;;  %v4123_v17 = vsel %vm3803_vm0, %v3643_v58, %v3963_v15  ;;  %vm3804_vm10 = vcmp.gt.f32.partialorder %v3644_v5, 0.0  ;;  %v3964_v19 = vmul.f32 0.2, %v3644_v5 }
 0x45b   : > { %v4227_v8 = vmax.f32 %v4119_v61, %v4123_v17  ;;  %v4126_v23 = vsel %vm3806_vm8, %v3646_v6, %v3966_v3 }
 0x45c   : > { %v4230_v29 = vmax.f32 %v4122_v20, %v4126_v23  ;;  %v4124_v30 = vsel %vm3804_vm10, %v3644_v5, %v3964_v19  ;;  %v10543_v31 = vpop.f32.mrb[112].mxu0 }
 0x45d   : > { %v4228_v32 = vmax.f32 %v4120_v27, %v4124_v30  ;;  %v3177_v33 = vpop.f32.mrb[113].mxu0  ;;  %v3649_v34 = vadd.f32 %v13184_v21, %v10543_v31 }
 0x45e   : > { %v10544_v37 = vpop.f32.mrb[114].mxu0  ;;  %v13264_v39 = vpack.c.bf16 %v4230_v29, %v4229_v16  ;;  %v3647_v44 = vadd.f32 %v13184_v21, %v3177_v33 }
 0x45f   : > { %v3180_v48 = vpop.f32.mrb[115].mxu0  ;;  %v13267_v51 = vpack.c.bf16 %v4228_v32, %v4227_v8  ;;  %v3969_v46 = vmul.f32 0.2, %v3649_v34  ;;  %v3650_v49 = vadd.f32 %v13184_v21, %v10544_v37  ;;  %vm3809_vm11 = vcmp.gt.f32.partialorder %v3649_v34, 0.0 }
 0x460   : > { %v3967_v53 = vmul.f32 0.2, %v3647_v44  ;;  %vm3807_vm12 = vcmp.gt.f32.partialorder %v3647_v44, 0.0  ;;  %v3648_v54 = vadd.f32 %v13184_v21, %v3180_v48 }
 0x461   : > { %10649 = vmatprep.mubr.msk.bf16.mxu1 %vm4336_vm9, %v13267_v51  ;;  %v4129_v60 = vsel %vm3809_vm11, %v3649_v34, %v3969_v46  ;;  %vm3810_vm13 = vcmp.gt.f32.partialorder %v3650_v49, 0.0  ;;  %v3970_v61 = vmul.f32 0.2, %v3650_v49 }
 0x462   : > { %10650 = vmatmul.mubr.msk.bf16.gmra.mrb[52].mxu1 %vm4336_vm9, %v13264_v39  ;;  %v4127_v1 = vsel %vm3807_vm12, %v3647_v44, %v3967_v53  ;;  %v3968_v2 = vmul.f32 0.2, %v3648_v54  ;;  %vm3808_vm1 = vcmp.gt.f32.partialorder %v3648_v54, 0.0 }
 0x463   : > { %v4130_v27 = vsel %vm3810_vm13, %v3650_v49, %v3970_v61 }
 0x464   : > { %v10547_v56 = vpop.f32.mrb[116].mxu0  ;;  %v4128_v31 = vsel %vm3808_vm1, %v3648_v54, %v3968_v2 }
 0x465   : > { %v3653_v12 = vadd.f32 %v13184_v21, %v10547_v56  ;;  %v3193_v58 = vpop.f32.mrb[117].mxu0 }
 0x466   : > { %v3651_v62 = vadd.f32 %v13184_v21, %v3193_v58  ;;  %v10548_v6 = vpop.f32.mrb[118].mxu0 }
 0x467   : > { %vm3813_vm14 = vcmp.gt.f32.partialorder %v3653_v12, 0.0  ;;  %v3973_v13 = vmul.f32 0.2, %v3653_v12  ;;  %v3654_v15 = vadd.f32 %v13184_v21, %v10548_v6  ;;  %v3196_v5 = vpop.f32.mrb[119].mxu0 }
 0x468   : > { %vm3811_vm15 = vcmp.gt.f32.partialorder %v3651_v62, 0.0  ;;  %v3971_v3 = vmul.f32 0.2, %v3651_v62  ;;  %v3652_v16 = vadd.f32 %v13184_v21, %v3196_v5 }
 0x469   : > { %v4133_v17 = vsel %vm3813_vm14, %v3653_v12, %v3973_v13  ;;  %vm3814_vm2 = vcmp.gt.f32.partialorder %v3654_v15, 0.0  ;;  %v3974_v19 = vmul.f32 0.2, %v3654_v15 }
 0x46a   : > { %v4233_v20 = vmax.f32 %v4129_v60, %v4133_v17  ;;  %v4131_v8 = vsel %vm3811_vm15, %v3651_v62, %v3971_v3  ;;  %vm3812_vm3 = vcmp.gt.f32.partialorder %v3652_v16, 0.0  ;;  %v3972_v23 = vmul.f32 0.2, %v3652_v16 }
 0x46b   : > { %v4231_v29 = vmax.f32 %v4127_v1, %v4131_v8  ;;  %v4134_v30 = vsel %vm3814_vm2, %v3654_v15, %v3974_v19 }
 0x46c   : > { %v4234_v32 = vmax.f32 %v4130_v27, %v4134_v30  ;;  %v4132_v33 = vsel %vm3812_vm3, %v3652_v16, %v3972_v23  ;;  %v10551_v34 = vpop.f32.mrb[120].mxu0 }
 0x46d   : > { %v4232_v37 = vmax.f32 %v4128_v31, %v4132_v33  ;;  %v3209_v44 = vpop.f32.mrb[121].mxu0  ;;  %v3657_v48 = vadd.f32 %v13184_v21, %v10551_v34 }
 0x46e   : > { %v10552_v46 = vpop.f32.mrb[122].mxu0  ;;  %v13281_v53 = vpack.c.bf16 %v4234_v32, %v4233_v20  ;;  %v3655_v56 = vadd.f32 %v13184_v21, %v3209_v44 }
 0x46f   : > { %v3212_v12 = vpop.f32.mrb[123].mxu0  ;;  %v13284_v58 = vpack.c.bf16 %v4232_v37, %v4231_v29  ;;  %v3977_v49 = vmul.f32 0.2, %v3657_v48  ;;  %v3658_v54 = vadd.f32 %v13184_v21, %v10552_v46  ;;  %vm3817_vm4 = vcmp.gt.f32.partialorder %v3657_v48, 0.0 }
 0x470   : > { %v3975_v60 = vmul.f32 0.2, %v3655_v56  ;;  %vm3815_vm5 = vcmp.gt.f32.partialorder %v3655_v56, 0.0  ;;  %v3656_v61 = vadd.f32 %v13184_v21, %v3212_v12 }
 0x471   : > { %10653 = vmatprep.mubr.msk.bf16.mxu1 %vm4336_vm9, %v13284_v58  ;;  %v4137_v13 = vsel %vm3817_vm4, %v3657_v48, %v3977_v49  ;;  %vm3818_vm6 = vcmp.gt.f32.partialorder %v3658_v54, 0.0  ;;  %v3978_v15 = vmul.f32 0.2, %v3658_v54 }
 0x472   : > { %10654 = vmatmul.mubr.msk.bf16.gmra.mrb[56].mxu1 %vm4336_vm9, %v13281_v53  ;;  %v4135_v3 = vsel %vm3815_vm5, %v3655_v56, %v3975_v60  ;;  %v3976_v20 = vmul.f32 0.2, %v3656_v61  ;;  %vm3816_vm8 = vcmp.gt.f32.partialorder %v3656_v61, 0.0 }
 0x473   : > { %v4138_v33 = vsel %vm3818_vm6, %v3658_v54, %v3978_v15 }
 0x474   : > { %v10555_v62 = vpop.f32.mrb[124].mxu0  ;;  %v4136_v44 = vsel %vm3816_vm8, %v3656_v61, %v3976_v20 }
 0x475   : > { %v3661_v6 = vadd.f32 %v13184_v21, %v10555_v62  ;;  %v3225_v1 = vpop.f32.mrb[125].mxu0 }
 0x476   : > { %v3659_v5 = vadd.f32 %v13184_v21, %v3225_v1  ;;  %v10556_v2 = vpop.f32.mrb[126].mxu0 }
 0x477   : > { %vm3821_vm0 = vcmp.gt.f32.partialorder %v3661_v6, 0.0  ;;  %v3981_v16 = vmul.f32 0.2, %v3661_v6  ;;  %v3662_v17 = vadd.f32 %v13184_v21, %v10556_v2  ;;  %v3228_v19 = vpop.f32.mrb[127].mxu0 }
 0x478   : > { %vm3819_vm7 = vcmp.gt.f32.partialorder %v3659_v5, 0.0  ;;  %v3979_v8 = vmul.f32 0.2, %v3659_v5  ;;  %v3660_v23 = vadd.f32 %v13184_v21, %v3228_v19 }
 0x479   : > { %v4141_v27 = vsel %vm3821_vm0, %v3661_v6, %v3981_v16  ;;  %vm3822_vm10 = vcmp.gt.f32.partialorder %v3662_v17, 0.0  ;;  %v3982_v29 = vmul.f32 0.2, %v3662_v17 }
 0x47a   : > { %v4237_v30 = vmax.f32 %v4137_v13, %v4141_v27  ;;  %v4139_v31 = vsel %vm3819_vm7, %v3659_v5, %v3979_v8  ;;  %vm3820_vm11 = vcmp.gt.f32.partialorder %v3660_v23, 0.0  ;;  %v3980_v32 = vmul.f32 0.2, %v3660_v23 }
 0x47b   : > { %v4235_v34 = vmax.f32 %v4135_v3, %v4139_v31  ;;  %v4142_v37 = vsel %vm3822_vm10, %v3662_v17, %v3982_v29 }
 0x47c   : > { %v4238_v48 = vmax.f32 %v4138_v33, %v4142_v37  ;;  %v4140_v46 = vsel %vm3820_vm11, %v3660_v23, %v3980_v32  ;;  %v10559_v56 = vpop.f32.mrb[128].mxu0 }
 0x47d   : > { %v4236_v12 = vmax.f32 %v4136_v44, %v4140_v46  ;;  %v3241_v49 = vpop.f32.mrb[129].mxu0  ;;  %v3665_v60 = vadd.f32 %v13184_v21, %v10559_v56 }
 0x47e   : > { %v10560_v62 = vpop.f32.mrb[130].mxu0  ;;  %v13298_v6 = vpack.c.bf16 %v4238_v48, %v4237_v30  ;;  %v3663_v1 = vadd.f32 %v13184_v21, %v3241_v49 }
 0x47f   : > { %v3244_v13 = vpop.f32.mrb[131].mxu0  ;;  %v13301_v5 = vpack.c.bf16 %v4236_v12, %v4235_v34  ;;  %v3985_v54 = vmul.f32 0.2, %v3665_v60  ;;  %v3666_v61 = vadd.f32 %v13184_v21, %v10560_v62  ;;  %vm3825_vm12 = vcmp.gt.f32.partialorder %v3665_v60, 0.0 }
 0x480   : > { %v3983_v15 = vmul.f32 0.2, %v3663_v1  ;;  %vm3823_vm13 = vcmp.gt.f32.partialorder %v3663_v1, 0.0  ;;  %v3664_v2 = vadd.f32 %v13184_v21, %v3244_v13 }
 0x481   : > { %10657 = vmatprep.mubr.msk.bf16.mxu1 %vm4336_vm9, %v13301_v5  ;;  %v4145_v19 = vsel %vm3825_vm12, %v3665_v60, %v3985_v54  ;;  %vm3826_vm14 = vcmp.gt.f32.partialorder %v3666_v61, 0.0  ;;  %v3986_v20 = vmul.f32 0.2, %v3666_v61 }
 0x482   : > { %10658 = vmatmul.mubr.msk.bf16.gmra.mrb[60].mxu1 %vm4336_vm9, %v13298_v6  ;;  %v4143_v27 = vsel %vm3823_vm13, %v3663_v1, %v3983_v15  ;;  %v3984_v32 = vmul.f32 0.2, %v3664_v2  ;;  %vm3824_vm2 = vcmp.gt.f32.partialorder %v3664_v2, 0.0 }
 0x483   : > { %v4146_v12 = vsel %vm3826_vm14, %v3666_v61, %v3986_v20 }
 0x484   : > { %v10563_v3 = vpop.f32.mrb[132].mxu0  ;;  %v4144_v62 = vsel %vm3824_vm2, %v3664_v2, %v3984_v32 }
 0x485   : > { %v3669_v16 = vadd.f32 %v13184_v21, %v10563_v3  ;;  %v3257_v17 = vpop.f32.mrb[133].mxu0 }
 0x486   : > { %v3667_v8 = vadd.f32 %v13184_v21, %v3257_v17  ;;  %v10564_v23 = vpop.f32.mrb[134].mxu0 }
 0x487   : > { %vm3829_vm15 = vcmp.gt.f32.partialorder %v3669_v16, 0.0  ;;  %v3989_v29 = vmul.f32 0.2, %v3669_v16  ;;  %v3670_v30 = vadd.f32 %v13184_v21, %v10564_v23  ;;  %v3260_v31 = vpop.f32.mrb[135].mxu0 }
 0x488   : > { %vm3827_vm1 = vcmp.gt.f32.partialorder %v3667_v8, 0.0  ;;  %v3987_v33 = vmul.f32 0.2, %v3667_v8  ;;  %v3668_v34 = vadd.f32 %v13184_v21, %v3260_v31 }
 0x489   : > { %v4149_v37 = vsel %vm3829_vm15, %v3669_v16, %v3989_v29  ;;  %vm3830_vm3 = vcmp.gt.f32.partialorder %v3670_v30, 0.0  ;;  %v3990_v44 = vmul.f32 0.2, %v3670_v30 }
 0x48a   : > { %v4241_v48 = vmax.f32 %v4145_v19, %v4149_v37  ;;  %v4147_v46 = vsel %vm3827_vm1, %v3667_v8, %v3987_v33  ;;  %vm3828_vm4 = vcmp.gt.f32.partialorder %v3668_v34, 0.0  ;;  %v3988_v56 = vmul.f32 0.2, %v3668_v34 }
 0x48b   : > { %v4239_v49 = vmax.f32 %v4143_v27, %v4147_v46  ;;  %v4150_v60 = vsel %vm3830_vm3, %v3670_v30, %v3990_v44 }
 0x48c   : > { %v4242_v1 = vmax.f32 %v4146_v12, %v4150_v60  ;;  %v4148_v13 = vsel %vm3828_vm4, %v3668_v34, %v3988_v56  ;;  %v10567_v54 = vpop.f32.mrb[136].mxu0 }
 0x48d   : > { %v4240_v15 = vmax.f32 %v4144_v62, %v4148_v13  ;;  %v3273_v3 = vpop.f32.mrb[137].mxu0  ;;  %v3673_v17 = vadd.f32 %v13184_v21, %v10567_v54 }
 0x48e   : > { %v10568_v23 = vpop.f32.mrb[138].mxu0  ;;  %v13315_v16 = vpack.c.bf16 %v4242_v1, %v4241_v48  ;;  %v3671_v19 = vadd.f32 %v13184_v21, %v3273_v3 }
 0x48f   : > { %v3276_v8 = vpop.f32.mrb[139].mxu0  ;;  %v13318_v29 = vpack.c.bf16 %v4240_v15, %v4239_v49  ;;  %v3993_v61 = vmul.f32 0.2, %v3673_v17  ;;  %v3674_v2 = vadd.f32 %v13184_v21, %v10568_v23  ;;  %vm3833_vm5 = vcmp.gt.f32.partialorder %v3673_v17, 0.0 }
 0x490   : > { %14543 = vst [vmem:[#allocation8_spill] sm:$0xff] %v13315_v16  ;;  %v3991_v20 = vmul.f32 0.2, %v3671_v19  ;;  %vm3831_vm6 = vcmp.gt.f32.partialorder %v3671_v19, 0.0  ;;  %v3672_v27 = vadd.f32 %v13184_v21, %v3276_v8 }
 0x491   : > { %10661 = vmatprep.mubr.msk.bf16.mxu1 %vm4336_vm9, %v13318_v29  ;;  %v4153_v33 = vsel %vm3833_vm5, %v3673_v17, %v3993_v61  ;;  %vm3834_vm0 = vcmp.gt.f32.partialorder %v3674_v2, 0.0  ;;  %v3994_v34 = vmul.f32 0.2, %v3674_v2 }
 0x492   : > { %10662 = vmatmul.mubr.msk.bf16.gmra.mrb[64].mxu1 %vm4336_vm9, %v13315_v16  ;;  %v4151_v48 = vsel %vm3831_vm6, %v3671_v19, %v3991_v20  ;;  %v3992_v49 = vmul.f32 0.2, %v3672_v27  ;;  %vm3832_vm10 = vcmp.gt.f32.partialorder %v3672_v27, 0.0 }
 0x493   : > { %v4154_v17 = vsel %vm3834_vm0, %v3674_v2, %v3994_v34 }
 0x494   : > { %v10571_v30 = vpop.f32.mrb[140].mxu0  ;;  %v4152_v8 = vsel %vm3832_vm10, %v3672_v27, %v3992_v49 }
 0x495   : > { %v3677_v31 = vadd.f32 %v13184_v21, %v10571_v30  ;;  %v3289_v32 = vpop.f32.mrb[141].mxu0 }
 0x496   : > { %v3675_v37 = vadd.f32 %v13184_v21, %v3289_v32  ;;  %v10572_v44 = vpop.f32.mrb[142].mxu0 }
 0x497   : > { %vm3837_vm7 = vcmp.gt.f32.partialorder %v3677_v31, 0.0  ;;  %v3997_v46 = vmul.f32 0.2, %v3677_v31  ;;  %v3678_v56 = vadd.f32 %v13184_v21, %v10572_v44  ;;  %v3292_v12 = vpop.f32.mrb[143].mxu0 }
 0x498   : > { %vm3835_vm8 = vcmp.gt.f32.partialorder %v3675_v37, 0.0  ;;  %v3995_v60 = vmul.f32 0.2, %v3675_v37  ;;  %v3676_v62 = vadd.f32 %v13184_v21, %v3292_v12 }
 0x499   : > { %v4157_v1 = vsel %vm3837_vm7, %v3677_v31, %v3997_v46  ;;  %vm3838_vm11 = vcmp.gt.f32.partialorder %v3678_v56, 0.0  ;;  %v3998_v13 = vmul.f32 0.2, %v3678_v56 }
 0x49a   : > { %v4245_v54 = vmax.f32 %v4153_v33, %v4157_v1  ;;  %v4155_v15 = vsel %vm3835_vm8, %v3675_v37, %v3995_v60  ;;  %vm3836_vm12 = vcmp.gt.f32.partialorder %v3676_v62, 0.0  ;;  %v3996_v3 = vmul.f32 0.2, %v3676_v62 }
 0x49b   : > { %v4243_v23 = vmax.f32 %v4151_v48, %v4155_v15  ;;  %v4158_v19 = vsel %vm3838_vm11, %v3678_v56, %v3998_v13 }
 0x49c   : > { %v4246_v61 = vmax.f32 %v4154_v17, %v4158_v19  ;;  %v4156_v20 = vsel %vm3836_vm12, %v3676_v62, %v3996_v3  ;;  %v10575_v30 = vpop.f32.mrb[144].mxu0 }
 0x49d   : > { %v4244_v32 = vmax.f32 %v4152_v8, %v4156_v20  ;;  %v3305_v44 = vpop.f32.mrb[145].mxu0  ;;  %v3681_v12 = vadd.f32 %v13184_v21, %v10575_v30 }
 0x49e   : > { %v10576_v16 = vpop.f32.mrb[146].mxu0  ;;  %v13332_v31 = vpack.c.bf16 %v4246_v61, %v4245_v54  ;;  %v3679_v33 = vadd.f32 %v13184_v21, %v3305_v44 }
 0x49f   : > { %v3308_v37 = vpop.f32.mrb[147].mxu0  ;;  %v13335_v46 = vpack.c.bf16 %v4244_v32, %v4243_v23  ;;  %v4001_v2 = vmul.f32 0.2, %v3681_v12  ;;  %v3682_v27 = vadd.f32 %v13184_v21, %v10576_v16  ;;  %vm3841_vm13 = vcmp.gt.f32.partialorder %v3681_v12, 0.0 }
 0x4a0   : > { %14544 = vst [vmem:[#allocation9_spill] sm:$0xff] %v13332_v31  ;;  %v3999_v34 = vmul.f32 0.2, %v3679_v33  ;;  %vm3839_vm14 = vcmp.gt.f32.partialorder %v3679_v33, 0.0  ;;  %v3680_v48 = vadd.f32 %v13184_v21, %v3308_v37 }
 0x4a1   : > { %14545 = vst [vmem:[#allocation10_spill] sm:$0xff] %v13335_v46  ;;  %10665 = vmatprep.mubr.msk.bf16.mxu1 %vm4336_vm9, %v13335_v46  ;;  %v4161_v62 = vsel %vm3841_vm13, %v3681_v12, %v4001_v2  ;;  %vm3842_vm15 = vcmp.gt.f32.partialorder %v3682_v27, 0.0  ;;  %v4002_v1 = vmul.f32 0.2, %v3682_v27 }
 0x4a2   : > { %10666 = vmatmul.mubr.msk.bf16.gmra.mrb[68].mxu1 %vm4336_vm9, %v13332_v31  ;;  %v4159_v15 = vsel %vm3839_vm14, %v3679_v33, %v3999_v34  ;;  %v4000_v23 = vmul.f32 0.2, %v3680_v48  ;;  %vm3840_vm3 = vcmp.gt.f32.partialorder %v3680_v48, 0.0 }
 0x4a3   : > { %v4162_v12 = vsel %vm3842_vm15, %v3682_v27, %v4002_v1 }
 0x4a4   : > { %v10579_v56 = vpop.f32.mrb[148].mxu0  ;;  %v4160_v2 = vsel %vm3840_vm3, %v3680_v48, %v4000_v23 }
 0x4a5   : > { %v3685_v49 = vadd.f32 %v13184_v21, %v10579_v56  ;;  %v3321_v60 = vpop.f32.mrb[149].mxu0 }
 0x4a6   : > { %v3683_v13 = vadd.f32 %v13184_v21, %v3321_v60  ;;  %v10580_v54 = vpop.f32.mrb[150].mxu0 }
 0x4a7   : > { %vm3845_vm1 = vcmp.gt.f32.partialorder %v3685_v49, 0.0  ;;  %v4005_v16 = vmul.f32 0.2, %v3685_v49  ;;  %v3686_v3 = vadd.f32 %v13184_v21, %v10580_v54  ;;  %v3324_v17 = vpop.f32.mrb[151].mxu0 }
 0x4a8   : > { %vm3843_vm2 = vcmp.gt.f32.partialorder %v3683_v13, 0.0  ;;  %v4003_v19 = vmul.f32 0.2, %v3683_v13  ;;  %v3684_v8 = vadd.f32 %v13184_v21, %v3324_v17 }
 0x4a9   : > { %v4165_v61 = vsel %vm3845_vm1, %v3685_v49, %v4005_v16  ;;  %vm3846_vm4 = vcmp.gt.f32.partialorder %v3686_v3, 0.0  ;;  %v4006_v20 = vmul.f32 0.2, %v3686_v3 }
 0x4aa   : > { %v4249_v30 = vmax.f32 %v4161_v62, %v4165_v61  ;;  %v4163_v32 = vsel %vm3843_vm2, %v3683_v13, %v4003_v19  ;;  %vm3844_vm5 = vcmp.gt.f32.partialorder %v3684_v8, 0.0  ;;  %v4004_v44 = vmul.f32 0.2, %v3684_v8 }
 0x4ab   : > { %v4247_v33 = vmax.f32 %v4159_v15, %v4163_v32  ;;  %v4166_v37 = vsel %vm3846_vm4, %v3686_v3, %v4006_v20 }
 0x4ac   : > { %v4250_v34 = vmax.f32 %v4162_v12, %v4166_v37  ;;  %v4164_v56 = vsel %vm3844_vm5, %v3684_v8, %v4004_v44  ;;  %v10583_v60 = vpop.f32.mrb[152].mxu0 }
 0x4ad   : > { %v4248_v54 = vmax.f32 %v4160_v2, %v4164_v56  ;;  %v3337_v31 = vpop.f32.mrb[153].mxu0  ;;  %v3689_v17 = vadd.f32 %v13184_v21, %v10583_v60 }
 0x4ae   : > { %v10584_v46 = vpop.f32.mrb[154].mxu0  ;;  %v13349_v49 = vpack.c.bf16 %v4250_v34, %v4249_v30  ;;  %v3687_v62 = vadd.f32 %v13184_v21, %v3337_v31 }
 0x4af   : > { %v3340_v13 = vpop.f32.mrb[155].mxu0  ;;  %v13352_v16 = vpack.c.bf16 %v4248_v54, %v4247_v33  ;;  %v4009_v27 = vmul.f32 0.2, %v3689_v17  ;;  %v3690_v48 = vadd.f32 %v13184_v21, %v10584_v46  ;;  %vm3849_vm6 = vcmp.gt.f32.partialorder %v3689_v17, 0.0 }
 0x4b0   : > { %14546 = vst [vmem:[#allocation11_spill] sm:$0xff] %v13349_v49  ;;  %v4007_v1 = vmul.f32 0.2, %v3687_v62  ;;  %vm3847_vm0 = vcmp.gt.f32.partialorder %v3687_v62, 0.0  ;;  %v3688_v15 = vadd.f32 %v13184_v21, %v3340_v13 }
 0x4b1   : > { %10669 = vmatprep.mubr.msk.bf16.mxu1 %vm4336_vm9, %v13352_v16  ;;  %v4169_v19 = vsel %vm3849_vm6, %v3689_v17, %v4009_v27  ;;  %vm3850_vm7 = vcmp.gt.f32.partialorder %v3690_v48, 0.0  ;;  %v4010_v8 = vmul.f32 0.2, %v3690_v48 }
 0x4b2   : > { %10670 = vmatmul.mubr.msk.bf16.gmra.mrb[72].mxu1 %vm4336_vm9, %v13349_v49  ;;  %v4167_v30 = vsel %vm3847_vm0, %v3687_v62, %v4007_v1  ;;  %v4008_v12 = vmul.f32 0.2, %v3688_v15  ;;  %vm3848_vm11 = vcmp.gt.f32.partialorder %v3688_v15, 0.0 }
 0x4b3   : > { %v4170_v17 = vsel %vm3850_vm7, %v3690_v48, %v4010_v8  ;;  %v11868_v48 = vld [vmem:[%s14428_s3 + $0x50] sm:$0xff]  }
 0x4b4   : > { %v10587_v3 = vpop.f32.mrb[156].mxu0  ;;  %v4168_v27 = vsel %vm3848_vm11, %v3688_v15, %v4008_v12  ;;  %v11869_v15 = vld [vmem:[%s14428_s3 + $0x58] sm:$0xff]  }
 0x4b5   : > { %v3693_v31 = vadd.f32 %v13184_v21, %v10587_v3  ;;  %v3353_v23 = vpop.f32.mrb[157].mxu0 }
 0x4b6   : > { %v3691_v61 = vadd.f32 %v13184_v21, %v3353_v23  ;;  %v10588_v20 = vpop.f32.mrb[158].mxu0 }
 0x4b7   : > { %vm3853_vm8 = vcmp.gt.f32.partialorder %v3693_v31, 0.0  ;;  %v4013_v46 = vmul.f32 0.2, %v3693_v31  ;;  %v3694_v32 = vadd.f32 %v13184_v21, %v10588_v20  ;;  %v3356_v44 = vpop.f32.mrb[159].mxu0 }
 0x4b8   : > { %vm3851_vm10 = vcmp.gt.f32.partialorder %v3691_v61, 0.0  ;;  %v4011_v33 = vmul.f32 0.2, %v3691_v61  ;;  %v3692_v37 = vadd.f32 %v13184_v21, %v3356_v44  ;;  %v11867_v21 = vld [vmem:[%s14428_s3 + $0x48] sm:$0xff]  }
 0x4b9   : > { %v4173_v2 = vsel %vm3853_vm8, %v3693_v31, %v4013_v46  ;;  %vm3854_vm12 = vcmp.gt.f32.partialorder %v3694_v32, 0.0  ;;  %v4014_v34 = vmul.f32 0.2, %v3694_v32  ;;  %v14550_v31 = vld [vmem:[#allocation11_spill] sm:$0xff] }
 0x4ba   : > { %v4253_v56 = vmax.f32 %v4169_v19, %v4173_v2  ;;  %v4171_v60 = vsel %vm3851_vm10, %v3691_v61, %v4011_v33  ;;  %vm3852_vm13 = vcmp.gt.f32.partialorder %v3692_v37, 0.0  ;;  %v4012_v54 = vmul.f32 0.2, %v3692_v37  ;;  %v11870_v19 = vld [vmem:[%s14430_s5 + $0x20] sm:$0xff]  }
 0x4bb   : > { %v4251_v62 = vmax.f32 %v4167_v30, %v4171_v60  ;;  %v4174_v13 = vsel %vm3854_vm12, %v3694_v32, %v4014_v34 }
 0x4bc   : > { %v4254_v1 = vmax.f32 %v4170_v17, %v4174_v13  ;;  %v4172_v3 = vsel %vm3852_vm13, %v3692_v37, %v4012_v54  ;;  %v11875_v13 = vld [vmem:[%s14430_s5 + $0x8] sm:$0xff]  }
 0x4bd   : > { %v4252_v23 = vmax.f32 %v4168_v27, %v4172_v3 }
 0x4be   : > { %v13365_v20 = vpack.c.bf16 %v4254_v1, %v4253_v56 }
 0x4bf   : > { %v13367_v49 = vpack.c.bf16 %v4252_v23, %v4251_v62 }
 0x4c1   : > { %10673 = vmatprep.mubr.msk.bf16.mxu1 %vm4336_vm9, %v13367_v49 }
 0x4c2   : > { %10674 = vmatmul.mubr.msk.bf16.gmra.mrb[76].mxu1 %vm4336_vm9, %v13365_v20 }
 0x4c3   : > { %10685 = vmatprep.mubr.bf16.mxu1 %v14542_v24 }
 0x4ca   : > { %10686 = vmatmul.mubr.bf16.vlgmr.msra.gmra.mrb[0].mxu1 %v14542_v24 }
 0x4cb   : > { %10689 = vmatprep.mubr.msk.bf16.mxu1 %vm4336_vm9, %v12983_v4  ;;  %10766 = vmatpush3.bf16.msra.mxu1 %v13242_v18  ;;  %v14548_v4 = vld [vmem:[#allocation10_spill] sm:$0xff]  ;;  %v14549_v18 = vld [vmem:[#allocation9_spill] sm:$0xff] }
 0x4cc   : > { %10767 = vmatprep.subr.bf16.mxu1 %v11867_v21 }
 0x4cf   : > { %10768 = vmatpush3.bf16.msra.mxu1 %v11867_v21  ;;  %v11876_v21 = vld [vmem:[%s14430_s5 + $0x10] sm:$0xff]  }
 0x4d0   : > { %10769 = vmatprep.subr.bf16.mxu1 %v11868_v48 }
 0x4d2   : > { %10690 = vmatmul.mubr.msk.bf16.gmra.mrb[4].mxu1 %vm4336_vm9, %v12980_v63  ;;  %v14547_v63 = vld [vmem:[#allocation8_spill] sm:$0xff] }
 0x4d3   : > { %10693 = vmatprep.mubr.msk.bf16.mxu1 %vm4336_vm9, %v13008_v45  ;;  %10770 = vmatpush3.bf16.msra.mxu1 %v11868_v48 }
 0x4d4   : > { %10771 = vmatprep.subr.bf16.mxu1 %v11869_v15 }
 0x4d7   : > { %10772 = vmatpush3.bf16.msra.mxu1 %v11869_v15 }
 0x4d8   : > { %10853 = vmatprep.subr.bf16.mxu1 %v11870_v19 }
 0x4da   : > { %10694 = vmatmul.mubr.msk.bf16.gmra.mrb[8].mxu1 %vm4336_vm9, %v13005_v42 }
 0x4db   : > { %10697 = vmatprep.mubr.msk.bf16.mxu1 %vm4336_vm9, %v13036_v28 }
 0x4e2   : > { %10698 = vmatmul.mubr.msk.bf16.gmra.mrb[12].mxu1 %vm4336_vm9, %v13033_v25 }
 0x4e3   : > { %10701 = vmatprep.mubr.msk.bf16.mxu1 %vm4336_vm9, %v13061_v14 }
 0x4ea   : > { %10702 = vmatmul.mubr.msk.bf16.gmra.mrb[16].mxu1 %vm4336_vm9, %v13058_v0 }
 0x4eb   : > { %10705 = vmatprep.mubr.msk.bf16.mxu1 %vm4336_vm9, %v13086_v52 }
 0x4f2   : > { %10706 = vmatmul.mubr.msk.bf16.gmra.mrb[20].mxu1 %vm4336_vm9, %v13083_v11 }
 0x4f3   : > { %10709 = vmatprep.mubr.msk.bf16.mxu1 %vm4336_vm9, %v13113_v41 }
 0x4fa   : > { %10710 = vmatmul.mubr.msk.bf16.gmra.mrb[24].mxu1 %vm4336_vm9, %v13110_v38 }
 0x4fb   : > { %10713 = vmatprep.mubr.msk.bf16.mxu1 %vm4336_vm9, %v13131_v26 }
 0x502   : > { %10714 = vmatmul.mubr.msk.bf16.gmra.mrb[28].mxu1 %vm4336_vm9, %v13128_v22 }
 0x503   : > { %10717 = vmatprep.mubr.msk.bf16.mxu1 %vm4336_vm9, %v13151_v7 }
 0x50a   : > { %10718 = vmatmul.mubr.msk.bf16.gmra.mrb[32].mxu1 %vm4336_vm9, %v13148_v55 }
 0x50b   : > { %10721 = vmatprep.mubr.msk.bf16.mxu1 %vm4336_vm9, %v13168_v59 }
 0x512   : > { %10722 = vmatmul.mubr.msk.bf16.gmra.mrb[36].mxu1 %vm4336_vm9, %v13165_v57 }
 0x513   : > { %10725 = vmatprep.mubr.msk.bf16.mxu1 %vm4336_vm9, %v13190_v50 }
 0x51a   : > { %10726 = vmatmul.mubr.msk.bf16.gmra.mrb[40].mxu1 %vm4336_vm9, %v13187_v47 }
 0x51b   : > { %10729 = vmatprep.mubr.msk.bf16.mxu1 %vm4336_vm9, %v13210_v10 }
 0x522   : > { %10730 = vmatmul.mubr.msk.bf16.gmra.mrb[44].mxu1 %vm4336_vm9, %v13207_v9 }
 0x523   : > { %10733 = vmatprep.mubr.msk.bf16.mxu1 %vm4336_vm9, %v13227_v40 }
 0x52a   : > { %10734 = vmatmul.mubr.msk.bf16.gmra.mrb[48].mxu1 %vm4336_vm9, %v13224_v36 }
 0x52b   : > { %10737 = vmatprep.mubr.msk.bf16.mxu1 %vm4336_vm9, %v13250_v43 }
 0x532   : > { %10738 = vmatmul.mubr.msk.bf16.gmra.mrb[52].mxu1 %vm4336_vm9, %v13247_v35 }
 0x533   : > { %10741 = vmatprep.mubr.msk.bf16.mxu1 %vm4336_vm9, %v13267_v51 }
 0x53a   : > { %10742 = vmatmul.mubr.msk.bf16.gmra.mrb[56].mxu1 %vm4336_vm9, %v13264_v39 }
 0x53b   : > { %10745 = vmatprep.mubr.msk.bf16.mxu1 %vm4336_vm9, %v13284_v58 }
 0x542   : > { %10746 = vmatmul.mubr.msk.bf16.gmra.mrb[60].mxu1 %vm4336_vm9, %v13281_v53 }
 0x543   : > { %10749 = vmatprep.mubr.msk.bf16.mxu1 %vm4336_vm9, %v13301_v5 }
 0x54a   : > { %10750 = vmatmul.mubr.msk.bf16.gmra.mrb[64].mxu1 %vm4336_vm9, %v13298_v6 }
 0x54b   : > { %10753 = vmatprep.mubr.msk.bf16.mxu1 %vm4336_vm9, %v13318_v29 }
 0x552   : > { %10754 = vmatmul.mubr.msk.bf16.gmra.mrb[68].mxu1 %vm4336_vm9, %v14547_v63 }
 0x553   : > { %10757 = vmatprep.mubr.msk.bf16.mxu1 %vm4336_vm9, %v14548_v4 }
 0x55a   : > { %10758 = vmatmul.mubr.msk.bf16.gmra.mrb[72].mxu1 %vm4336_vm9, %v14549_v18 }
 0x55b   : > { %10761 = vmatprep.mubr.msk.bf16.mxu1 %vm4336_vm9, %v13352_v16 }
 0x562   : > { %10762 = vmatmul.mubr.msk.bf16.gmra.mrb[76].mxu1 %vm4336_vm9, %v14550_v31 }
 0x563   : > { %10773 = vmatprep.mubr.msk.bf16.mxu1 %vm4336_vm9, %v13008_v45  ;;  %v11872_v45 = vld [vmem:[%s14430_s5 + $0x30] sm:$0xff]  }
 0x56a   : > { %10774 = vmatmul.mubr.msk.bf16.vlgmr.msra.gmra.mrb[0].mxu1 %vm4336_vm9, %v13005_v42  ;;  %v11871_v42 = vld [vmem:[%s14430_s5 + $0x28] sm:$0xff]  }
 0x56b   : > { %10777 = vmatprep.mubr.msk.bf16.mxu1 %vm4336_vm9, %v13036_v28  ;;  %10854 = vmatpush3.bf16.msra.mxu1 %v11870_v19  ;;  %v11874_v28 = vld [vmem:[%s14430_s5] sm:$0xff]  }
 0x56c   : > { %10855 = vmatprep.subr.bf16.mxu1 %v11871_v42 }
 0x56f   : > { %10856 = vmatpush3.bf16.msra.mxu1 %v11871_v42 }
 0x570   : > { %10857 = vmatprep.subr.bf16.mxu1 %v11872_v45 }
 0x572   : > { %10778 = vmatmul.mubr.msk.bf16.gmra.mrb[4].mxu1 %vm4336_vm9, %v13033_v25  ;;  %v11873_v25 = vld [vmem:[%s14430_s5 + $0x38] sm:$0xff]  }
 0x573   : > { %10781 = vmatprep.mubr.msk.bf16.mxu1 %vm4336_vm9, %v13061_v14  ;;  %10858 = vmatpush3.bf16.msra.mxu1 %v11872_v45 }
 0x574   : > { %10859 = vmatprep.subr.bf16.mxu1 %v11873_v25 }
 0x577   : > { %10860 = vmatpush3.bf16.msra.mxu1 %v11873_v25 }
 0x578   : > { %10901 = vmatprep.subr.bf16.mxu1 %v11874_v28 }
 0x57a   : > { %10782 = vmatmul.mubr.msk.bf16.gmra.mrb[8].mxu1 %vm4336_vm9, %v13058_v0  ;;  %v13557_v0 = vld [vmem:[%s14429_s4] ss:$0 sm:$0xff] }
 0x57b   : > { %10785 = vmatprep.mubr.msk.bf16.mxu1 %vm4336_vm9, %v13086_v52 }
 0x582   : > { %10786 = vmatmul.mubr.msk.bf16.gmra.mrb[12].mxu1 %vm4336_vm9, %v13083_v11 }
 0x583   : > { %10789 = vmatprep.mubr.msk.bf16.mxu1 %vm4336_vm9, %v13113_v41 }
 0x58a   : > { %10790 = vmatmul.mubr.msk.bf16.gmra.mrb[16].mxu1 %vm4336_vm9, %v13110_v38 }
 0x58b   : > { %10793 = vmatprep.mubr.msk.bf16.mxu1 %vm4336_vm9, %v13131_v26 }
 0x592   : > { %10794 = vmatmul.mubr.msk.bf16.gmra.mrb[20].mxu1 %vm4336_vm9, %v13128_v22 }
 0x593   : > { %10797 = vmatprep.mubr.msk.bf16.mxu1 %vm4336_vm9, %v13151_v7 }
 0x59a   : > { %10798 = vmatmul.mubr.msk.bf16.gmra.mrb[24].mxu1 %vm4336_vm9, %v13148_v55 }
 0x59b   : > { %10801 = vmatprep.mubr.msk.bf16.mxu1 %vm4336_vm9, %v13168_v59 }
 0x5a2   : > { %10802 = vmatmul.mubr.msk.bf16.gmra.mrb[28].mxu1 %vm4336_vm9, %v13165_v57 }
 0x5a3   : > { %10805 = vmatprep.mubr.msk.bf16.mxu1 %vm4336_vm9, %v13190_v50 }
 0x5aa   : > { %10806 = vmatmul.mubr.msk.bf16.gmra.mrb[32].mxu1 %vm4336_vm9, %v13187_v47 }
 0x5ab   : > { %10809 = vmatprep.mubr.msk.bf16.mxu1 %vm4336_vm9, %v13210_v10 }
 0x5b2   : > { %10810 = vmatmul.mubr.msk.bf16.gmra.mrb[36].mxu1 %vm4336_vm9, %v13207_v9 }
 0x5b3   : > { %10813 = vmatprep.mubr.msk.bf16.mxu1 %vm4336_vm9, %v13227_v40 }
 0x5ba   : > { %10814 = vmatmul.mubr.msk.bf16.gmra.mrb[40].mxu1 %vm4336_vm9, %v13224_v36 }
 0x5bb   : > { %10817 = vmatprep.mubr.msk.bf16.mxu1 %vm4336_vm9, %v13250_v43 }
 0x5c2   : > { %10818 = vmatmul.mubr.msk.bf16.gmra.mrb[44].mxu1 %vm4336_vm9, %v13247_v35 }
 0x5c3   : > { %10821 = vmatprep.mubr.msk.bf16.mxu1 %vm4336_vm9, %v13267_v51 }
 0x5ca   : > { %10822 = vmatmul.mubr.msk.bf16.gmra.mrb[48].mxu1 %vm4336_vm9, %v13264_v39 }
 0x5cb   : > { %10825 = vmatprep.mubr.msk.bf16.mxu1 %vm4336_vm9, %v13284_v58 }
 0x5d2   : > { %10826 = vmatmul.mubr.msk.bf16.gmra.mrb[52].mxu1 %vm4336_vm9, %v13281_v53 }
 0x5d3   : > { %10829 = vmatprep.mubr.msk.bf16.mxu1 %vm4336_vm9, %v13301_v5 }
 0x5da   : > { %10830 = vmatmul.mubr.msk.bf16.gmra.mrb[56].mxu1 %vm4336_vm9, %v13298_v6 }
 0x5db   : > { %10833 = vmatprep.mubr.msk.bf16.mxu1 %vm4336_vm9, %v13318_v29 }
 0x5e2   : > { %10834 = vmatmul.mubr.msk.bf16.gmra.mrb[60].mxu1 %vm4336_vm9, %v14547_v63 }
 0x5e3   : > { %10837 = vmatprep.mubr.msk.bf16.mxu1 %vm4336_vm9, %v14548_v4 }
 0x5ea   : > { %10838 = vmatmul.mubr.msk.bf16.gmra.mrb[64].mxu1 %vm4336_vm9, %v14549_v18 }
 0x5eb   : > { %10841 = vmatprep.mubr.msk.bf16.mxu1 %vm4336_vm9, %v13352_v16 }
 0x5f2   : > { %10842 = vmatmul.mubr.msk.bf16.gmra.mrb[68].mxu1 %vm4336_vm9, %v14550_v31 }
 0x5f3   : > { %10845 = vmatprep.mubr.msk.bf16.mxu1 %vm4336_vm9, %v13367_v49 }
 0x5fa   : > { %10846 = vmatmul.mubr.msk.bf16.gmra.mrb[72].mxu1 %vm4336_vm9, %v13365_v20 }
 0x5fb   : > { %10849 = vmatprep.mubr.bf16.mxu1 %v14542_v24 }
 0x602   : > { %10850 = vmatmul.mubr.bf16.gmra.mrb[76].mxu1 %v14542_v24 }
 0x63d   : > { %v10775_v14 = vpop.f32.mrb[0].mxu1 }
 0x63e   : > { %v5256_v11 = vpop.f32.mrb[1].mxu1  ;;  %v5664_v52 = vadd.f32 %v10775_v14, %v13557_v0 }
 0x63f   : > { %v10776_v38 = vpop.f32.mrb[2].mxu1  ;;  %v5662_v41 = vadd.f32 %v13557_v0, %v5256_v11 }
 0x640   : > { %v5259_v22 = vpop.f32.mrb[3].mxu1  ;;  %v5824_v26 = vmul.f32 0.2, %v5664_v52  ;;  %v5665_v55 = vadd.f32 %v10776_v38, %v13557_v0  ;;  %vm5744_vm14 = vcmp.gt.f32.partialorder %v5664_v52, 0.0 }
 0x641   : > { %v5822_v7 = vmul.f32 0.2, %v5662_v41  ;;  %vm5742_vm15 = vcmp.gt.f32.partialorder %v5662_v41, 0.0  ;;  %v5663_v57 = vadd.f32 %v13557_v0, %v5259_v22 }
 0x642   : > { %v5904_v9 = vsel %vm5744_vm14, %v5664_v52, %v5824_v26  ;;  %vm5745_vm1 = vcmp.gt.f32.partialorder %v5665_v55, 0.0  ;;  %v5825_v10 = vmul.f32 0.2, %v5665_v55 }
 0x643   : > { %v5902_v35 = vsel %vm5742_vm15, %v5662_v41, %v5822_v7  ;;  %v5823_v53 = vmul.f32 0.2, %v5663_v57  ;;  %vm5743_vm4 = vcmp.gt.f32.partialorder %v5663_v57, 0.0 }
 0x644   : > { %v5905_v61 = vsel %vm5745_vm1, %v5665_v55, %v5825_v10  ;;  %v11877_v10 = vld [vmem:[%s14430_s5 + $0x18] sm:$0xff]  }
 0x645   : > { %v10779_v59 = vpop.f32.mrb[4].mxu1  ;;  %v5903_v32 = vsel %vm5743_vm4, %v5663_v57, %v5823_v53 }
 0x646   : > { %v5668_v47 = vadd.f32 %v10779_v59, %v13557_v0  ;;  %v5272_v50 = vpop.f32.mrb[5].mxu1 }
 0x647   : > { %v5666_v36 = vadd.f32 %v13557_v0, %v5272_v50  ;;  %v10780_v40 = vpop.f32.mrb[6].mxu1 }
 0x648   : > { %vm5748_vm2 = vcmp.gt.f32.partialorder %v5668_v47, 0.0  ;;  %v5828_v43 = vmul.f32 0.2, %v5668_v47  ;;  %v5669_v39 = vadd.f32 %v10780_v40, %v13557_v0  ;;  %v5275_v51 = vpop.f32.mrb[7].mxu1 }
 0x649   : > { %vm5746_vm3 = vcmp.gt.f32.partialorder %v5666_v36, 0.0  ;;  %v5826_v58 = vmul.f32 0.2, %v5666_v36  ;;  %v5667_v6 = vadd.f32 %v13557_v0, %v5275_v51 }
 0x64a   : > { %v5908_v5 = vsel %vm5748_vm2, %v5668_v47, %v5828_v43  ;;  %vm5749_vm5 = vcmp.gt.f32.partialorder %v5669_v39, 0.0  ;;  %v5829_v29 = vmul.f32 0.2, %v5669_v39 }
 0x64b   : > { %v5984_v49 = vmax.f32 %v5904_v9, %v5908_v5  ;;  %v5906_v16 = vsel %vm5746_vm3, %v5666_v36, %v5826_v58  ;;  %vm5747_vm6 = vcmp.gt.f32.partialorder %v5667_v6, 0.0  ;;  %v5827_v8 = vmul.f32 0.2, %v5667_v6 }
 0x64c   : > { %v5982_v30 = vmax.f32 %v5902_v35, %v5906_v16  ;;  %v5909_v46 = vsel %vm5749_vm5, %v5669_v39, %v5829_v29 }
 0x64d   : > { %v5985_v44 = vmax.f32 %v5905_v61, %v5909_v46  ;;  %v5907_v12 = vsel %vm5747_vm6, %v5667_v6, %v5827_v8  ;;  %v10783_v33 = vpop.f32.mrb[8].mxu1 }
 0x64e   : > { %v5983_v37 = vmax.f32 %v5903_v32, %v5907_v12  ;;  %v5288_v2 = vpop.f32.mrb[9].mxu1  ;;  %v5672_v56 = vadd.f32 %v10783_v33, %v13557_v0 }
 0x64f   : > { %v13568_v34 = vpack.c.bf16 %v5985_v44, %v5984_v49  ;;  %v10784_v60 = vpop.f32.mrb[10].mxu1  ;;  %v5670_v54 = vadd.f32 %v13557_v0, %v5288_v2 }
 0x650   : > { %v5291_v17 = vpop.f32.mrb[11].mxu1  ;;  %v13572_v62 = vpack.c.bf16 %v5983_v37, %v5982_v30  ;;  %v5832_v27 = vmul.f32 0.2, %v5672_v56  ;;  %v5673_v1 = vadd.f32 %v10784_v60, %v13557_v0  ;;  %vm5752_vm0 = vcmp.gt.f32.partialorder %v5672_v56, 0.0 }
 0x651   : > { %v5830_v3 = vmul.f32 0.2, %v5670_v54  ;;  %vm5750_vm7 = vcmp.gt.f32.partialorder %v5670_v54, 0.0  ;;  %v5671_v23 = vadd.f32 %v13557_v0, %v5291_v17 }
 0x652   : > { %10861 = vmatprep.mubr.msk.bf16.mxu1 %vm4336_vm9, %v13572_v62  ;;  %v5912_v63 = vsel %vm5752_vm0, %v5672_v56, %v5832_v27  ;;  %vm5753_vm8 = vcmp.gt.f32.partialorder %v5673_v1, 0.0  ;;  %v5833_v4 = vmul.f32 0.2, %v5673_v1 }
 0x653   : > { %10862 = vmatmul.mubr.msk.bf16.vlgmr.msra.gmra.mrb[80].mxu1 %vm4336_vm9, %v13568_v34  ;;  %v5910_v19 = vsel %vm5750_vm7, %v5670_v54, %v5830_v3  ;;  %vm5751_vm12 = vcmp.gt.f32.partialorder %v5671_v23, 0.0 }
 0x654   : > { %10902 = vmatpush3.bf16.msra.mxu1 %v11874_v28  ;;  %v5831_v28 = vmul.f32 0.2, %v5671_v23  ;;  %v5913_v55 = vsel %vm5753_vm8, %v5673_v1, %v5833_v4 }
 0x655   : > { %v10787_v20 = vpop.f32.mrb[12].mxu1  ;;  %10903 = vmatprep.subr.bf16.mxu1 %v11875_v13 }
 0x656   : > { %v5676_v48 = vadd.f32 %v10787_v20, %v13557_v0  ;;  %v5304_v15 = vpop.f32.mrb[13].mxu1  ;;  %v5911_v59 = vsel %vm5751_vm12, %v5671_v23, %v5831_v28  ;;  %v13613_v23 = vld [vmem:[%s14430_s5 + $0x40] sm:$0xff]  }
 0x657   : > { %v5674_v18 = vadd.f32 %v13557_v0, %v5304_v15  ;;  %v10788_v31 = vpop.f32.mrb[14].mxu1 }
 0x658   : > { %vm5756_vm10 = vcmp.gt.f32.partialorder %v5676_v48, 0.0  ;;  %v5836_v42 = vmul.f32 0.2, %v5676_v48  ;;  %v5677_v45 = vadd.f32 %v10788_v31, %v13557_v0  ;;  %v5307_v25 = vpop.f32.mrb[15].mxu1  ;;  %10904 = vmatpush3.bf16.msra.mxu1 %v11875_v13 }
 0x659   : > { %vm5754_vm11 = vcmp.gt.f32.partialorder %v5674_v18, 0.0  ;;  %v5834_v14 = vmul.f32 0.2, %v5674_v18  ;;  %v5675_v11 = vadd.f32 %v13557_v0, %v5307_v25  ;;  %10905 = vmatprep.subr.bf16.mxu1 %v11876_v21 }
 0x65a   : > { %v5916_v52 = vsel %vm5756_vm10, %v5676_v48, %v5836_v42  ;;  %vm5757_vm13 = vcmp.gt.f32.partialorder %v5677_v45, 0.0  ;;  %v5837_v38 = vmul.f32 0.2, %v5677_v45 }
 0x65b   : > { %v5988_v41 = vmax.f32 %v5912_v63, %v5916_v52  ;;  %v5914_v22 = vsel %vm5754_vm11, %v5674_v18, %v5834_v14  ;;  %vm5755_vm14 = vcmp.gt.f32.partialorder %v5675_v11, 0.0  ;;  %v5835_v26 = vmul.f32 0.2, %v5675_v11 }
 0x65c   : > { %v5986_v7 = vmax.f32 %v5910_v19, %v5914_v22  ;;  %v5917_v57 = vsel %vm5757_vm13, %v5677_v45, %v5837_v38  ;;  %10906 = vmatpush3.bf16.msra.mxu1 %v11876_v21 }
 0x65d   : > { %v5989_v47 = vmax.f32 %v5913_v55, %v5917_v57  ;;  %v5915_v50 = vsel %vm5755_vm14, %v5675_v11, %v5835_v26  ;;  %v10791_v9 = vpop.f32.mrb[16].mxu1  ;;  %10907 = vmatprep.subr.bf16.mxu1 %v11877_v10 }
 0x65e   : > { %v5987_v36 = vmax.f32 %v5911_v59, %v5915_v50  ;;  %v5320_v40 = vpop.f32.mrb[17].mxu1  ;;  %v5680_v35 = vadd.f32 %v10791_v9, %v13557_v0 }
 0x65f   : > { %v10792_v43 = vpop.f32.mrb[18].mxu1  ;;  %v13595_v39 = vpack.c.bf16 %v5989_v47, %v5988_v41  ;;  %v5678_v51 = vadd.f32 %v13557_v0, %v5320_v40 }
 0x660   : > { %v5323_v53 = vpop.f32.mrb[19].mxu1  ;;  %v13598_v58 = vpack.c.bf16 %v5987_v36, %v5986_v7  ;;  %10908 = vmatpush3.bf16.msra.mxu1 %v11877_v10  ;;  %v5840_v6 = vmul.f32 0.2, %v5680_v35  ;;  %v5681_v5 = vadd.f32 %v10792_v43, %v13557_v0  ;;  %vm5760_vm15 = vcmp.gt.f32.partialorder %v5680_v35, 0.0 }
 0x661   : > { %v5838_v29 = vmul.f32 0.2, %v5678_v51  ;;  %vm5758_vm1 = vcmp.gt.f32.partialorder %v5678_v51, 0.0  ;;  %v5679_v49 = vadd.f32 %v13557_v0, %v5323_v53  ;;  %10949 = vmatprep.subr.bf16.mxu1 %v13613_v23 }
 0x662   : > { %10865 = vmatprep.mubr.msk.bf16.mxu1 %vm4336_vm9, %v13598_v58  ;;  %v5920_v30 = vsel %vm5760_vm15, %v5680_v35, %v5840_v6  ;;  %vm5761_vm2 = vcmp.gt.f32.partialorder %v5681_v5, 0.0  ;;  %v5841_v46 = vmul.f32 0.2, %v5681_v5 }
 0x663   : > { %10866 = vmatmul.mubr.msk.bf16.gmra.mrb[84].mxu1 %vm4336_vm9, %v13595_v39  ;;  %v5918_v12 = vsel %vm5758_vm1, %v5678_v51, %v5838_v29  ;;  %v5839_v56 = vmul.f32 0.2, %v5679_v49  ;;  %vm5759_vm5 = vcmp.gt.f32.partialorder %v5679_v49, 0.0 }
 0x664   : > { %v5921_v20 = vsel %vm5761_vm2, %v5681_v5, %v5841_v46 }
 0x665   : > { %v10795_v16 = vpop.f32.mrb[20].mxu1  ;;  %v5919_v15 = vsel %vm5759_vm5, %v5679_v49, %v5839_v56 }
 0x666   : > { %v5684_v8 = vadd.f32 %v10795_v16, %v13557_v0  ;;  %v5336_v61 = vpop.f32.mrb[21].mxu1 }
 0x667   : > { %v5682_v32 = vadd.f32 %v13557_v0, %v5336_v61  ;;  %v10796_v44 = vpop.f32.mrb[22].mxu1 }
 0x668   : > { %vm5764_vm3 = vcmp.gt.f32.partialorder %v5684_v8, 0.0  ;;  %v5844_v33 = vmul.f32 0.2, %v5684_v8  ;;  %v5685_v37 = vadd.f32 %v10796_v44, %v13557_v0  ;;  %v5339_v2 = vpop.f32.mrb[23].mxu1 }
 0x669   : > { %vm5762_vm4 = vcmp.gt.f32.partialorder %v5682_v32, 0.0  ;;  %v5842_v60 = vmul.f32 0.2, %v5682_v32  ;;  %v5683_v54 = vadd.f32 %v13557_v0, %v5339_v2 }
 0x66a   : > { %v5924_v17 = vsel %vm5764_vm3, %v5684_v8, %v5844_v33  ;;  %vm5765_vm6 = vcmp.gt.f32.partialorder %v5685_v37, 0.0  ;;  %v5845_v13 = vmul.f32 0.2, %v5685_v37 }
 0x66b   : > { %v5992_v27 = vmax.f32 %v5920_v30, %v5924_v17  ;;  %v5922_v1 = vsel %vm5762_vm4, %v5682_v32, %v5842_v60  ;;  %vm5763_vm0 = vcmp.gt.f32.partialorder %v5683_v54, 0.0  ;;  %v5843_v3 = vmul.f32 0.2, %v5683_v54 }
 0x66c   : > { %v5990_v21 = vmax.f32 %v5918_v12, %v5922_v1  ;;  %v5925_v48 = vsel %vm5765_vm6, %v5685_v37, %v5845_v13 }
 0x66d   : > { %v5993_v63 = vmax.f32 %v5921_v20, %v5925_v48  ;;  %v5923_v4 = vsel %vm5763_vm0, %v5683_v54, %v5843_v3  ;;  %v10799_v18 = vpop.f32.mrb[24].mxu1 }
 0x66e   : > { %v5991_v31 = vmax.f32 %v5919_v15, %v5923_v4  ;;  %v5352_v19 = vpop.f32.mrb[25].mxu1  ;;  %v5688_v42 = vadd.f32 %v10799_v18, %v13557_v0 }
 0x66f   : > { %v10800_v45 = vpop.f32.mrb[26].mxu1  ;;  %v13618_v25 = vpack.c.bf16 %v5993_v63, %v5992_v27  ;;  %v5686_v28 = vadd.f32 %v13557_v0, %v5352_v19 }
 0x670   : > { %v5355_v14 = vpop.f32.mrb[27].mxu1  ;;  %v13621_v11 = vpack.c.bf16 %v5991_v31, %v5990_v21  ;;  %v5848_v52 = vmul.f32 0.2, %v5688_v42  ;;  %v5689_v38 = vadd.f32 %v10800_v45, %v13557_v0  ;;  %vm5768_vm7 = vcmp.gt.f32.partialorder %v5688_v42, 0.0 }
 0x671   : > { %v5846_v41 = vmul.f32 0.2, %v5686_v28  ;;  %vm5766_vm8 = vcmp.gt.f32.partialorder %v5686_v28, 0.0  ;;  %v5687_v22 = vadd.f32 %v13557_v0, %v5355_v14 }
 0x672   : > { %10869 = vmatprep.mubr.msk.bf16.mxu1 %vm4336_vm9, %v13621_v11  ;;  %v5928_v57 = vsel %vm5768_vm7, %v5688_v42, %v5848_v52  ;;  %vm5769_vm10 = vcmp.gt.f32.partialorder %v5689_v38, 0.0  ;;  %v5849_v59 = vmul.f32 0.2, %v5689_v38 }
 0x673   : > { %10870 = vmatmul.mubr.msk.bf16.gmra.mrb[88].mxu1 %vm4336_vm9, %v13618_v25  ;;  %v5926_v9 = vsel %vm5766_vm8, %v5686_v28, %v5846_v41  ;;  %v5847_v35 = vmul.f32 0.2, %v5687_v22  ;;  %vm5767_vm13 = vcmp.gt.f32.partialorder %v5687_v22, 0.0 }
 0x674   : > { %v5929_v16 = vsel %vm5769_vm10, %v5689_v38, %v5849_v59 }
 0x675   : > { %v10803_v26 = vpop.f32.mrb[28].mxu1  ;;  %v5927_v30 = vsel %vm5767_vm13, %v5687_v22, %v5847_v35 }
 0x676   : > { %v5692_v55 = vadd.f32 %v10803_v26, %v13557_v0  ;;  %v5368_v7 = vpop.f32.mrb[29].mxu1 }
 0x677   : > { %v5690_v47 = vadd.f32 %v13557_v0, %v5368_v7  ;;  %v10804_v50 = vpop.f32.mrb[30].mxu1 }
 0x678   : > { %vm5772_vm11 = vcmp.gt.f32.partialorder %v5692_v55, 0.0  ;;  %v5852_v10 = vmul.f32 0.2, %v5692_v55  ;;  %v5693_v36 = vadd.f32 %v10804_v50, %v13557_v0  ;;  %v5371_v40 = vpop.f32.mrb[31].mxu1 }
 0x679   : > { %vm5770_vm12 = vcmp.gt.f32.partialorder %v5690_v47, 0.0  ;;  %v5850_v43 = vmul.f32 0.2, %v5690_v47  ;;  %v5691_v51 = vadd.f32 %v13557_v0, %v5371_v40 }
 0x67a   : > { %v5932_v53 = vsel %vm5772_vm11, %v5692_v55, %v5852_v10  ;;  %vm5773_vm14 = vcmp.gt.f32.partialorder %v5693_v36, 0.0  ;;  %v5853_v6 = vmul.f32 0.2, %v5693_v36 }
 0x67b   : > { %v5996_v5 = vmax.f32 %v5928_v57, %v5932_v53  ;;  %v5930_v29 = vsel %vm5770_vm12, %v5690_v47, %v5850_v43  ;;  %vm5771_vm15 = vcmp.gt.f32.partialorder %v5691_v51, 0.0  ;;  %v5851_v49 = vmul.f32 0.2, %v5691_v51 }
 0x67c   : > { %v5994_v8 = vmax.f32 %v5926_v9, %v5930_v29  ;;  %v5933_v61 = vsel %vm5773_vm14, %v5693_v36, %v5853_v6 }
 0x67d   : > { %v5997_v46 = vmax.f32 %v5929_v16, %v5933_v61  ;;  %v5931_v32 = vsel %vm5771_vm15, %v5691_v51, %v5851_v49  ;;  %v10807_v44 = vpop.f32.mrb[32].mxu1 }
 0x67e   : > { %v5995_v12 = vmax.f32 %v5927_v30, %v5931_v32  ;;  %v5384_v33 = vpop.f32.mrb[33].mxu1  ;;  %v5696_v37 = vadd.f32 %v10807_v44, %v13557_v0 }
 0x67f   : > { %v10808_v2 = vpop.f32.mrb[34].mxu1  ;;  %v13635_v56 = vpack.c.bf16 %v5997_v46, %v5996_v5  ;;  %v5694_v60 = vadd.f32 %v13557_v0, %v5384_v33 }
 0x680   : > { %v5387_v54 = vpop.f32.mrb[35].mxu1  ;;  %v13638_v17 = vpack.c.bf16 %v5995_v12, %v5994_v8  ;;  %v5856_v13 = vmul.f32 0.2, %v5696_v37  ;;  %v5697_v27 = vadd.f32 %v10808_v2, %v13557_v0  ;;  %vm5776_vm1 = vcmp.gt.f32.partialorder %v5696_v37, 0.0 }
 0x681   : > { %v5854_v1 = vmul.f32 0.2, %v5694_v60  ;;  %vm5774_vm2 = vcmp.gt.f32.partialorder %v5694_v60, 0.0  ;;  %v5695_v3 = vadd.f32 %v13557_v0, %v5387_v54 }
 0x682   : > { %10873 = vmatprep.mubr.msk.bf16.mxu1 %vm4336_vm9, %v13638_v17  ;;  %v5936_v15 = vsel %vm5776_vm1, %v5696_v37, %v5856_v13  ;;  %vm5777_vm3 = vcmp.gt.f32.partialorder %v5697_v27, 0.0  ;;  %v5857_v63 = vmul.f32 0.2, %v5697_v27 }
 0x683   : > { %10874 = vmatmul.mubr.msk.bf16.gmra.mrb[92].mxu1 %vm4336_vm9, %v13635_v56  ;;  %v5934_v31 = vsel %vm5774_vm2, %v5694_v60, %v5854_v1  ;;  %v5855_v28 = vmul.f32 0.2, %v5695_v3  ;;  %vm5775_vm6 = vcmp.gt.f32.partialorder %v5695_v3, 0.0 }
 0x684   : > { %v5937_v7 = vsel %vm5777_vm3, %v5697_v27, %v5857_v63 }
 0x685   : > { %v10811_v20 = vpop.f32.mrb[36].mxu1  ;;  %v5935_v47 = vsel %vm5775_vm6, %v5695_v3, %v5855_v28 }
 0x686   : > { %v5700_v21 = vadd.f32 %v10811_v20, %v13557_v0  ;;  %v5400_v48 = vpop.f32.mrb[37].mxu1 }
 0x687   : > { %v5698_v4 = vadd.f32 %v13557_v0, %v5400_v48  ;;  %v10812_v18 = vpop.f32.mrb[38].mxu1 }
 0x688   : > { %vm5780_vm4 = vcmp.gt.f32.partialorder %v5700_v21, 0.0  ;;  %v5860_v19 = vmul.f32 0.2, %v5700_v21  ;;  %v5701_v42 = vadd.f32 %v10812_v18, %v13557_v0  ;;  %v5403_v45 = vpop.f32.mrb[39].mxu1 }
 0x689   : > { %vm5778_vm5 = vcmp.gt.f32.partialorder %v5698_v4, 0.0  ;;  %v5858_v14 = vmul.f32 0.2, %v5698_v4  ;;  %v5699_v52 = vadd.f32 %v13557_v0, %v5403_v45 }
 0x68a   : > { %v5940_v38 = vsel %vm5780_vm4, %v5700_v21, %v5860_v19  ;;  %vm5781_vm0 = vcmp.gt.f32.partialorder %v5701_v42, 0.0  ;;  %v5861_v41 = vmul.f32 0.2, %v5701_v42 }
 0x68b   : > { %v6000_v22 = vmax.f32 %v5936_v15, %v5940_v38  ;;  %v5938_v26 = vsel %vm5778_vm5, %v5698_v4, %v5858_v14  ;;  %vm5779_vm7 = vcmp.gt.f32.partialorder %v5699_v52, 0.0  ;;  %v5859_v55 = vmul.f32 0.2, %v5699_v52 }
 0x68c   : > { %v5998_v57 = vmax.f32 %v5934_v31, %v5938_v26  ;;  %v5941_v59 = vsel %vm5781_vm0, %v5701_v42, %v5861_v41 }
 0x68d   : > { %v6001_v50 = vmax.f32 %v5937_v7, %v5941_v59  ;;  %v5939_v9 = vsel %vm5779_vm7, %v5699_v52, %v5859_v55  ;;  %v10815_v10 = vpop.f32.mrb[40].mxu1 }
 0x68e   : > { %v5999_v36 = vmax.f32 %v5935_v47, %v5939_v9  ;;  %v5416_v40 = vpop.f32.mrb[41].mxu1  ;;  %v5704_v35 = vadd.f32 %v10815_v10, %v13557_v0 }
 0x68f   : > { %v10816_v43 = vpop.f32.mrb[42].mxu1  ;;  %v13652_v51 = vpack.c.bf16 %v6001_v50, %v6000_v22  ;;  %v5702_v53 = vadd.f32 %v13557_v0, %v5416_v40 }
 0x690   : > { %v5419_v6 = vpop.f32.mrb[43].mxu1  ;;  %v13655_v5 = vpack.c.bf16 %v5999_v36, %v5998_v57  ;;  %v5864_v29 = vmul.f32 0.2, %v5704_v35  ;;  %v5705_v49 = vadd.f32 %v10816_v43, %v13557_v0  ;;  %vm5784_vm8 = vcmp.gt.f32.partialorder %v5704_v35, 0.0 }
 0x691   : > { %v5862_v16 = vmul.f32 0.2, %v5702_v53  ;;  %vm5782_vm10 = vcmp.gt.f32.partialorder %v5702_v53, 0.0  ;;  %v5703_v8 = vadd.f32 %v13557_v0, %v5419_v6 }
 0x692   : > { %10877 = vmatprep.mubr.msk.bf16.mxu1 %vm4336_vm9, %v13655_v5  ;;  %v5944_v32 = vsel %vm5784_vm8, %v5704_v35, %v5864_v29  ;;  %vm5785_vm11 = vcmp.gt.f32.partialorder %v5705_v49, 0.0  ;;  %v5865_v44 = vmul.f32 0.2, %v5705_v49 }
 0x693   : > { %10878 = vmatmul.mubr.msk.bf16.gmra.mrb[96].mxu1 %vm4336_vm9, %v13652_v51  ;;  %v5942_v37 = vsel %vm5782_vm10, %v5702_v53, %v5862_v16  ;;  %v5863_v13 = vmul.f32 0.2, %v5703_v8  ;;  %vm5783_vm14 = vcmp.gt.f32.partialorder %v5703_v8, 0.0 }
 0x694   : > { %v5945_v63 = vsel %vm5785_vm11, %v5705_v49, %v5865_v44 }
 0x695   : > { %v10819_v61 = vpop.f32.mrb[44].mxu1  ;;  %v5943_v31 = vsel %vm5783_vm14, %v5703_v8, %v5863_v13 }
 0x696   : > { %v5708_v30 = vadd.f32 %v10819_v61, %v13557_v0  ;;  %v5432_v46 = vpop.f32.mrb[45].mxu1 }
 0x697   : > { %v5706_v12 = vadd.f32 %v13557_v0, %v5432_v46  ;;  %v10820_v33 = vpop.f32.mrb[46].mxu1 }
 0x698   : > { %vm5788_vm12 = vcmp.gt.f32.partialorder %v5708_v30, 0.0  ;;  %v5868_v2 = vmul.f32 0.2, %v5708_v30  ;;  %v5709_v60 = vadd.f32 %v10820_v33, %v13557_v0  ;;  %v5435_v54 = vpop.f32.mrb[47].mxu1 }
 0x699   : > { %vm5786_vm13 = vcmp.gt.f32.partialorder %v5706_v12, 0.0  ;;  %v5866_v27 = vmul.f32 0.2, %v5706_v12  ;;  %v5707_v1 = vadd.f32 %v13557_v0, %v5435_v54 }
 0x69a   : > { %v5948_v3 = vsel %vm5788_vm12, %v5708_v30, %v5868_v2  ;;  %vm5789_vm15 = vcmp.gt.f32.partialorder %v5709_v60, 0.0  ;;  %v5869_v20 = vmul.f32 0.2, %v5709_v60 }
 0x69b   : > { %v6004_v21 = vmax.f32 %v5944_v32, %v5948_v3  ;;  %v5946_v48 = vsel %vm5786_vm13, %v5706_v12, %v5866_v27  ;;  %vm5787_vm1 = vcmp.gt.f32.partialorder %v5707_v1, 0.0  ;;  %v5867_v15 = vmul.f32 0.2, %v5707_v1 }
 0x69c   : > { %v6002_v4 = vmax.f32 %v5942_v37, %v5946_v48  ;;  %v5949_v18 = vsel %vm5789_vm15, %v5709_v60, %v5869_v20 }
 0x69d   : > { %v6005_v19 = vmax.f32 %v5945_v63, %v5949_v18  ;;  %v5947_v42 = vsel %vm5787_vm1, %v5707_v1, %v5867_v15  ;;  %v10823_v45 = vpop.f32.mrb[48].mxu1 }
 0x69e   : > { %v6003_v28 = vmax.f32 %v5943_v31, %v5947_v42  ;;  %v5448_v14 = vpop.f32.mrb[49].mxu1  ;;  %v5712_v52 = vadd.f32 %v10823_v45, %v13557_v0 }
 0x69f   : > { %v10824_v38 = vpop.f32.mrb[50].mxu1  ;;  %v13669_v41 = vpack.c.bf16 %v6005_v19, %v6004_v21  ;;  %v5710_v22 = vadd.f32 %v13557_v0, %v5448_v14 }
 0x6a0   : > { %v5451_v26 = vpop.f32.mrb[51].mxu1  ;;  %v13672_v55 = vpack.c.bf16 %v6003_v28, %v6002_v4  ;;  %v5872_v7 = vmul.f32 0.2, %v5712_v52  ;;  %v5713_v57 = vadd.f32 %v10824_v38, %v13557_v0  ;;  %vm5792_vm2 = vcmp.gt.f32.partialorder %v5712_v52, 0.0 }
 0x6a1   : > { %v5870_v59 = vmul.f32 0.2, %v5710_v22  ;;  %vm5790_vm3 = vcmp.gt.f32.partialorder %v5710_v22, 0.0  ;;  %v5711_v47 = vadd.f32 %v13557_v0, %v5451_v26 }
 0x6a2   : > { %10881 = vmatprep.mubr.msk.bf16.mxu1 %vm4336_vm9, %v13672_v55  ;;  %v5952_v36 = vsel %vm5792_vm2, %v5712_v52, %v5872_v7  ;;  %vm5793_vm4 = vcmp.gt.f32.partialorder %v5713_v57, 0.0  ;;  %v5873_v40 = vmul.f32 0.2, %v5713_v57 }
 0x6a3   : > { %10882 = vmatmul.mubr.msk.bf16.gmra.mrb[100].mxu1 %vm4336_vm9, %v13669_v41  ;;  %v5950_v53 = vsel %vm5790_vm3, %v5710_v22, %v5870_v59  ;;  %v5871_v16 = vmul.f32 0.2, %v5711_v47  ;;  %vm5791_vm0 = vcmp.gt.f32.partialorder %v5711_v47, 0.0 }
 0x6a4   : > { %v5953_v33 = vsel %vm5793_vm4, %v5713_v57, %v5873_v40 }
 0x6a5   : > { %v10827_v50 = vpop.f32.mrb[52].mxu1  ;;  %v5951_v60 = vsel %vm5791_vm0, %v5711_v47, %v5871_v16 }
 0x6a6   : > { %v5716_v9 = vadd.f32 %v10827_v50, %v13557_v0  ;;  %v5464_v10 = vpop.f32.mrb[53].mxu1 }
 0x6a7   : > { %v5714_v35 = vadd.f32 %v13557_v0, %v5464_v10  ;;  %v10828_v43 = vpop.f32.mrb[54].mxu1 }
 0x6a8   : > { %vm5796_vm5 = vcmp.gt.f32.partialorder %v5716_v9, 0.0  ;;  %v5876_v6 = vmul.f32 0.2, %v5716_v9  ;;  %v5717_v29 = vadd.f32 %v10828_v43, %v13557_v0  ;;  %v5467_v49 = vpop.f32.mrb[55].mxu1 }
 0x6a9   : > { %vm5794_vm6 = vcmp.gt.f32.partialorder %v5714_v35, 0.0  ;;  %v5874_v8 = vmul.f32 0.2, %v5714_v35  ;;  %v5715_v61 = vadd.f32 %v13557_v0, %v5467_v49 }
 0x6aa   : > { %v5956_v30 = vsel %vm5796_vm5, %v5716_v9, %v5876_v6  ;;  %vm5797_vm7 = vcmp.gt.f32.partialorder %v5717_v29, 0.0  ;;  %v5877_v46 = vmul.f32 0.2, %v5717_v29 }
 0x6ab   : > { %v6008_v32 = vmax.f32 %v5952_v36, %v5956_v30  ;;  %v5954_v44 = vsel %vm5794_vm6, %v5714_v35, %v5874_v8  ;;  %vm5795_vm8 = vcmp.gt.f32.partialorder %v5715_v61, 0.0  ;;  %v5875_v12 = vmul.f32 0.2, %v5715_v61 }
 0x6ac   : > { %v6006_v37 = vmax.f32 %v5950_v53, %v5954_v44  ;;  %v5957_v2 = vsel %vm5797_vm7, %v5717_v29, %v5877_v46 }
 0x6ad   : > { %v6009_v54 = vmax.f32 %v5953_v33, %v5957_v2  ;;  %v5955_v13 = vsel %vm5795_vm8, %v5715_v61, %v5875_v12  ;;  %v10831_v27 = vpop.f32.mrb[56].mxu1 }
 0x6ae   : > { %v6007_v1 = vmax.f32 %v5951_v60, %v5955_v13  ;;  %v5480_v3 = vpop.f32.mrb[57].mxu1  ;;  %v5720_v20 = vadd.f32 %v10831_v27, %v13557_v0 }
 0x6af   : > { %v10832_v21 = vpop.f32.mrb[58].mxu1  ;;  %v13686_v48 = vpack.c.bf16 %v6009_v54, %v6008_v32  ;;  %v5718_v15 = vadd.f32 %v13557_v0, %v5480_v3 }
 0x6b0   : > { %v5483_v63 = vpop.f32.mrb[59].mxu1  ;;  %v13689_v4 = vpack.c.bf16 %v6007_v1, %v6006_v37  ;;  %v5880_v18 = vmul.f32 0.2, %v5720_v20  ;;  %v5721_v31 = vadd.f32 %v10832_v21, %v13557_v0  ;;  %vm5800_vm10 = vcmp.gt.f32.partialorder %v5720_v20, 0.0 }
 0x6b1   : > { %v5878_v19 = vmul.f32 0.2, %v5718_v15  ;;  %vm5798_vm11 = vcmp.gt.f32.partialorder %v5718_v15, 0.0  ;;  %v5719_v42 = vadd.f32 %v13557_v0, %v5483_v63 }
 0x6b2   : > { %10885 = vmatprep.mubr.msk.bf16.mxu1 %vm4336_vm9, %v13689_v4  ;;  %v5960_v52 = vsel %vm5800_vm10, %v5720_v20, %v5880_v18  ;;  %vm5801_vm12 = vcmp.gt.f32.partialorder %v5721_v31, 0.0  ;;  %v5881_v38 = vmul.f32 0.2, %v5721_v31 }
 0x6b3   : > { %10886 = vmatmul.mubr.msk.bf16.gmra.mrb[104].mxu1 %vm4336_vm9, %v13686_v48  ;;  %v5958_v7 = vsel %vm5798_vm11, %v5718_v15, %v5878_v19  ;;  %v5879_v50 = vmul.f32 0.2, %v5719_v42  ;;  %vm5799_vm15 = vcmp.gt.f32.partialorder %v5719_v42, 0.0 }
 0x6b4   : > { %v5961_v6 = vsel %vm5801_vm12, %v5721_v31, %v5881_v38 }
 0x6b5   : > { %v10835_v45 = vpop.f32.mrb[60].mxu1  ;;  %v5959_v16 = vsel %vm5799_vm15, %v5719_v42, %v5879_v50 }
 0x6b6   : > { %v5724_v28 = vadd.f32 %v10835_v45, %v13557_v0  ;;  %v5496_v14 = vpop.f32.mrb[61].mxu1 }
 0x6b7   : > { %v5722_v22 = vadd.f32 %v13557_v0, %v5496_v14  ;;  %v10836_v26 = vpop.f32.mrb[62].mxu1 }
 0x6b8   : > { %vm5804_vm13 = vcmp.gt.f32.partialorder %v5724_v28, 0.0  ;;  %v5884_v57 = vmul.f32 0.2, %v5724_v28  ;;  %v5725_v59 = vadd.f32 %v10836_v26, %v13557_v0  ;;  %v5499_v47 = vpop.f32.mrb[63].mxu1 }
 0x6b9   : > { %vm5802_vm14 = vcmp.gt.f32.partialorder %v5722_v22, 0.0  ;;  %v5882_v9 = vmul.f32 0.2, %v5722_v22  ;;  %v5723_v10 = vadd.f32 %v13557_v0, %v5499_v47 }
 0x6ba   : > { %v5964_v36 = vsel %vm5804_vm13, %v5724_v28, %v5884_v57  ;;  %vm5805_vm1 = vcmp.gt.f32.partialorder %v5725_v59, 0.0  ;;  %v5885_v40 = vmul.f32 0.2, %v5725_v59 }
 0x6bb   : > { %v6012_v35 = vmax.f32 %v5960_v52, %v5964_v36  ;;  %v5962_v43 = vsel %vm5802_vm14, %v5722_v22, %v5882_v9  ;;  %vm5803_vm2 = vcmp.gt.f32.partialorder %v5723_v10, 0.0  ;;  %v5883_v53 = vmul.f32 0.2, %v5723_v10 }
 0x6bc   : > { %v6010_v29 = vmax.f32 %v5958_v7, %v5962_v43  ;;  %v5965_v49 = vsel %vm5805_vm1, %v5725_v59, %v5885_v40 }
 0x6bd   : > { %v6013_v8 = vmax.f32 %v5961_v6, %v5965_v49  ;;  %v5963_v61 = vsel %vm5803_vm2, %v5723_v10, %v5883_v53  ;;  %v10839_v30 = vpop.f32.mrb[64].mxu1 }
 0x6be   : > { %v6011_v46 = vmax.f32 %v5959_v16, %v5963_v61  ;;  %v5512_v32 = vpop.f32.mrb[65].mxu1  ;;  %v5728_v44 = vadd.f32 %v10839_v30, %v13557_v0 }
 0x6bf   : > { %v10840_v12 = vpop.f32.mrb[66].mxu1  ;;  %v13703_v33 = vpack.c.bf16 %v6013_v8, %v6012_v35  ;;  %v5726_v37 = vadd.f32 %v13557_v0, %v5512_v32 }
 0x6c0   : > { %v5515_v2 = vpop.f32.mrb[67].mxu1  ;;  %v13706_v60 = vpack.c.bf16 %v6011_v46, %v6010_v29  ;;  %v5888_v54 = vmul.f32 0.2, %v5728_v44  ;;  %v5729_v13 = vadd.f32 %v10840_v12, %v13557_v0  ;;  %vm5808_vm3 = vcmp.gt.f32.partialorder %v5728_v44, 0.0 }
 0x6c1   : > { %v5886_v27 = vmul.f32 0.2, %v5726_v37  ;;  %vm5806_vm4 = vcmp.gt.f32.partialorder %v5726_v37, 0.0  ;;  %v5727_v1 = vadd.f32 %v13557_v0, %v5515_v2 }
 0x6c2   : > { %10889 = vmatprep.mubr.msk.bf16.mxu1 %vm4336_vm9, %v13706_v60  ;;  %v5968_v15 = vsel %vm5808_vm3, %v5728_v44, %v5888_v54  ;;  %vm5809_vm5 = vcmp.gt.f32.partialorder %v5729_v13, 0.0  ;;  %v5889_v63 = vmul.f32 0.2, %v5729_v13 }
 0x6c3   : > { %10890 = vmatmul.mubr.msk.bf16.gmra.mrb[108].mxu1 %vm4336_vm9, %v13703_v33  ;;  %v5966_v19 = vsel %vm5806_vm4, %v5726_v37, %v5886_v27  ;;  %v5887_v14 = vmul.f32 0.2, %v5727_v1  ;;  %vm5807_vm7 = vcmp.gt.f32.partialorder %v5727_v1, 0.0 }
 0x6c4   : > { %v5969_v47 = vsel %vm5809_vm5, %v5729_v13, %v5889_v63 }
 0x6c5   : > { %v10843_v3 = vpop.f32.mrb[68].mxu1  ;;  %v5967_v10 = vsel %vm5807_vm7, %v5727_v1, %v5887_v14 }
 0x6c6   : > { %v5732_v20 = vadd.f32 %v10843_v3, %v13557_v0  ;;  %v5528_v21 = vpop.f32.mrb[69].mxu1 }
 0x6c7   : > { %v5730_v18 = vadd.f32 %v13557_v0, %v5528_v21  ;;  %v10844_v31 = vpop.f32.mrb[70].mxu1 }
 0x6c8   : > { %vm5812_vm6 = vcmp.gt.f32.partialorder %v5732_v20, 0.0  ;;  %v5892_v42 = vmul.f32 0.2, %v5732_v20  ;;  %v5733_v45 = vadd.f32 %v10844_v31, %v13557_v0  ;;  %v5531_v28 = vpop.f32.mrb[71].mxu1 }
 0x6c9   : > { %vm5810_vm0 = vcmp.gt.f32.partialorder %v5730_v18, 0.0  ;;  %v5890_v52 = vmul.f32 0.2, %v5730_v18  ;;  %v5731_v38 = vadd.f32 %v13557_v0, %v5531_v28 }
 0x6ca   : > { %v5972_v22 = vsel %vm5812_vm6, %v5732_v20, %v5892_v42  ;;  %vm5813_vm8 = vcmp.gt.f32.partialorder %v5733_v45, 0.0  ;;  %v5893_v26 = vmul.f32 0.2, %v5733_v45 }
 0x6cb   : > { %v6016_v7 = vmax.f32 %v5968_v15, %v5972_v22  ;;  %v5970_v57 = vsel %vm5810_vm0, %v5730_v18, %v5890_v52  ;;  %vm5811_vm10 = vcmp.gt.f32.partialorder %v5731_v38, 0.0  ;;  %v5891_v59 = vmul.f32 0.2, %v5731_v38 }
 0x6cc   : > { %v6014_v50 = vmax.f32 %v5966_v19, %v5970_v57  ;;  %v5973_v9 = vsel %vm5813_vm8, %v5733_v45, %v5893_v26 }
 0x6cd   : > { %v6017_v36 = vmax.f32 %v5969_v47, %v5973_v9  ;;  %v5971_v40 = vsel %vm5811_vm10, %v5731_v38, %v5891_v59  ;;  %v10847_v35 = vpop.f32.mrb[72].mxu1  ;;  %v11880_v9 = vld [vmem:[%s14430_s5 + $0x50] sm:$0xff]  }
 0x6ce   : > { %v6015_v43 = vmax.f32 %v5967_v10, %v5971_v40  ;;  %v5544_v53 = vpop.f32.mrb[73].mxu1  ;;  %v5736_v6 = vadd.f32 %v10847_v35, %v13557_v0  ;;  %v11881_v10 = vld [vmem:[%s14430_s5 + $0x58] sm:$0xff]  }
 0x6cf   : > { %v10848_v29 = vpop.f32.mrb[74].mxu1  ;;  %v13720_v49 = vpack.c.bf16 %v6017_v36, %v6016_v7  ;;  %v5734_v16 = vadd.f32 %v13557_v0, %v5544_v53 }
 0x6d0   : > { %v5547_v8 = vpop.f32.mrb[75].mxu1  ;;  %v13723_v61 = vpack.c.bf16 %v6015_v43, %v6014_v50  ;;  %v5896_v30 = vmul.f32 0.2, %v5736_v6  ;;  %v5737_v46 = vadd.f32 %v10848_v29, %v13557_v0  ;;  %vm5816_vm11 = vcmp.gt.f32.partialorder %v5736_v6, 0.0 }
 0x6d1   : > { %v5894_v32 = vmul.f32 0.2, %v5734_v16  ;;  %vm5814_vm12 = vcmp.gt.f32.partialorder %v5734_v16, 0.0  ;;  %v5735_v44 = vadd.f32 %v13557_v0, %v5547_v8 }
 0x6d2   : > { %10893 = vmatprep.mubr.msk.bf16.mxu1 %vm4336_vm9, %v13723_v61  ;;  %v5976_v54 = vsel %vm5816_vm11, %v5736_v6, %v5896_v30  ;;  %vm5817_vm13 = vcmp.gt.f32.partialorder %v5737_v46, 0.0  ;;  %v5897_v13 = vmul.f32 0.2, %v5737_v46 }
 0x6d3   : > { %10894 = vmatmul.mubr.msk.bf16.gmra.mrb[112].mxu1 %vm4336_vm9, %v13720_v49  ;;  %v5974_v3 = vsel %vm5814_vm12, %v5734_v16, %v5894_v32  ;;  %v5895_v63 = vmul.f32 0.2, %v5735_v44  ;;  %vm5815_vm1 = vcmp.gt.f32.partialorder %v5735_v44, 0.0 }
 0x6d4   : > { %v5977_v52 = vsel %vm5817_vm13, %v5737_v46, %v5897_v13 }
 0x6d5   : > { %v10851_v12 = vpop.f32.mrb[76].mxu1  ;;  %v5975_v26 = vsel %vm5815_vm1, %v5735_v44, %v5895_v63 }
 0x6d6   : > { %v5740_v37 = vadd.f32 %v10851_v12, %v13557_v0  ;;  %v5560_v2 = vpop.f32.mrb[77].mxu1 }
 0x6d7   : > { %v5738_v27 = vadd.f32 %v13557_v0, %v5560_v2  ;;  %v10852_v1 = vpop.f32.mrb[78].mxu1 }
 0x6d8   : > { %vm5820_vm14 = vcmp.gt.f32.partialorder %v5740_v37, 0.0  ;;  %v5900_v20 = vmul.f32 0.2, %v5740_v37  ;;  %v5741_v21 = vadd.f32 %v10852_v1, %v13557_v0  ;;  %v5563_v15 = vpop.f32.mrb[79].mxu1 }
 0x6d9   : > { %vm5818_vm15 = vcmp.gt.f32.partialorder %v5738_v27, 0.0  ;;  %v5898_v18 = vmul.f32 0.2, %v5738_v27  ;;  %v5739_v31 = vadd.f32 %v13557_v0, %v5563_v15  ;;  %v11879_v0 = vld [vmem:[%s14430_s5 + $0x48] sm:$0xff]  }
 0x6da   : > { %v5980_v19 = vsel %vm5820_vm14, %v5740_v37, %v5900_v20  ;;  %vm5821_vm2 = vcmp.gt.f32.partialorder %v5741_v21, 0.0  ;;  %v5901_v42 = vmul.f32 0.2, %v5741_v21 }
 0x6db   : > { %v6020_v45 = vmax.f32 %v5976_v54, %v5980_v19  ;;  %v5978_v28 = vsel %vm5818_vm15, %v5738_v27, %v5898_v18  ;;  %vm5819_vm3 = vcmp.gt.f32.partialorder %v5739_v31, 0.0  ;;  %v5899_v14 = vmul.f32 0.2, %v5739_v31 }
 0x6dc   : > { %v6018_v38 = vmax.f32 %v5974_v3, %v5978_v28  ;;  %v5981_v22 = vsel %vm5821_vm2, %v5741_v21, %v5901_v42 }
 0x6dd   : > { %v6021_v7 = vmax.f32 %v5977_v52, %v5981_v22  ;;  %v5979_v57 = vsel %vm5819_vm3, %v5739_v31, %v5899_v14 }
 0x6de   : > { %v6019_v59 = vmax.f32 %v5975_v26, %v5979_v57  ;;  %v11891_v26 = vld [vmem:[%s14432_s7 + $0x8] sm:$0xff]  }
 0x6df   : > { %v6041_v47 = vpack.c.bf16 %v6021_v7, %v6020_v45 }
 0x6e0   : > { %v6040_v50 = vpack.c.bf16 %v6019_v59, %v6018_v38 }
 0x6e2   : > { %10897 = vmatprep.mubr.msk.bf16.mxu1 %vm4336_vm9, %v6040_v50 }
 0x6e3   : > { %10898 = vmatmul.mubr.msk.bf16.gmra.mrb[116].mxu1 %vm4336_vm9, %v6041_v47 }
 0x6e4   : > { %10909 = vmatprep.mubr.bf16.mxu1 %v14542_v24 }
 0x6eb   : > { %10910 = vmatmul.mubr.bf16.vlgmr.msra.gmra.mrb[80].mxu1 %v14542_v24 }
 0x6ec   : > { %10913 = vmatprep.mubr.msk.bf16.mxu1 %vm4336_vm9, %v13572_v62  ;;  %10950 = vmatpush3.bf16.msra.mxu1 %v13613_v23  ;;  %v11882_v62 = vld [vmem:[%s14432_s7 + $0x40] sm:$0xff]   ;;  %v11884_v23 = vld [vmem:[%s14432_s7 + $0x50] sm:$0xff]  }
 0x6ed   : > { %10951 = vmatprep.subr.bf16.mxu1 %v11879_v0 }
 0x6f0   : > { %10952 = vmatpush3.bf16.msra.mxu1 %v11879_v0  ;;  %v11892_v0 = vld [vmem:[%s14432_s7 + $0x10] sm:$0xff]  }
 0x6f1   : > { %10953 = vmatprep.subr.bf16.mxu1 %v11880_v9 }
 0x6f3   : > { %10914 = vmatmul.mubr.msk.bf16.gmra.mrb[84].mxu1 %vm4336_vm9, %v13568_v34  ;;  %v11883_v34 = vld [vmem:[%s14432_s7 + $0x48] sm:$0xff]  }
 0x6f4   : > { %10917 = vmatprep.mubr.msk.bf16.mxu1 %vm4336_vm9, %v13598_v58  ;;  %10954 = vmatpush3.bf16.msra.mxu1 %v11880_v9 }
 0x6f5   : > { %10955 = vmatprep.subr.bf16.mxu1 %v11881_v10 }
 0x6f8   : > { %10956 = vmatpush3.bf16.msra.mxu1 %v11881_v10 }
 0x6f9   : > { %10997 = vmatprep.subr.bf16.mxu1 %v11882_v62 }
 0x6fb   : > { %10918 = vmatmul.mubr.msk.bf16.gmra.mrb[88].mxu1 %vm4336_vm9, %v13595_v39 }
 0x6fc   : > { %10921 = vmatprep.mubr.msk.bf16.mxu1 %vm4336_vm9, %v13621_v11 }
 0x703   : > { %10922 = vmatmul.mubr.msk.bf16.gmra.mrb[92].mxu1 %vm4336_vm9, %v13618_v25 }
 0x704   : > { %10925 = vmatprep.mubr.msk.bf16.mxu1 %vm4336_vm9, %v13638_v17 }
 0x70b   : > { %10926 = vmatmul.mubr.msk.bf16.gmra.mrb[96].mxu1 %vm4336_vm9, %v13635_v56 }
 0x70c   : > { %10929 = vmatprep.mubr.msk.bf16.mxu1 %vm4336_vm9, %v13655_v5 }
 0x713   : > { %10930 = vmatmul.mubr.msk.bf16.gmra.mrb[100].mxu1 %vm4336_vm9, %v13652_v51 }
 0x714   : > { %10933 = vmatprep.mubr.msk.bf16.mxu1 %vm4336_vm9, %v13672_v55 }
 0x71b   : > { %10934 = vmatmul.mubr.msk.bf16.gmra.mrb[104].mxu1 %vm4336_vm9, %v13669_v41 }
 0x71c   : > { %10937 = vmatprep.mubr.msk.bf16.mxu1 %vm4336_vm9, %v13689_v4 }
 0x723   : > { %10938 = vmatmul.mubr.msk.bf16.gmra.mrb[108].mxu1 %vm4336_vm9, %v13686_v48 }
 0x724   : > { %10941 = vmatprep.mubr.msk.bf16.mxu1 %vm4336_vm9, %v13706_v60 }
 0x72b   : > { %10942 = vmatmul.mubr.msk.bf16.gmra.mrb[112].mxu1 %vm4336_vm9, %v13703_v33 }
 0x72c   : > { %10945 = vmatprep.mubr.msk.bf16.mxu1 %vm4336_vm9, %v13723_v61 }
 0x733   : > { %10946 = vmatmul.mubr.msk.bf16.gmra.mrb[116].mxu1 %vm4336_vm9, %v13720_v49 }
 0x734   : > { %10957 = vmatprep.mubr.msk.bf16.mxu1 %vm4336_vm9, %v13598_v58  ;;  %v11886_v58 = vld [vmem:[%s14432_s7 + $0x60] sm:$0xff]  }
 0x73b   : > { %10958 = vmatmul.mubr.msk.bf16.vlgmr.msra.gmra.mrb[80].mxu1 %vm4336_vm9, %v13595_v39  ;;  %v11885_v39 = vld [vmem:[%s14432_s7 + $0x58] sm:$0xff]  }
 0x73c   : > { %10961 = vmatprep.mubr.msk.bf16.mxu1 %vm4336_vm9, %v13621_v11  ;;  %10998 = vmatpush3.bf16.msra.mxu1 %v11882_v62  ;;  %v11888_v11 = vld [vmem:[%s14432_s7 + $0x70] sm:$0xff]  }
 0x73d   : > { %10999 = vmatprep.subr.bf16.mxu1 %v11883_v34 }
 0x740   : > { %11000 = vmatpush3.bf16.msra.mxu1 %v11883_v34 }
 0x741   : > { %11001 = vmatprep.subr.bf16.mxu1 %v11884_v23 }
 0x743   : > { %10962 = vmatmul.mubr.msk.bf16.gmra.mrb[84].mxu1 %vm4336_vm9, %v13618_v25  ;;  %v11887_v25 = vld [vmem:[%s14432_s7 + $0x68] sm:$0xff]  }
 0x744   : > { %10965 = vmatprep.mubr.msk.bf16.mxu1 %vm4336_vm9, %v13638_v17  ;;  %11002 = vmatpush3.bf16.msra.mxu1 %v11884_v23  ;;  %v11890_v17 = vld [vmem:[%s14432_s7] sm:$0xff]  }
 0x745   : > { %11003 = vmatprep.subr.bf16.mxu1 %v11885_v39 }
 0x748   : > { %11004 = vmatpush3.bf16.msra.mxu1 %v11885_v39 }
 0x749   : > { %11005 = vmatprep.subr.bf16.mxu1 %v11886_v58 }
 0x74b   : > { %10966 = vmatmul.mubr.msk.bf16.gmra.mrb[88].mxu1 %vm4336_vm9, %v13635_v56  ;;  %v11889_v56 = vld [vmem:[%s14432_s7 + $0x78] sm:$0xff]  }
 0x74c   : > { %10969 = vmatprep.mubr.msk.bf16.mxu1 %vm4336_vm9, %v13655_v5  ;;  %11006 = vmatpush3.bf16.msra.mxu1 %v11886_v58 }
 0x74d   : > { %11007 = vmatprep.subr.bf16.mxu1 %v11887_v25 }
 0x750   : > { %11008 = vmatpush3.bf16.msra.mxu1 %v11887_v25 }
 0x751   : > { %11009 = vmatprep.subr.bf16.mxu1 %v11888_v11 }
 0x753   : > { %10970 = vmatmul.mubr.msk.bf16.gmra.mrb[92].mxu1 %vm4336_vm9, %v13652_v51  ;;  %v13852_v51 = vld [vmem:[%s14431_s6] ss:$0 sm:$0xff] }
 0x754   : > { %10973 = vmatprep.mubr.msk.bf16.mxu1 %vm4336_vm9, %v13672_v55  ;;  %11010 = vmatpush3.bf16.msra.mxu1 %v11888_v11 }
 0x755   : > { %11011 = vmatprep.subr.bf16.mxu1 %v11889_v56 }
 0x758   : > { %11012 = vmatpush3.bf16.msra.mxu1 %v11889_v56 }
 0x759   : > { %11033 = vmatprep.subr.bf16.mxu1 %v11890_v17 }
 0x75b   : > { %10974 = vmatmul.mubr.msk.bf16.gmra.mrb[96].mxu1 %vm4336_vm9, %v13669_v41 }
 0x75c   : > { %10977 = vmatprep.mubr.msk.bf16.mxu1 %vm4336_vm9, %v13689_v4 }
 0x763   : > { %10978 = vmatmul.mubr.msk.bf16.gmra.mrb[100].mxu1 %vm4336_vm9, %v13686_v48 }
 0x764   : > { %10981 = vmatprep.mubr.msk.bf16.mxu1 %vm4336_vm9, %v13706_v60 }
 0x76b   : > { %10982 = vmatmul.mubr.msk.bf16.gmra.mrb[104].mxu1 %vm4336_vm9, %v13703_v33 }
 0x76c   : > { %10985 = vmatprep.mubr.msk.bf16.mxu1 %vm4336_vm9, %v13723_v61 }
 0x773   : > { %10986 = vmatmul.mubr.msk.bf16.gmra.mrb[108].mxu1 %vm4336_vm9, %v13720_v49 }
 0x774   : > { %10989 = vmatprep.mubr.msk.bf16.mxu1 %vm4336_vm9, %v6040_v50 }
 0x77b   : > { %10990 = vmatmul.mubr.msk.bf16.gmra.mrb[112].mxu1 %vm4336_vm9, %v6041_v47 }
 0x77c   : > { %10993 = vmatprep.mubr.bf16.mxu1 %v14542_v24 }
 0x783   : > { %10994 = vmatmul.mubr.bf16.gmra.mrb[116].mxu1 %v14542_v24 }
 0x80e   : > { %v10959_v5 = vpop.f32.mrb[80].mxu1 }
 0x80f   : > { %v6620_v41 = vpop.f32.mrb[81].mxu1  ;;  %v6828_v55 = vadd.f32 %v10959_v5, %v13852_v51 }
 0x810   : > { %v10960_v48 = vpop.f32.mrb[82].mxu1  ;;  %v6826_v4 = vadd.f32 %v13852_v51, %v6620_v41 }
 0x811   : > { %v6623_v33 = vpop.f32.mrb[83].mxu1  ;;  %v6908_v60 = vmul.f32 0.2, %v6828_v55  ;;  %v6829_v36 = vadd.f32 %v10960_v48, %v13852_v51  ;;  %vm6868_vm9 = vcmp.gt.f32.partialorder %v6828_v55, 0.0 }
 0x812   : > { %v6906_v40 = vmul.f32 0.2, %v6826_v4  ;;  %vm6866_vm4 = vcmp.gt.f32.partialorder %v6826_v4, 0.0  ;;  %v6827_v35 = vadd.f32 %v13852_v51, %v6623_v33 }
 0x813   : > { %v6948_v29 = vsel %vm6868_vm9, %v6828_v55, %v6908_v60  ;;  %vm6869_vm5 = vcmp.gt.f32.partialorder %v6829_v36, 0.0  ;;  %v6909_v49 = vmul.f32 0.2, %v6829_v36  ;;  %v11893_v55 = vld [vmem:[%s14432_s7 + $0x18] sm:$0xff]  }
 0x814   : > { %v6946_v61 = vsel %vm6866_vm4, %v6826_v4, %v6906_v40  ;;  %v6907_v44 = vmul.f32 0.2, %v6827_v35  ;;  %vm6867_vm7 = vcmp.gt.f32.partialorder %v6827_v35, 0.0 }
 0x815   : > { %v6949_v3 = vsel %vm6869_vm5, %v6829_v36, %v6909_v49 }
 0x816   : > { %v10963_v43 = vpop.f32.mrb[84].mxu1  ;;  %v6947_v15 = vsel %vm6867_vm7, %v6827_v35, %v6907_v44 }
 0x817   : > { %v6832_v53 = vadd.f32 %v10963_v43, %v13852_v51  ;;  %v6636_v6 = vpop.f32.mrb[85].mxu1 }
 0x818   : > { %v6830_v16 = vadd.f32 %v13852_v51, %v6636_v6  ;;  %v10964_v8 = vpop.f32.mrb[86].mxu1 }
 0x819   : > { %vm6872_vm6 = vcmp.gt.f32.partialorder %v6832_v53, 0.0  ;;  %v6912_v30 = vmul.f32 0.2, %v6832_v53  ;;  %v6833_v46 = vadd.f32 %v10964_v8, %v13852_v51  ;;  %v6639_v32 = vpop.f32.mrb[87].mxu1 }
 0x81a   : > { %vm6870_vm0 = vcmp.gt.f32.partialorder %v6830_v16, 0.0  ;;  %v6910_v12 = vmul.f32 0.2, %v6830_v16  ;;  %v6831_v37 = vadd.f32 %v13852_v51, %v6639_v32 }
 0x81b   : > { %v6952_v2 = vsel %vm6872_vm6, %v6832_v53, %v6912_v30  ;;  %vm6873_vm8 = vcmp.gt.f32.partialorder %v6833_v46, 0.0  ;;  %v6913_v54 = vmul.f32 0.2, %v6833_v46 }
 0x81c   : > { %v6988_v13 = vmax.f32 %v6948_v29, %v6952_v2  ;;  %v6950_v27 = vsel %vm6870_vm0, %v6830_v16, %v6910_v12  ;;  %vm6871_vm10 = vcmp.gt.f32.partialorder %v6831_v37, 0.0  ;;  %v6911_v1 = vmul.f32 0.2, %v6831_v37  ;;  %v11894_v16 = vld [vmem:[%s14432_s7 + $0x20] sm:$0xff]   ;;  %v11895_v2 = vld [vmem:[%s14432_s7 + $0x28] sm:$0xff]  }
 0x81d   : > { %v6953_v20 = vsel %vm6873_vm8, %v6833_v46, %v6913_v54  ;;  %v6986_v21 = vmax.f32 %v6946_v61, %v6950_v27 }
 0x81e   : > { %v6989_v63 = vmax.f32 %v6949_v3, %v6953_v20  ;;  %v6951_v18 = vsel %vm6871_vm10, %v6831_v37, %v6911_v1  ;;  %v10967_v31 = vpop.f32.mrb[88].mxu1  ;;  %v11896_v20 = vld [vmem:[%s14432_s7 + $0x30] sm:$0xff]  }
 0x81f   : > { %v6652_v19 = vpop.f32.mrb[89].mxu1  ;;  %v6987_v42 = vmax.f32 %v6947_v15, %v6951_v18  ;;  %v6836_v28 = vadd.f32 %v10967_v31, %v13852_v51 }
 0x820   : > { %v13863_v45 = vpack.c.bf16 %v6989_v63, %v6988_v13  ;;  %v10968_v14 = vpop.f32.mrb[90].mxu1  ;;  %v6834_v52 = vadd.f32 %v13852_v51, %v6652_v19 }
 0x821   : > { %v6655_v38 = vpop.f32.mrb[91].mxu1  ;;  %v13867_v22 = vpack.c.bf16 %v6987_v42, %v6986_v21  ;;  %v6916_v7 = vmul.f32 0.2, %v6836_v28  ;;  %v6837_v57 = vadd.f32 %v10968_v14, %v13852_v51  ;;  %vm6876_vm11 = vcmp.gt.f32.partialorder %v6836_v28, 0.0 }
 0x822   : > { %v6914_v59 = vmul.f32 0.2, %v6834_v52  ;;  %vm6874_vm12 = vcmp.gt.f32.partialorder %v6834_v52, 0.0  ;;  %v6835_v47 = vadd.f32 %v13852_v51, %v6655_v38 }
 0x823   : > { %11013 = vmatprep.mubr.bf16.mxu1 %v13867_v22  ;;  %v6956_v62 = vsel %vm6876_vm11, %v6836_v28, %v6916_v7  ;;  %vm6877_vm13 = vcmp.gt.f32.partialorder %v6837_v57, 0.0  ;;  %v6917_v34 = vmul.f32 0.2, %v6837_v57 }
 0x824   : > { %11014 = vmatmul.mubr.bf16.vlgmr.msra.gmra.mrb[120].mxu1 %v13863_v45  ;;  %v6954_v58 = vsel %vm6874_vm12, %v6834_v52, %v6914_v59  ;;  %vm6875_vm1 = vcmp.gt.f32.partialorder %v6835_v47, 0.0 }
 0x825   : > { %11034 = vmatpush3.bf16.msra.mxu1 %v11890_v17  ;;  %v6915_v17 = vmul.f32 0.2, %v6835_v47  ;;  %v6957_v40 = vsel %vm6877_vm13, %v6837_v57, %v6917_v34  ;;  %v11897_v57 = vld [vmem:[%s14432_s7 + $0x38] sm:$0xff]  }
 0x826   : > { %v10971_v50 = vpop.f32.mrb[92].mxu1  ;;  %11035 = vmatprep.subr.bf16.mxu1 %v11891_v26 }
 0x827   : > { %v6840_v9 = vadd.f32 %v10971_v50, %v13852_v51  ;;  %v6668_v10 = vpop.f32.mrb[93].mxu1  ;;  %v6955_v53 = vsel %vm6875_vm1, %v6835_v47, %v6915_v17 }
 0x828   : > { %v6838_v23 = vadd.f32 %v13852_v51, %v6668_v10  ;;  %v10972_v39 = vpop.f32.mrb[94].mxu1 }
 0x829   : > { %vm6880_vm14 = vcmp.gt.f32.partialorder %v6840_v9, 0.0  ;;  %v6920_v25 = vmul.f32 0.2, %v6840_v9  ;;  %v6841_v11 = vadd.f32 %v10972_v39, %v13852_v51  ;;  %v6671_v56 = vpop.f32.mrb[95].mxu1  ;;  %11036 = vmatpush3.bf16.msra.mxu1 %v11891_v26 }
 0x82a   : > { %vm6878_vm15 = vcmp.gt.f32.partialorder %v6838_v23, 0.0  ;;  %v6918_v5 = vmul.f32 0.2, %v6838_v23  ;;  %v6839_v41 = vadd.f32 %v13852_v51, %v6671_v56  ;;  %11037 = vmatprep.subr.bf16.mxu1 %v11892_v0 }
 0x82b   : > { %v6960_v48 = vsel %vm6880_vm14, %v6840_v9, %v6920_v25  ;;  %vm6881_vm2 = vcmp.gt.f32.partialorder %v6841_v11, 0.0  ;;  %v6921_v4 = vmul.f32 0.2, %v6841_v11 }
 0x82c   : > { %v6958_v33 = vsel %vm6878_vm15, %v6838_v23, %v6918_v5  ;;  %vm6879_vm3 = vcmp.gt.f32.partialorder %v6839_v41, 0.0  ;;  %v6919_v60 = vmul.f32 0.2, %v6839_v41  ;;  %v6992_v36 = vmax.f32 %v6956_v62, %v6960_v48 }
 0x82d   : > { %v6961_v35 = vsel %vm6881_vm2, %v6841_v11, %v6921_v4  ;;  %v6990_v43 = vmax.f32 %v6954_v58, %v6958_v33  ;;  %11038 = vmatpush3.bf16.msra.mxu1 %v11892_v0  ;;  %v13917_v11 = vld [vmem:[%s14432_s7 + $0x80] sm:$0xff]  }
 0x82e   : > { %v6959_v6 = vsel %vm6879_vm3, %v6839_v41, %v6919_v60  ;;  %v10975_v29 = vpop.f32.mrb[96].mxu1  ;;  %v6993_v49 = vmax.f32 %v6957_v40, %v6961_v35  ;;  %11039 = vmatprep.subr.bf16.mxu1 %v11893_v55 }
 0x82f   : > { %v6684_v8 = vpop.f32.mrb[97].mxu1  ;;  %v6991_v61 = vmax.f32 %v6955_v53, %v6959_v6  ;;  %v6844_v30 = vadd.f32 %v10975_v29, %v13852_v51 }
 0x830   : > { %v10976_v46 = vpop.f32.mrb[98].mxu1  ;;  %v13891_v32 = vpack.c.bf16 %v6993_v49, %v6992_v36  ;;  %v6842_v44 = vadd.f32 %v13852_v51, %v6684_v8 }
 0x831   : > { %v6687_v12 = vpop.f32.mrb[99].mxu1  ;;  %v13894_v37 = vpack.c.bf16 %v6991_v61, %v6990_v43  ;;  %11040 = vmatpush3.bf16.msra.mxu1 %v11893_v55  ;;  %v6924_v54 = vmul.f32 0.2, %v6844_v30  ;;  %v6845_v13 = vadd.f32 %v10976_v46, %v13852_v51  ;;  %vm6884_vm9 = vcmp.gt.f32.partialorder %v6844_v30, 0.0 }
 0x832   : > { %11041 = vmatprep.subr.bf16.mxu1 %v11894_v16  ;;  %v6922_v27 = vmul.f32 0.2, %v6842_v44  ;;  %vm6882_vm4 = vcmp.gt.f32.partialorder %v6842_v44, 0.0  ;;  %v6843_v1 = vadd.f32 %v13852_v51, %v6687_v12 }
 0x833   : > { %11017 = vmatprep.mubr.bf16.mxu1 %v13894_v37  ;;  %v6964_v63 = vsel %vm6884_vm9, %v6844_v30, %v6924_v54  ;;  %vm6885_vm5 = vcmp.gt.f32.partialorder %v6845_v13, 0.0  ;;  %v6925_v18 = vmul.f32 0.2, %v6845_v13 }
 0x834   : > { %11018 = vmatmul.mubr.bf16.gmra.mrb[124].mxu1 %v13891_v32  ;;  %v6962_v42 = vsel %vm6882_vm4, %v6842_v44, %v6922_v27  ;;  %v6923_v38 = vmul.f32 0.2, %v6843_v1  ;;  %vm6883_vm7 = vcmp.gt.f32.partialorder %v6843_v1, 0.0 }
 0x835   : > { %11042 = vmatpush3.bf16.msra.mxu1 %v11894_v16  ;;  %v6965_v10 = vsel %vm6885_vm5, %v6845_v13, %v6925_v18 }
 0x836   : > { %v10979_v3 = vpop.f32.mrb[100].mxu1  ;;  %11043 = vmatprep.subr.bf16.mxu1 %v11895_v2  ;;  %v6963_v23 = vsel %vm6883_vm7, %v6843_v1, %v6923_v38 }
 0x837   : > { %v6848_v21 = vadd.f32 %v10979_v3, %v13852_v51  ;;  %v6700_v15 = vpop.f32.mrb[101].mxu1 }
 0x838   : > { %v6846_v31 = vadd.f32 %v13852_v51, %v6700_v15  ;;  %v10980_v19 = vpop.f32.mrb[102].mxu1 }
 0x839   : > { %vm6888_vm6 = vcmp.gt.f32.partialorder %v6848_v21, 0.0  ;;  %v6928_v28 = vmul.f32 0.2, %v6848_v21  ;;  %v6849_v14 = vadd.f32 %v10980_v19, %v13852_v51  ;;  %v6703_v52 = vpop.f32.mrb[103].mxu1  ;;  %11044 = vmatpush3.bf16.msra.mxu1 %v11895_v2 }
 0x83a   : > { %vm6886_vm0 = vcmp.gt.f32.partialorder %v6846_v31, 0.0  ;;  %v6926_v26 = vmul.f32 0.2, %v6846_v31  ;;  %v6847_v7 = vadd.f32 %v13852_v51, %v6703_v52  ;;  %11045 = vmatprep.subr.bf16.mxu1 %v11896_v20 }
 0x83b   : > { %v6968_v59 = vsel %vm6888_vm6, %v6848_v21, %v6928_v28  ;;  %vm6889_vm8 = vcmp.gt.f32.partialorder %v6849_v14, 0.0  ;;  %v6929_v47 = vmul.f32 0.2, %v6849_v14 }
 0x83c   : > { %v6966_v50 = vsel %vm6886_vm0, %v6846_v31, %v6926_v26  ;;  %vm6887_vm10 = vcmp.gt.f32.partialorder %v6847_v7, 0.0  ;;  %v6927_v0 = vmul.f32 0.2, %v6847_v7  ;;  %v6996_v9 = vmax.f32 %v6964_v63, %v6968_v59 }
 0x83d   : > { %v6969_v62 = vsel %vm6889_vm8, %v6849_v14, %v6929_v47  ;;  %v6994_v34 = vmax.f32 %v6962_v42, %v6966_v50  ;;  %11046 = vmatpush3.bf16.msra.mxu1 %v11896_v20 }
 0x83e   : > { %v6967_v39 = vsel %vm6887_vm10, %v6847_v7, %v6927_v0  ;;  %v10983_v58 = vpop.f32.mrb[104].mxu1  ;;  %v6997_v25 = vmax.f32 %v6965_v10, %v6969_v62  ;;  %11047 = vmatprep.subr.bf16.mxu1 %v11897_v57 }
 0x83f   : > { %v6716_v56 = vpop.f32.mrb[105].mxu1  ;;  %v6995_v17 = vmax.f32 %v6963_v23, %v6967_v39  ;;  %v6852_v5 = vadd.f32 %v10983_v58, %v13852_v51 }
 0x840   : > { %v10984_v41 = vpop.f32.mrb[106].mxu1  ;;  %v13920_v55 = vpack.c.bf16 %v6997_v25, %v6996_v9  ;;  %v6850_v48 = vadd.f32 %v13852_v51, %v6716_v56 }
 0x841   : > { %v6719_v4 = vpop.f32.mrb[107].mxu1  ;;  %v13923_v33 = vpack.c.bf16 %v6995_v17, %v6994_v34  ;;  %11048 = vmatpush3.bf16.msra.mxu1 %v11897_v57  ;;  %v6932_v60 = vmul.f32 0.2, %v6852_v5  ;;  %v6853_v36 = vadd.f32 %v10984_v41, %v13852_v51  ;;  %vm6892_vm11 = vcmp.gt.f32.partialorder %v6852_v5, 0.0 }
 0x842   : > { %11069 = vmatprep.subr.bf16.mxu1 %v13917_v11  ;;  %v6930_v40 = vmul.f32 0.2, %v6850_v48  ;;  %vm6890_vm12 = vcmp.gt.f32.partialorder %v6850_v48, 0.0  ;;  %v6851_v35 = vadd.f32 %v13852_v51, %v6719_v4 }
 0x843   : > { %11021 = vmatprep.mubr.bf16.mxu1 %v13923_v33  ;;  %v6972_v29 = vsel %vm6892_vm11, %v6852_v5, %v6932_v60  ;;  %vm6893_vm13 = vcmp.gt.f32.partialorder %v6853_v36, 0.0  ;;  %v6933_v49 = vmul.f32 0.2, %v6853_v36 }
 0x844   : > { %11022 = vmatmul.mubr.bf16.gmra.mrb[128].mxu1 %v13920_v55  ;;  %v6970_v61 = vsel %vm6890_vm12, %v6850_v48, %v6930_v40  ;;  %v6931_v12 = vmul.f32 0.2, %v6851_v35  ;;  %vm6891_vm1 = vcmp.gt.f32.partialorder %v6851_v35, 0.0 }
 0x845   : > { %v6973_v21 = vsel %vm6893_vm13, %v6853_v36, %v6933_v49 }
 0x846   : > { %v10987_v43 = vpop.f32.mrb[108].mxu1  ;;  %v6971_v18 = vsel %vm6891_vm1, %v6851_v35, %v6931_v12  ;;  %v11900_v12 = vld [vmem:[%s14432_s7 + $0x90] sm:$0xff]  }
 0x847   : > { %v6856_v53 = vadd.f32 %v10987_v43, %v13852_v51  ;;  %v6732_v6 = vpop.f32.mrb[109].mxu1 }
 0x848   : > { %v6854_v16 = vadd.f32 %v13852_v51, %v6732_v6  ;;  %v10988_v8 = vpop.f32.mrb[110].mxu1 }
 0x849   : > { %vm6896_vm14 = vcmp.gt.f32.partialorder %v6856_v53, 0.0  ;;  %v6936_v30 = vmul.f32 0.2, %v6856_v53  ;;  %v6857_v46 = vadd.f32 %v10988_v8, %v13852_v51  ;;  %v6735_v44 = vpop.f32.mrb[111].mxu1 }
 0x84a   : > { %vm6894_vm15 = vcmp.gt.f32.partialorder %v6854_v16, 0.0  ;;  %v6934_v2 = vmul.f32 0.2, %v6854_v16  ;;  %v6855_v54 = vadd.f32 %v13852_v51, %v6735_v44 }
 0x84b   : > { %v6976_v13 = vsel %vm6896_vm14, %v6856_v53, %v6936_v30  ;;  %vm6897_vm2 = vcmp.gt.f32.partialorder %v6857_v46, 0.0  ;;  %v6937_v27 = vmul.f32 0.2, %v6857_v46 }
 0x84c   : > { %v6974_v1 = vsel %vm6894_vm15, %v6854_v16, %v6934_v2  ;;  %vm6895_vm3 = vcmp.gt.f32.partialorder %v6855_v54, 0.0  ;;  %v6935_v3 = vmul.f32 0.2, %v6855_v54  ;;  %v7000_v20 = vmax.f32 %v6972_v29, %v6976_v13  ;;  %v11901_v2 = vld [vmem:[%s14432_s7 + $0x98] sm:$0xff]   ;;  %v11914_v13 = vld [vmem:[%s14434_s9 + $0xa4] ss:$8 sps:$4 sm:$0xff]  }
 0x84d   : > { %v6977_v15 = vsel %vm6897_vm2, %v6857_v46, %v6937_v27  ;;  %v6998_v63 = vmax.f32 %v6970_v61, %v6974_v1  ;;  %v11912_v27 = vld [vmem:[%s14434_s9 + $0xa0] ss:$8 sps:$4 sm:$0xff]   ;;  %v11915_v1 = vld [vmem:[%s14434_s9 + $0xb0] ss:$8 sps:$4 sm:$0xff]  }
 0x84e   : > { %v6975_v31 = vsel %vm6895_vm3, %v6855_v54, %v6935_v3  ;;  %v10991_v19 = vpop.f32.mrb[112].mxu1  ;;  %v7001_v42 = vmax.f32 %v6973_v21, %v6977_v15  ;;  %v11905_v54 = vld [vmem:[%s14432_s7 + $0xb8] sm:$0xff]   ;;  %v11918_v21 = vld [vmem:[%s14434_s9 + $0xc0] ss:$8 sps:$4 sm:$0xff]  }
 0x84f   : > { %v6748_v28 = vpop.f32.mrb[113].mxu1  ;;  %v6999_v14 = vmax.f32 %v6971_v18, %v6975_v31  ;;  %v6860_v52 = vadd.f32 %v10991_v19, %v13852_v51  ;;  %v11917_v3 = vld [vmem:[%s14434_s9 + $0xb4] ss:$8 sps:$4 sm:$0xff]   ;;  %v11929_v18 = vld [vmem:[%s14434_s9 + $0xe4] ss:$8 sps:$4 sm:$0xff]  }
 0x850   : > { %v10992_v38 = vpop.f32.mrb[114].mxu1  ;;  %v13936_v26 = vpack.c.bf16 %v7001_v42, %v7000_v20  ;;  %v6858_v7 = vadd.f32 %v13852_v51, %v6748_v28  ;;  %v11920_v20 = vld [vmem:[%s14434_s9 + $0xc4] ss:$8 sps:$4 sm:$0xff]   ;;  %v11923_v15 = vld [vmem:[%s14434_s9 + $0xd4] ss:$8 sps:$4 sm:$0xff]  }
 0x851   : > { %v6751_v57 = vpop.f32.mrb[115].mxu1  ;;  %v13939_v59 = vpack.c.bf16 %v6999_v14, %v6998_v63  ;;  %v6940_v47 = vmul.f32 0.2, %v6860_v52  ;;  %v6861_v50 = vadd.f32 %v10992_v38, %v13852_v51  ;;  %vm6900_vm9 = vcmp.gt.f32.partialorder %v6860_v52, 0.0  ;;  %v11921_v63 = vld [vmem:[%s14434_s9 + $0xd0] ss:$8 sps:$4 sm:$0xff]  }
 0x852   : > { %v6938_v0 = vmul.f32 0.2, %v6858_v7  ;;  %vm6898_vm4 = vcmp.gt.f32.partialorder %v6858_v7, 0.0  ;;  %v6859_v9 = vadd.f32 %v13852_v51, %v6751_v57  ;;  %v11927_v31 = vld [vmem:[%s14434_s9 + $0xe0] ss:$8 sps:$4 sm:$0xff]  }
 0x853   : > { %11025 = vmatprep.mubr.bf16.mxu1 %v13939_v59  ;;  %v6980_v23 = vsel %vm6900_vm9, %v6860_v52, %v6940_v47  ;;  %vm6901_vm5 = vcmp.gt.f32.partialorder %v6861_v50, 0.0  ;;  %v6941_v39 = vmul.f32 0.2, %v6861_v50  ;;  %v11924_v19 = vld [vmem:[%s14436_s11] ss:$8 sps:$4 sm:$0xff]  }
 0x854   : > { %11026 = vmatmul.mubr.bf16.gmra.mrb[132].mxu1 %v13936_v26  ;;  %v6978_v56 = vsel %vm6898_vm4, %v6858_v7, %v6938_v0  ;;  %v6939_v48 = vmul.f32 0.2, %v6859_v9  ;;  %vm6899_vm7 = vcmp.gt.f32.partialorder %v6859_v9, 0.0  ;;  %v11926_v42 = vld [vmem:[%s14436_s11 + $0x4] ss:$8 sps:$4 sm:$0xff]  }
 0x855   : > { %v6981_v6 = vsel %vm6901_vm5, %v6861_v50, %v6941_v39  ;;  %8461 = vmatprep.subr.bf16.mxu0 %v11926_v42  ;;  %v11932_v28 = vld [vmem:[%s14434_s9 + $0xf4] ss:$8 sps:$4 sm:$0xff]   ;;  %v11930_v14 = vld [vmem:[%s14434_s9 + $0xf0] ss:$8 sps:$4 sm:$0xff]   ;;  %v11935_v52 = vld [vmem:[%s14434_s9 + $0x4] ss:$8 sps:$4 sm:$0xff]  }
 0x856   : > { %v10995_v10 = vpop.f32.mrb[116].mxu1  ;;  %v6979_v16 = vsel %vm6899_vm7, %v6859_v9, %v6939_v48  ;;  %8462 = vmatpush1.bf16.msra.mxu0 %v11924_v19  ;;  %v11939_v38 = vld [vmem:[%s14436_s11 + $0x10] ss:$8 sps:$4 sm:$0xff]   ;;  %v11957_v7 = vld [vmem:[%s14436_s11 + $0x20] ss:$8 sps:$4 sm:$0xff]  }
 0x857   : > { %v6864_v62 = vadd.f32 %v10995_v10, %v13852_v51  ;;  %v6764_v34 = vpop.f32.mrb[117].mxu1  ;;  %v11959_v57 = vld [vmem:[%s14436_s11 + $0x24] ss:$8 sps:$4 sm:$0xff]   ;;  %v11977_v47 = vld [vmem:[%s14436_s11 + $0x34] ss:$8 sps:$4 sm:$0xff]  }
 0x858   : > { %v6862_v58 = vadd.f32 %v13852_v51, %v6764_v34  ;;  %v10996_v25 = vpop.f32.mrb[118].mxu1  ;;  %v11992_v34 = vld [vmem:[%s14436_s11 + $0x44] ss:$8 sps:$4 sm:$0xff]   ;;  %v11995_v39 = vld [vmem:[%s14436_s11 + $0x54] ss:$8 sps:$4 sm:$0xff]  }
 0x859   : > { %vm6904_vm6 = vcmp.gt.f32.partialorder %v6864_v62, 0.0  ;;  %v6944_v17 = vmul.f32 0.2, %v6864_v62  ;;  %v6865_v5 = vadd.f32 %v10996_v25, %v13852_v51  ;;  %v6767_v41 = vpop.f32.mrb[119].mxu1  ;;  %v11998_v25 = vld [vmem:[%s14436_s11 + $0x64] ss:$8 sps:$4 sm:$0xff]  }
 0x85a   : > { %vm6902_vm0 = vcmp.gt.f32.partialorder %v6862_v58, 0.0  ;;  %v6942_v4 = vmul.f32 0.2, %v6862_v58  ;;  %v6863_v60 = vadd.f32 %v13852_v51, %v6767_v41  ;;  %v11899_v51 = vld [vmem:[%s14432_s7 + $0x88] sm:$0xff]   ;;  %v12007_v48 = vld [vmem:[%s14436_s11 + $0x94] ss:$8 sps:$4 sm:$0xff]  }
 0x85b   : > { %v6984_v36 = vsel %vm6904_vm6, %v6864_v62, %v6944_v17  ;;  %vm6905_vm8 = vcmp.gt.f32.partialorder %v6865_v5, 0.0  ;;  %v6945_v40 = vmul.f32 0.2, %v6865_v5  ;;  %v11990_v62 = vld [vmem:[%s14436_s11 + $0x40] ss:$8 sps:$4 sm:$0xff]  }
 0x85c   : > { %v6982_v35 = vsel %vm6902_vm0, %v6862_v58, %v6942_v4  ;;  %vm6903_vm10 = vcmp.gt.f32.partialorder %v6863_v60, 0.0  ;;  %v6943_v43 = vmul.f32 0.2, %v6863_v60  ;;  %v7004_v53 = vmax.f32 %v6980_v23, %v6984_v36  ;;  %v11993_v23 = vld [vmem:[%s14436_s11 + $0x50] ss:$8 sps:$4 sm:$0xff]  }
 0x85d   : > { %v6985_v29 = vsel %vm6905_vm8, %v6865_v5, %v6945_v40  ;;  %v7002_v49 = vmax.f32 %v6978_v56, %v6982_v35  ;;  %v11996_v58 = vld [vmem:[%s14436_s11 + $0x60] ss:$8 sps:$4 sm:$0xff]   ;;  %v12001_v56 = vld [vmem:[%s14436_s11 + $0x74] ss:$8 sps:$4 sm:$0xff]   ;;  %v11999_v17 = vld [vmem:[%s14436_s11 + $0x70] ss:$8 sps:$4 sm:$0xff]  }
 0x85e   : > { %v6983_v8 = vsel %vm6903_vm10, %v6863_v60, %v6943_v43  ;;  %v7005_v61 = vmax.f32 %v6981_v6, %v6985_v29  ;;  %v12004_v5 = vld [vmem:[%s14436_s11 + $0x84] ss:$8 sps:$4 sm:$0xff]   ;;  %v12002_v41 = vld [vmem:[%s14436_s11 + $0x80] ss:$8 sps:$4 sm:$0xff]   ;;  %v12005_v60 = vld [vmem:[%s14436_s11 + $0x90] ss:$8 sps:$4 sm:$0xff]  }
 0x85f   : > { %v7003_v30 = vmax.f32 %v6979_v16, %v6983_v8  ;;  %v12010_v40 = vld [vmem:[%s14436_s11 + $0xa4] ss:$8 sps:$4 sm:$0xff]   ;;  %v12013_v6 = vld [vmem:[%s14436_s11 + $0xb4] ss:$8 sps:$4 sm:$0xff]   ;;  %v14114_v29 = vld [vmem:[%s14433_s8] ss:$0 sm:$0xff] }
 0x860   : > { %v7015_v46 = vpack.c.bf16 %v7005_v61, %v7004_v53  ;;  %v12008_v53 = vld [vmem:[%s14436_s11 + $0xa0] ss:$8 sps:$4 sm:$0xff]   ;;  %v12011_v16 = vld [vmem:[%s14436_s11 + $0xb0] ss:$8 sps:$4 sm:$0xff]   ;;  %v12016_v61 = vld [vmem:[%s14436_s11 + $0xc4] ss:$8 sps:$4 sm:$0xff]  }
 0x861   : > { %v7014_v44 = vpack.c.bf16 %v7003_v30, %v7002_v49 }
 0x863   : > { %11029 = vmatprep.mubr.bf16.mxu1 %v7014_v44 }
 0x864   : > { %11030 = vmatmul.mubr.bf16.gmra.mrb[136].mxu1 %v7015_v46 }
 0x865   : > { %11049 = vmatprep.mubr.bf16.mxu1 %v14542_v24 }
 0x86c   : > { %11050 = vmatmul.mubr.bf16.vlgmr.msra.gmra.mrb[120].mxu1 %v14542_v24 }
 0x86d   : > { %11053 = vmatprep.mubr.bf16.mxu1 %v13867_v22  ;;  %11070 = vmatpush3.bf16.msra.mxu1 %v13917_v11  ;;  %v11902_v22 = vld [vmem:[%s14432_s7 + $0xa0] sm:$0xff]   ;;  %v11903_v11 = vld [vmem:[%s14432_s7 + $0xa8] sm:$0xff]  }
 0x86e   : > { %11071 = vmatprep.subr.bf16.mxu1 %v11899_v51 }
 0x871   : > { %11072 = vmatpush3.bf16.msra.mxu1 %v11899_v51 }
 0x872   : > { %11073 = vmatprep.subr.bf16.mxu1 %v11900_v12 }
 0x874   : > { %11054 = vmatmul.mubr.bf16.gmra.mrb[124].mxu1 %v13863_v45  ;;  %v11904_v45 = vld [vmem:[%s14432_s7 + $0xb0] sm:$0xff]  }
 0x875   : > { %11057 = vmatprep.mubr.bf16.mxu1 %v13894_v37  ;;  %11074 = vmatpush3.bf16.msra.mxu1 %v11900_v12  ;;  %v12014_v12 = vld [vmem:[%s14436_s11 + $0xc0] ss:$8 sps:$4 sm:$0xff]  }
 0x876   : > { %11075 = vmatprep.subr.bf16.mxu1 %v11901_v2 }
 0x879   : > { %11076 = vmatpush3.bf16.msra.mxu1 %v11901_v2  ;;  %v12019_v2 = vld [vmem:[%s14436_s11 + $0xd4] ss:$8 sps:$4 sm:$0xff]  }
 0x87a   : > { %11077 = vmatprep.subr.bf16.mxu1 %v11902_v22 }
 0x87c   : > { %11058 = vmatmul.mubr.bf16.gmra.mrb[128].mxu1 %v13891_v32 }
 0x87d   : > { %11061 = vmatprep.mubr.bf16.mxu1 %v13923_v33  ;;  %11078 = vmatpush3.bf16.msra.mxu1 %v11902_v22 }
 0x87e   : > { %11079 = vmatprep.subr.bf16.mxu1 %v11903_v11 }
 0x881   : > { %11080 = vmatpush3.bf16.msra.mxu1 %v11903_v11 }
 0x882   : > { %11081 = vmatprep.subr.bf16.mxu1 %v11904_v45 }
 0x884   : > { %11062 = vmatmul.mubr.bf16.gmra.mrb[132].mxu1 %v13920_v55 }
 0x885   : > { %11065 = vmatprep.mubr.bf16.mxu1 %v13939_v59  ;;  %11082 = vmatpush3.bf16.msra.mxu1 %v11904_v45 }
 0x886   : > { %11083 = vmatprep.subr.bf16.mxu1 %v11905_v54 }
 0x889   : > { %11084 = vmatpush3.bf16.msra.mxu1 %v11905_v54 }
 0x88c   : > { %11066 = vmatmul.mubr.bf16.gmra.mrb[140].mxu1 %v13936_v26 }
 0x88d   : > { %11085 = vmatprep.mubr.bf16.mxu1 %v13894_v37  ;;  %v11908_v37 = vld [vmem:[%s14434_s9 + $0x84] ss:$8 sps:$4 sm:$0xff]  }
 0x88e   : > { %7749 = vmatprep.subr.bf16.mxu1 %v11908_v37  ;;  %v12017_v37 = vld [vmem:[%s14436_s11 + $0xd0] ss:$8 sps:$4 sm:$0xff]  }
 0x894   : > { %11086 = vmatmul.mubr.bf16.vlgmr.msra.gmra.mrb[120].mxu1 %v13891_v32  ;;  %v11906_v32 = vld [vmem:[%s14434_s9 + $0x80] ss:$8 sps:$4 sm:$0xff]  }
 0x895   : > { %11089 = vmatprep.mubr.bf16.mxu1 %v13923_v33  ;;  %7750 = vmatpush1.bf16.msra.mxu1 %v11906_v32  ;;  %v11909_v33 = vld [vmem:[%s14434_s9 + $0x90] ss:$8 sps:$4 sm:$0xff]  }
 0x89c   : > { %11090 = vmatmul.mubr.bf16.gmra.mrb[124].mxu1 %v13920_v55  ;;  %v11911_v55 = vld [vmem:[%s14434_s9 + $0x94] ss:$8 sps:$4 sm:$0xff]  }
 0x89d   : > { %11093 = vmatprep.mubr.bf16.mxu1 %v13939_v59  ;;  %7751 = vmatprep.subr.bf16.mxu1 %v11911_v55  ;;  %v11975_v59 = vld [vmem:[%s14436_s11 + $0x30] ss:$8 sps:$4 sm:$0xff]  }
 0x89e   : > { %7752 = vmatpush1.bf16.msra.mxu1 %v11909_v33 }
 0x89f   : > { %7753 = vmatprep.subr.bf16.mxu1 %v11914_v13  ;;  %v12022_v13 = vld [vmem:[%s14436_s11 + $0xe4] ss:$8 sps:$4 sm:$0xff]  }
 0x8a2   : > { %7754 = vmatpush1.bf16.msra.mxu1 %v11912_v27 }
 0x8a3   : > { %7755 = vmatprep.subr.bf16.mxu1 %v11917_v3 }
 0x8a4   : > { %11094 = vmatmul.mubr.bf16.gmra.mrb[128].mxu1 %v13936_v26  ;;  %v11941_v26 = vld [vmem:[%s14436_s11 + $0x14] ss:$8 sps:$4 sm:$0xff]  }
 0x8a5   : > { %11097 = vmatprep.mubr.bf16.mxu1 %v7014_v44  ;;  %8463 = vmatprep.subr.bf16.mxu0 %v11941_v26 }
 0x8a6   : > { %7756 = vmatpush1.bf16.msra.mxu1 %v11915_v1  ;;  %8464 = vmatpush1.bf16.msra.mxu0 %v11939_v38 }
 0x8a7   : > { %7757 = vmatprep.subr.bf16.mxu1 %v11920_v20  ;;  %8465 = vmatprep.subr.bf16.mxu0 %v11959_v57 }
 0x8aa   : > { %7758 = vmatpush1.bf16.msra.mxu1 %v11918_v21  ;;  %8466 = vmatpush1.bf16.msra.mxu0 %v11957_v7 }
 0x8ab   : > { %7759 = vmatprep.subr.bf16.mxu1 %v11923_v15  ;;  %8467 = vmatprep.subr.bf16.mxu0 %v11977_v47 }
 0x8ac   : > { %11098 = vmatmul.mubr.bf16.gmra.mrb[132].mxu1 %v7015_v46 }
 0x8ad   : > { %11101 = vmatprep.mubr.bf16.mxu1 %v14542_v24 }
 0x8ae   : > { %7760 = vmatpush1.bf16.msra.mxu1 %v11921_v63  ;;  %8468 = vmatpush1.bf16.msra.mxu0 %v11975_v59 }
 0x8af   : > { %7761 = vmatprep.subr.bf16.mxu1 %v11929_v18  ;;  %8469 = vmatprep.subr.bf16.mxu0 %v11992_v34 }
 0x8b2   : > { %7762 = vmatpush1.bf16.msra.mxu1 %v11927_v31  ;;  %8470 = vmatpush1.bf16.msra.mxu0 %v11990_v62  ;;  %v12020_v31 = vld [vmem:[%s14436_s11 + $0xe0] ss:$8 sps:$4 sm:$0xff]  }
 0x8b3   : > { %7763 = vmatprep.subr.bf16.mxu1 %v11932_v28  ;;  %8471 = vmatprep.subr.bf16.mxu0 %v11995_v39 }
 0x8b4   : > { %11102 = vmatmul.mubr.bf16.gmra.mrb[144].mxu1 %v14542_v24 }
 0x8b5   : > { %7781 = vmatprep.mubr.bf16.mxu1 %v14542_v24 }
 0x8b6   : > { %7764 = vmatpush1.bf16.msra.mxu1 %v11930_v14  ;;  %8472 = vmatpush1.bf16.msra.mxu0 %v11993_v23 }
 0x8b7   : > { %7902 = vmatprep.subr.bf16.mxu1 %v11935_v52  ;;  %8473 = vmatprep.subr.bf16.mxu0 %v11998_v25 }
 0x8ba   : > { %8474 = vmatpush1.bf16.msra.mxu0 %v11996_v58  ;;  %v11933_v58 = vld [vmem:[%s14434_s9] ss:$8 sps:$4 sm:$0xff]  }
 0x8bb   : > { %8475 = vmatprep.subr.bf16.mxu0 %v12001_v56 }
 0x8be   : > { %8476 = vmatpush1.bf16.msra.mxu0 %v11999_v17 }
 0x8bf   : > { %8477 = vmatprep.subr.bf16.mxu0 %v12004_v5 }
 0x8c2   : > { %8478 = vmatpush1.bf16.msra.mxu0 %v12002_v41  ;;  %v11938_v41 = vld [vmem:[%s14434_s9 + $0x14] ss:$8 sps:$4 sm:$0xff]  }
 0x8c3   : > { %8479 = vmatprep.subr.bf16.mxu0 %v12007_v48 }
 0x8c6   : > { %8480 = vmatpush1.bf16.msra.mxu0 %v12005_v60  ;;  %v11936_v60 = vld [vmem:[%s14434_s9 + $0x10] ss:$8 sps:$4 sm:$0xff]  }
 0x8c7   : > { %8481 = vmatprep.subr.bf16.mxu0 %v12010_v40  ;;  %v11944_v40 = vld [vmem:[%s14434_s9 + $0x24] ss:$8 sps:$4 sm:$0xff]  }
 0x8ca   : > { %8482 = vmatpush1.bf16.msra.mxu0 %v12008_v53 }
 0x8cb   : > { %8483 = vmatprep.subr.bf16.mxu0 %v12013_v6 }
 0x8ce   : > { %8484 = vmatpush1.bf16.msra.mxu0 %v12011_v16 }
 0x8cf   : > { %8485 = vmatprep.subr.bf16.mxu0 %v12016_v61 }
 0x8d2   : > { %8486 = vmatpush1.bf16.msra.mxu0 %v12014_v12 }
 0x8d3   : > { %8487 = vmatprep.subr.bf16.mxu0 %v12019_v2  ;;  %v11947_v2 = vld [vmem:[%s14434_s9 + $0x34] ss:$8 sps:$4 sm:$0xff]  }
 0x8d6   : > { %8488 = vmatpush1.bf16.msra.mxu0 %v12017_v37 }
 0x8d7   : > { %8489 = vmatprep.subr.bf16.mxu0 %v12022_v13 }
 0x8da   : > { %8490 = vmatpush1.bf16.msra.mxu0 %v12020_v31 }
 0x937   : > { %v11031_v50 = vpop.f32.mrb[136].mxu1 }
 0x938   : > { %v7195_v0 = vpop.f32.mrb[137].mxu1 }
 0x939   : > { %v11032_v9 = vpop.f32.mrb[138].mxu1 }
 0x93a   : > { %v7197_v10 = vpop.f32.mrb[139].mxu1 }
 0x95f   : > { %v11067_v4 = vpop.f32.mrb[140].mxu1 }
 0x960   : > { %v7352_v36 = vpop.f32.mrb[141].mxu1 }
 0x961   : > { %v11068_v35 = vpop.f32.mrb[142].mxu1 }
 0x962   : > { %v7354_v43 = vpop.f32.mrb[143].mxu1 }
 0x967   : > { %v11087_v49 = vpop.f32.mrb[120].mxu1 }
 0x968   : > { %v7462_v8 = vpop.f32.mrb[121].mxu1  ;;  %v7562_v30 = vadd.f32 %v11087_v49, %v14114_v29 }
 0x969   : > { %v11088_v46 = vpop.f32.mrb[122].mxu1  ;;  %v7560_v44 = vadd.f32 %v14114_v29, %v7462_v8 }
 0x96a   : > { %v7465_v51 = vpop.f32.mrb[123].mxu1  ;;  %v7594_v22 = vmul.f32 0.2, %v7562_v30  ;;  %v7563_v11 = vadd.f32 %v11088_v46, %v14114_v29  ;;  %vm7578_vm11 = vcmp.gt.f32.partialorder %v7562_v30, 0.0 }
 0x96b   : > { %v7592_v45 = vmul.f32 0.2, %v7560_v44  ;;  %vm7576_vm12 = vcmp.gt.f32.partialorder %v7560_v44, 0.0  ;;  %v7561_v54 = vadd.f32 %v14114_v29, %v7465_v51 }
 0x96c   : > { %v7610_v27 = vsel %vm7578_vm11, %v7562_v30, %v7594_v22  ;;  %vm7579_vm13 = vcmp.gt.f32.partialorder %v7563_v11, 0.0  ;;  %v7595_v1 = vmul.f32 0.2, %v7563_v11  ;;  %v11942_v30 = vld [vmem:[%s14434_s9 + $0x20] ss:$8 sps:$4 sm:$0xff]  }
 0x96d   : > { %v7608_v21 = vsel %vm7576_vm12, %v7560_v44, %v7592_v45  ;;  %v7593_v19 = vmul.f32 0.2, %v7561_v54  ;;  %vm7577_vm1 = vcmp.gt.f32.partialorder %v7561_v54, 0.0 }
 0x96e   : > { %v7611_v57 = vsel %vm7579_vm13, %v7563_v11, %v7595_v1 }
 0x96f   : > { %v11091_v32 = vpop.f32.mrb[124].mxu1  ;;  %v7609_v50 = vsel %vm7577_vm1, %v7561_v54, %v7593_v19  ;;  %v11948_v19 = vld [vmem:[%s14434_s9 + $0x40] ss:$8 sps:$4 sm:$0xff]  }
 0x970   : > { %v7566_v55 = vadd.f32 %v11091_v32, %v14114_v29  ;;  %v7478_v33 = vpop.f32.mrb[125].mxu1 }
 0x971   : > { %v7564_v3 = vadd.f32 %v14114_v29, %v7478_v33  ;;  %v11092_v20 = vpop.f32.mrb[126].mxu1  ;;  %v11945_v33 = vld [vmem:[%s14434_s9 + $0x30] ss:$8 sps:$4 sm:$0xff]  }
 0x972   : > { %vm7582_vm14 = vcmp.gt.f32.partialorder %v7566_v55, 0.0  ;;  %v7598_v15 = vmul.f32 0.2, %v7566_v55  ;;  %v7567_v63 = vadd.f32 %v11092_v20, %v14114_v29  ;;  %v7481_v18 = vpop.f32.mrb[127].mxu1 }
 0x973   : > { %vm7580_vm15 = vcmp.gt.f32.partialorder %v7564_v3, 0.0  ;;  %v7596_v42 = vmul.f32 0.2, %v7564_v3  ;;  %v7565_v28 = vadd.f32 %v14114_v29, %v7481_v18 }
 0x974   : > { %v7614_v14 = vsel %vm7582_vm14, %v7566_v55, %v7598_v15  ;;  %vm7583_vm2 = vcmp.gt.f32.partialorder %v7567_v63, 0.0  ;;  %v7599_v52 = vmul.f32 0.2, %v7567_v63 }
 0x975   : > { %v7612_v38 = vsel %vm7580_vm15, %v7564_v3, %v7596_v42  ;;  %vm7581_vm3 = vcmp.gt.f32.partialorder %v7565_v28, 0.0  ;;  %v7597_v26 = vmul.f32 0.2, %v7565_v28  ;;  %v7626_v7 = vmax.f32 %v7610_v27, %v7614_v14  ;;  %v11950_v3 = vld [vmem:[%s14434_s9 + $0x44] ss:$8 sps:$4 sm:$0xff]  }
 0x976   : > { %v7624_v59 = vmax.f32 %v7608_v21, %v7612_v38  ;;  %v7615_v47 = vsel %vm7583_vm2, %v7567_v63, %v7599_v52  ;;  %v11953_v52 = vld [vmem:[%s14434_s9 + $0x54] ss:$8 sps:$4 sm:$0xff]  }
 0x977   : > { %v7613_v0 = vsel %vm7581_vm3, %v7565_v28, %v7597_v26  ;;  %v11095_v9 = vpop.f32.mrb[128].mxu1  ;;  %v7627_v10 = vmax.f32 %v7611_v57, %v7615_v47  ;;  %v11951_v26 = vld [vmem:[%s14434_s9 + $0x50] ss:$8 sps:$4 sm:$0xff]   ;;  %v11954_v57 = vld [vmem:[%s14434_s9 + $0x60] ss:$8 sps:$4 sm:$0xff]  }
 0x978   : > { %v7625_v62 = vmax.f32 %v7609_v50, %v7613_v0  ;;  %v7494_v34 = vpop.f32.mrb[129].mxu1  ;;  %v7570_v23 = vadd.f32 %v11095_v9, %v14114_v29  ;;  %v11960_v47 = vld [vmem:[%s14434_s9 + $0x70] ss:$8 sps:$4 sm:$0xff]   ;;  %v11965_v50 = vld [vmem:[%s14434_s9 + $0x104] ss:$8 sps:$4 sm:$0xff]  }
 0x979   : > { %v11096_v39 = vpop.f32.mrb[130].mxu1  ;;  %v14150_v25 = vpack.c.bf16 %v7627_v10, %v7626_v7  ;;  %v7568_v17 = vadd.f32 %v14114_v29, %v7494_v34  ;;  %v11956_v7 = vld [vmem:[%s14434_s9 + $0x64] ss:$8 sps:$4 sm:$0xff]   ;;  %v11963_v0 = vld [vmem:[%s14434_s9 + $0x100] ss:$8 sps:$4 sm:$0xff]  }
 0x97a   : > { %v14152_v56 = vpack.c.bf16 %v7625_v62, %v7624_v59  ;;  %v7497_v5 = vpop.f32.mrb[131].mxu1  ;;  %v7602_v48 = vmul.f32 0.2, %v7570_v23  ;;  %v7571_v4 = vadd.f32 %v11096_v39, %v14114_v29  ;;  %vm7586_vm9 = vcmp.gt.f32.partialorder %v7570_v23, 0.0  ;;  %v11962_v59 = vld [vmem:[%s14434_s9 + $0x74] ss:$8 sps:$4 sm:$0xff]  }
 0x97b   : > { %v7600_v36 = vmul.f32 0.2, %v7568_v17  ;;  %vm7584_vm4 = vcmp.gt.f32.partialorder %v7568_v17, 0.0  ;;  %v7569_v35 = vadd.f32 %v14114_v29, %v7497_v5  ;;  %v11968_v9 = vld [vmem:[%s14434_s9 + $0x114] ss:$8 sps:$4 sm:$0xff]  }
 0x97c   : > { %7782 = vmatmul.mubr.bf16.vlgmr.msra.gmra.mrb[148].mxu1 %v14152_v56  ;;  %v7618_v49 = vsel %vm7586_vm9, %v7570_v23, %v7602_v48  ;;  %vm7587_vm5 = vcmp.gt.f32.partialorder %v7571_v4, 0.0  ;;  %v7603_v16 = vmul.f32 0.2, %v7571_v4  ;;  %v11966_v10 = vld [vmem:[%s14434_s9 + $0x110] ss:$8 sps:$4 sm:$0xff]  }
 0x97d   : > { %7903 = vmatpush1.bf16.msra.mxu1 %v11933_v58  ;;  %7791 = vmatprep.mubr.bf16.mxu1 %v14542_v24  ;;  %v7616_v46 = vsel %vm7584_vm4, %v7568_v17, %v7600_v36  ;;  %v7601_v22 = vmul.f32 0.2, %v7569_v35  ;;  %vm7585_vm7 = vcmp.gt.f32.partialorder %v7569_v35, 0.0  ;;  %v11971_v62 = vld [vmem:[%s14434_s9 + $0x124] ss:$8 sps:$4 sm:$0xff]  }
 0x97e   : > { %7904 = vmatprep.subr.bf16.mxu1 %v11938_v41  ;;  %v7619_v27 = vsel %vm7587_vm5, %v7571_v4, %v7603_v16  ;;  %v11969_v34 = vld [vmem:[%s14434_s9 + $0x120] ss:$8 sps:$4 sm:$0xff]   ;;  %v11974_v23 = vld [vmem:[%s14434_s9 + $0x134] ss:$8 sps:$4 sm:$0xff]   ;;  %v11972_v39 = vld [vmem:[%s14434_s9 + $0x130] ss:$8 sps:$4 sm:$0xff]  }
 0x97f   : > { %v11099_v43 = vpop.f32.mrb[132].mxu1  ;;  %v7617_v20 = vsel %vm7585_vm7, %v7569_v35, %v7601_v22  ;;  %v11980_v58 = vld [vmem:[%s14434_s9 + $0x144] ss:$8 sps:$4 sm:$0xff]   ;;  %v11978_v17 = vld [vmem:[%s14434_s9 + $0x140] ss:$8 sps:$4 sm:$0xff]   ;;  %v12033_v16 = vld [vmem:[%s14438_s13 + $0x18] sm:$0xff]  }
 0x980   : > { %v7574_v53 = vadd.f32 %v11099_v43, %v14114_v29  ;;  %v7510_v6 = vpop.f32.mrb[133].mxu1  ;;  %v11983_v5 = vld [vmem:[%s14434_s9 + $0x154] ss:$8 sps:$4 sm:$0xff]   ;;  %v11981_v41 = vld [vmem:[%s14434_s9 + $0x150] ss:$8 sps:$4 sm:$0xff]   ;;  %v12027_v35 = vld [vmem:[%s14438_s13] sm:$0xff]  }
 0x981   : > { %v7572_v8 = vadd.f32 %v14114_v29, %v7510_v6  ;;  %v11100_v61 = vpop.f32.mrb[134].mxu1  ;;  %7905 = vmatpush1.bf16.msra.mxu1 %v11936_v60  ;;  %v11986_v48 = vld [vmem:[%s14434_s9 + $0x164] ss:$8 sps:$4 sm:$0xff]   ;;  %v11984_v4 = vld [vmem:[%s14434_s9 + $0x160] ss:$8 sps:$4 sm:$0xff]   ;;  %v12031_v6 = vld [vmem:[%s14438_s13 + $0x10] sm:$0xff]  }
 0x982   : > { %vm7590_vm6 = vcmp.gt.f32.partialorder %v7574_v53, 0.0  ;;  %v7606_v44 = vmul.f32 0.2, %v7574_v53  ;;  %v7575_v51 = vadd.f32 %v11100_v61, %v14114_v29  ;;  %v7513_v12 = vpop.f32.mrb[135].mxu1  ;;  %7906 = vmatprep.subr.bf16.mxu1 %v11944_v40  ;;  %v11987_v60 = vld [vmem:[%s14434_s9 + $0x170] ss:$8 sps:$4 sm:$0xff]  }
 0x983   : > { %vm7588_vm0 = vcmp.gt.f32.partialorder %v7572_v8, 0.0  ;;  %v7604_v11 = vmul.f32 0.2, %v7572_v8  ;;  %v7573_v45 = vadd.f32 %v14114_v29, %v7513_v12  ;;  %v12025_v36 = vld [vmem:[%s14436_s11 + $0xf4] ss:$8 sps:$4 sm:$0xff]   ;;  %v12026_v40 = vld [vmem:[%s14438_s13 + $0x40] sm:$0xff]  }
 0x984   : > { %v7622_v54 = vsel %vm7590_vm6, %v7574_v53, %v7606_v44  ;;  %vm7591_vm8 = vcmp.gt.f32.partialorder %v7575_v51, 0.0  ;;  %v7607_v32 = vmul.f32 0.2, %v7575_v51  ;;  %7792 = vmatmul.mubr.bf16.gmra.mrb[152].mxu1 %v14150_v25  ;;  %8491 = vmatprep.subr.bf16.mxu0 %v12025_v36  ;;  %v12029_v43 = vld [vmem:[%s14438_s13 + $0x8] sm:$0xff]   ;;  %v12030_v53 = vld [vmem:[%s14438_s13 + $0x50] sm:$0xff]   ;;  %v12035_v61 = vld [vmem:[%s14438_s13 + $0x20] sm:$0xff]  }
 0x985   : > { %v7620_v37 = vsel %vm7588_vm0, %v7572_v8, %v7604_v11  ;;  %vm7589_vm10 = vcmp.gt.f32.partialorder %v7573_v45, 0.0  ;;  %v7605_v55 = vmul.f32 0.2, %v7573_v45  ;;  %7907 = vmatpush1.bf16.msra.mxu1 %v11942_v30  ;;  %7801 = vmatprep.mubr.bf16.mxu1 %v14542_v24  ;;  %v7630_v13 = vmax.f32 %v7618_v49, %v7622_v54  ;;  %v12032_v49 = vld [vmem:[%s14438_s13 + $0x58] sm:$0xff]   ;;  %v12034_v8 = vld [vmem:[%s14438_s13 + $0x60] sm:$0xff]  }
 0x986   : > { %v7623_v29 = vsel %vm7591_vm8, %v7575_v51, %v7607_v32  ;;  %7908 = vmatprep.subr.bf16.mxu1 %v11947_v2  ;;  %v7628_v1 = vmax.f32 %v7616_v46, %v7620_v37  ;;  %v8163_v30 = vlaneseq  ;;  %v8161_v12 = vld [vmem:[%s14435_s10] sm:$0x3] }
 0x987   : > { %v7621_v21 = vsel %vm7589_vm10, %v7573_v45, %v7605_v55  ;;  %v7631_v15 = vmax.f32 %v7619_v27, %v7623_v29  ;;  %v11103_v63 = vpop.f32.mrb[144].mxu1 }
 0x988   : > { %v7629_v18 = vmax.f32 %v7617_v20, %v7621_v21  ;;  %v7526_v31 = vpop.f32.mrb[145].mxu1  ;;  %v14312_v46 = vshrl.u32 %v8163_v30, 7 }
 0x989   : > { %7909 = vmatpush1.bf16.msra.mxu1 %v11945_v33  ;;  %v14191_v42 = vpack.c.bf16 %v7631_v15, %v7630_v13  ;;  %v11104_v28 = vpop.f32.mrb[146].mxu1 }
 0x98a   : > { %v7634_v14 = vpack.c.bf16 %v7629_v18, %v7628_v1  ;;  %7910 = vmatprep.subr.bf16.mxu1 %v11950_v3  ;;  %v7528_v38 = vpop.f32.mrb[147].mxu1  ;;  %v8165_v51 = vsub.s32 0, %v14312_v46  ;;  %v8169_v22 = vsub.s32 1, %v14312_v46 }
 0x98c   : > { %7802 = vmatmul.mubr.bf16.gmra.mrb[156].mxu1 %v7634_v14  ;;  %v14321_v54 = vrot.slane %v8161_v12, %v8165_v51  ;;  %v14325_v32 = vrot.slane %v8161_v12, %v8169_v22 }
 0x98d   : > { %7911 = vmatpush1.bf16.msra.mxu1 %v11948_v19  ;;  %7811 = vmatprep.mubr.bf16.mxu1 %v14542_v24 }
 0x98e   : > { %7912 = vmatprep.subr.bf16.mxu1 %v11953_v52 }
 0x991   : > { %7913 = vmatpush1.bf16.msra.mxu1 %v11951_v26 }
 0x992   : > { %7914 = vmatprep.subr.bf16.mxu1 %v11956_v7 }
 0x994   : > { %7812 = vmatmul.mubr.bf16.gmra.mrb[160].mxu1 %v14191_v42 }
 0x995   : > { %7915 = vmatpush1.bf16.msra.mxu1 %v11954_v57  ;;  %7934 = vmatprep.mubr.bf16.mxu1 %v14542_v24 }
 0x996   : > { %7916 = vmatprep.subr.bf16.mxu1 %v11962_v59 }
 0x999   : > { %7917 = vmatpush1.bf16.msra.mxu1 %v11960_v47 }
 0x99a   : > { %8072 = vmatprep.subr.bf16.mxu1 %v11965_v50 }
 0x99c   : > { %7935 = vmatmul.mubr.bf16.vlgmr.msra.gmra.mrb[148].mxu1 %v14542_v24 }
 0x99d   : > { %8073 = vmatpush1.bf16.msra.mxu1 %v11963_v0  ;;  %7944 = vmatprep.mubr.bf16.mxu1 %v14542_v24 }
 0x99e   : > { %8074 = vmatprep.subr.bf16.mxu1 %v11968_v9 }
 0x9a1   : > { %8075 = vmatpush1.bf16.msra.mxu1 %v11966_v10 }
 0x9a2   : > { %8076 = vmatprep.subr.bf16.mxu1 %v11971_v62 }
 0x9a4   : > { %7945 = vmatmul.mubr.bf16.gmra.mrb[152].mxu1 %v14542_v24 }
 0x9a5   : > { %8077 = vmatpush1.bf16.msra.mxu1 %v11969_v34  ;;  %7954 = vmatprep.mubr.bf16.mxu1 %v14542_v24 }
 0x9a6   : > { %8078 = vmatprep.subr.bf16.mxu1 %v11974_v23 }
 0x9a9   : > { %8079 = vmatpush1.bf16.msra.mxu1 %v11972_v39 }
 0x9aa   : > { %8080 = vmatprep.subr.bf16.mxu1 %v11980_v58 }
 0x9ac   : > { %7955 = vmatmul.mubr.bf16.gmra.mrb[156].mxu1 %v14152_v56  ;;  %v11989_v56 = vld [vmem:[%s14434_s9 + $0x174] ss:$8 sps:$4 sm:$0xff]  }
 0x9ad   : > { %8081 = vmatpush1.bf16.msra.mxu1 %v11978_v17  ;;  %7964 = vmatprep.mubr.bf16.mxu1 %v14542_v24 }
 0x9ae   : > { %8082 = vmatprep.subr.bf16.mxu1 %v11983_v5 }
 0x9b1   : > { %8083 = vmatpush1.bf16.msra.mxu1 %v11981_v41 }
 0x9b2   : > { %8084 = vmatprep.subr.bf16.mxu1 %v11986_v48 }
 0x9b4   : > { %7965 = vmatmul.mubr.bf16.gmra.mrb[160].mxu1 %v14150_v25  ;;  %v12023_v25 = vld [vmem:[%s14436_s11 + $0xf0] ss:$8 sps:$4 sm:$0xff]  }
 0x9b5   : > { %8085 = vmatpush1.bf16.msra.mxu1 %v11984_v4  ;;  %8104 = vmatprep.mubr.bf16.mxu1 %v14542_v24 }
 0x9b6   : > { %8086 = vmatprep.subr.bf16.mxu1 %v11989_v56  ;;  %8492 = vmatpush1.bf16.msra.mxu0 %v12023_v25 }
 0x9b9   : > { %8087 = vmatpush1.bf16.msra.mxu1 %v11987_v60 }
 0x9ba   : > { %10069 = vmatprep.subr.bf16.mxu1 %v12026_v40 }
 0x9bc   : > { %8105 = vmatmul.mubr.bf16.vlgmr.msra.gmra.mrb[148].mxu1 %v7634_v14 }
 0x9bd   : > { %8114 = vmatprep.mubr.bf16.mxu1 %v14542_v24  ;;  %10070 = vmatpush3.bf16.msra.mxu1 %v12027_v35 }
 0x9c4   : > { %8115 = vmatmul.mubr.bf16.gmra.mrb[152].mxu1 %v14191_v42 }
 0x9c5   : > { %8124 = vmatprep.mubr.bf16.mxu1 %v14542_v24 }
 0x9cc   : > { %8125 = vmatmul.mubr.bf16.gmra.mrb[156].mxu1 %v14542_v24 }
 0x9cd   : > { %8134 = vmatprep.mubr.bf16.mxu1 %v14542_v24 }
 0x9d4   : > { %8135 = vmatmul.mubr.bf16.gmra.mrb[160].mxu1 %v14542_v24  ;;  %v12028_v24 = vld [vmem:[%s14438_s13 + $0x48] sm:$0xff]  }
 0x9d5   : > { %10071 = vmatprep.subr.bf16.mxu1 %v12028_v24 }
 0x9d6   : > { %10072 = vmatpush3.bf16.msra.mxu1 %v12029_v43 }
 0x9d7   : > { %10073 = vmatprep.subr.bf16.mxu1 %v12030_v53 }
 0x9da   : > { %10074 = vmatpush3.bf16.msra.mxu1 %v12031_v6 }
 0x9db   : > { %10075 = vmatprep.subr.bf16.mxu1 %v12032_v49 }
 0x9de   : > { %10076 = vmatpush3.bf16.msra.mxu1 %v12033_v16 }
 0x9df   : > { %10077 = vmatprep.subr.bf16.mxu1 %v12034_v8 }
 0x9e2   : > { %10078 = vmatpush3.bf16.msra.mxu1 %v12035_v61 }
 0xa8f   : > { %v8106_v44 = vpop.f32.mrb[148].mxu1 }
 0xa90   : > { %v8108_v2 = vpop.f32.mrb[149].mxu1  ;;  %v8173_v37 = vadd.f32 %v14321_v54, %v8106_v44 }
 0xa91   : > { %v8110_v11 = vpop.f32.mrb[150].mxu1  ;;  %v8174_v33 = vadd.f32 %v14325_v32, %v8108_v2 }
 0xa92   : > { %v8112_v45 = vpop.f32.mrb[151].mxu1  ;;  %v8175_v13 = vadd.f32 %v14321_v54, %v8110_v11  ;;  %vm8189_vm11 = vcmp.gt.f32.partialorder %v8173_v37, 0.0  ;;  %v8205_v20 = vmul.f32 0.2, %v8173_v37 }
 0xa93   : > { %v8176_v27 = vadd.f32 %v14325_v32, %v8112_v45  ;;  %v8206_v21 = vmul.f32 0.2, %v8174_v33  ;;  %vm8190_vm12 = vcmp.gt.f32.partialorder %v8174_v33, 0.0 }
 0xa94   : > { %v8207_v15 = vmul.f32 0.2, %v8175_v13  ;;  %vm8191_vm13 = vcmp.gt.f32.partialorder %v8175_v13, 0.0  ;;  %v8221_v19 = vsel %vm8189_vm11, %v8173_v37, %v8205_v20 }
 0xa95   : > { %v8208_v63 = vmul.f32 0.2, %v8176_v27  ;;  %vm8192_vm14 = vcmp.gt.f32.partialorder %v8176_v27, 0.0  ;;  %v8222_v28 = vsel %vm8190_vm12, %v8174_v33, %v8206_v21 }
 0xa96   : > { %v8223_v14 = vsel %vm8191_vm13, %v8175_v13, %v8207_v15 }
 0xa97   : > { %v8116_v55 = vpop.f32.mrb[152].mxu1  ;;  %v8224_v52 = vsel %vm8192_vm14, %v8176_v27, %v8208_v63 }
 0xa98   : > { %v8118_v29 = vpop.f32.mrb[153].mxu1  ;;  %v8177_v18 = vadd.f32 %v14321_v54, %v8116_v55 }
 0xa99   : > { %v8120_v1 = vpop.f32.mrb[154].mxu1  ;;  %v8178_v31 = vadd.f32 %v14325_v32, %v8118_v29 }
 0xa9a   : > { %v8122_v3 = vpop.f32.mrb[155].mxu1  ;;  %vm8193_vm15 = vcmp.gt.f32.partialorder %v8177_v18, 0.0  ;;  %v8209_v7 = vmul.f32 0.2, %v8177_v18  ;;  %v8179_v57 = vadd.f32 %v14321_v54, %v8120_v1 }
 0xa9b   : > { %vm8194_vm1 = vcmp.gt.f32.partialorder %v8178_v31, 0.0  ;;  %v8210_v10 = vmul.f32 0.2, %v8178_v31  ;;  %v8180_v23 = vadd.f32 %v14325_v32, %v8122_v3 }
 0xa9c   : > { %v8225_v48 = vsel %vm8193_vm15, %v8177_v18, %v8209_v7  ;;  %vm8195_vm5 = vcmp.gt.f32.partialorder %v8179_v57, 0.0  ;;  %v8211_v25 = vmul.f32 0.2, %v8179_v57  ;;  %v12038_v7 = vld [vmem:[%s14438_s13 + $0x70] sm:$0xff]  }
 0xa9d   : > { %v8226_v60 = vsel %vm8194_vm1, %v8178_v31, %v8210_v10  ;;  %vm8196_vm6 = vcmp.gt.f32.partialorder %v8180_v23, 0.0  ;;  %v8212_v24 = vmul.f32 0.2, %v8180_v23 }
 0xa9e   : > { %v8227_v20 = vsel %vm8195_vm5, %v8179_v57, %v8211_v25  ;;  %v12039_v57 = vld [vmem:[%s14438_s13 + $0x30] sm:$0xff]  }
 0xa9f   : > { %v8126_v42 = vpop.f32.mrb[156].mxu1 }
 0xaa0   : > { %v8181_v38 = vadd.f32 %v14321_v54, %v8126_v42  ;;  %v8128_v26 = vpop.f32.mrb[157].mxu1 }
 0xaa1   : > { %v8182_v59 = vadd.f32 %v14325_v32, %v8128_v26  ;;  %v8130_v47 = vpop.f32.mrb[158].mxu1  ;;  %v12037_v26 = vld [vmem:[%s14438_s13 + $0x28] sm:$0xff]  }
 0xaa2   : > { %vm8197_vm2 = vcmp.gt.f32.partialorder %v8181_v38, 0.0  ;;  %v8213_v50 = vmul.f32 0.2, %v8181_v38  ;;  %v8183_v0 = vadd.f32 %v14321_v54, %v8130_v47  ;;  %v8132_v9 = vpop.f32.mrb[159].mxu1  ;;  %v12041_v47 = vld [vmem:[%s14438_s13 + $0x38] sm:$0xff]  }
 0xaa3   : > { %vm8198_vm3 = vcmp.gt.f32.partialorder %v8182_v59, 0.0  ;;  %v8214_v62 = vmul.f32 0.2, %v8182_v59  ;;  %v8184_v34 = vadd.f32 %v14325_v32, %v8132_v9 }
 0xaa4   : > { %v8229_v39 = vsel %vm8197_vm2, %v8181_v38, %v8213_v50  ;;  %vm8199_vm9 = vcmp.gt.f32.partialorder %v8183_v0, 0.0  ;;  %v8215_v58 = vmul.f32 0.2, %v8183_v0  ;;  %v12036_v38 = vld [vmem:[%s14438_s13 + $0x68] sm:$0xff]   ;;  %v8289_v50 = vld [vmem:[%s14437_s12] sm:$0x3] }
 0xaa5   : > { %v8237_v17 = vadd.f32 %v8229_v39, %v8221_v19  ;;  %v8230_v5 = vsel %vm8198_vm3, %v8182_v59, %v8214_v62  ;;  %vm8200_vm4 = vcmp.gt.f32.partialorder %v8184_v34, 0.0  ;;  %v8216_v41 = vmul.f32 0.2, %v8184_v34  ;;  %10079 = vmatprep.subr.bf16.mxu1 %v12036_v38  ;;  %v12040_v59 = vld [vmem:[%s14438_s13 + $0x78] sm:$0xff]  }
 0xaa6   : > { %v8238_v4 = vadd.f32 %v8230_v5, %v8222_v28  ;;  %v8231_v56 = vsel %vm8199_vm9, %v8183_v0, %v8215_v58  ;;  %10080 = vmatpush3.bf16.msra.mxu1 %v12037_v26  ;;  %v8294_v0 = vrot.slane %v8289_v50, %v8165_v51  ;;  %v8298_v9 = vrot.slane %v8289_v50, %v8169_v22 }
 0xaa7   : > { %v8239_v36 = vadd.f32 %v8231_v56, %v8223_v14  ;;  %v8232_v40 = vsel %vm8200_vm4, %v8184_v34, %v8216_v41  ;;  %v8136_v35 = vpop.f32.mrb[160].mxu1  ;;  %v8245_v49 = vmul.f32 0.5, %v8237_v17  ;;  %10081 = vmatprep.subr.bf16.mxu1 %v12038_v7 }
 0xaa8   : > { %v8240_v43 = vadd.f32 %v8232_v40, %v8224_v52  ;;  %v8185_v53 = vadd.f32 %v14321_v54, %v8136_v35  ;;  %v8138_v6 = vpop.f32.mrb[161].mxu1  ;;  %v8246_v30 = vmul.f32 0.5, %v8238_v4 }
 0xaa9   : > { %v8247_v16 = vmul.f32 0.5, %v8239_v36  ;;  %v8186_v8 = vadd.f32 %v14325_v32, %v8138_v6  ;;  %v8140_v61 = vpop.f32.mrb[162].mxu1 }
 0xaaa   : > { %vm8201_vm0 = vcmp.gt.f32.partialorder %v8185_v53, 0.0  ;;  %v8217_v44 = vmul.f32 0.2, %v8185_v53  ;;  %v8187_v12 = vadd.f32 %v14321_v54, %v8140_v61  ;;  %v8142_v2 = vpop.f32.mrb[163].mxu1  ;;  %v8248_v11 = vmul.f32 0.5, %v8240_v43  ;;  %10082 = vmatpush3.bf16.msra.mxu1 %v12039_v57 }
 0xaab   : > { %v8253_v45 = vpack.c.bf16 %v8247_v16, %v8245_v49  ;;  %vm8202_vm7 = vcmp.gt.f32.partialorder %v8186_v8, 0.0  ;;  %v8218_v37 = vmul.f32 0.2, %v8186_v8  ;;  %v8188_v55 = vadd.f32 %v14325_v32, %v8142_v2  ;;  %10083 = vmatprep.subr.bf16.mxu1 %v12040_v59 }
 0xaac   : > { %v8233_v33 = vsel %vm8201_vm0, %v8185_v53, %v8217_v44  ;;  %vm8203_vm8 = vcmp.gt.f32.partialorder %v8187_v12, 0.0  ;;  %v8219_v13 = vmul.f32 0.2, %v8187_v12  ;;  %v8254_v27 = vpack.c.bf16 %v8248_v11, %v8246_v30 }
 0xaad   : > { %v8241_v29 = vadd.f32 %v8233_v33, %v8225_v48  ;;  %v8234_v1 = vsel %vm8202_vm7, %v8186_v8, %v8218_v37  ;;  %vm8204_vm10 = vcmp.gt.f32.partialorder %v8188_v55, 0.0  ;;  %v8220_v3 = vmul.f32 0.2, %v8188_v55 }
 0xaae   : > { %v8242_v21 = vadd.f32 %v8234_v1, %v8226_v60  ;;  %v8235_v15 = vsel %vm8203_vm8, %v8187_v12, %v8219_v13  ;;  %8493 = vmatprep.mubr.bf16.mxu0 %v8254_v27  ;;  %v8228_v54 = vsel %vm8196_vm6, %v8180_v23, %v8212_v24  ;;  %10084 = vmatpush3.bf16.msra.mxu1 %v12041_v47  ;;  %v9542_v13 = vld [vmem:[%s14439_s14] ss:$0 sm:$0xff] }
 0xaaf   : > { %v8243_v63 = vadd.f32 %v8235_v15, %v8227_v20  ;;  %v8236_v18 = vsel %vm8204_vm10, %v8188_v55, %v8220_v3  ;;  %8494 = vmatmul.mubr.bf16.vlgmr.msra.gmra.mrb[160].mxu0 %v8253_v45  ;;  %v8249_v32 = vmul.f32 0.5, %v8241_v29 }
 0xab0   : > { %v8244_v31 = vadd.f32 %v8236_v18, %v8228_v54  ;;  %v8250_v42 = vmul.f32 0.5, %v8242_v21 }
 0xab1   : > { %v8251_v19 = vmul.f32 0.5, %v8243_v63 }
 0xab2   : > { %v8252_v28 = vmul.f32 0.5, %v8244_v31 }
 0xab3   : > { %v8255_v14 = vpack.c.bf16 %v8251_v19, %v8249_v32 }
 0xab4   : > { %v8256_v52 = vpack.c.bf16 %v8252_v28, %v8250_v42 }
 0xab6   : > { %8503 = vmatprep.mubr.bf16.mxu0 %v8256_v52 }
 0xab7   : > { %8504 = vmatmul.mubr.bf16.gmra.mrb[164].mxu0 %v8255_v14 }
 0xb82   : > { %v8495_v10 = vpop.f32.mrb[160].mxu0 }
 0xb83   : > { %v8496_v62 = vadd.f32 %v8495_v10, %v8294_v0  ;;  %v8497_v34 = vpop.f32.mrb[161].mxu0 }
 0xb84   : > { %v8498_v23 = vadd.f32 %v8497_v34, %v8298_v9  ;;  %v8499_v39 = vpop.f32.mrb[162].mxu0 }
 0xb85   : > { %v8522_v58 = vmul.f32 0.01, %v8496_v62  ;;  %v8500_v17 = vadd.f32 %v8499_v39, %v8294_v0  ;;  %v8501_v5 = vpop.f32.mrb[163].mxu0  ;;  %vm8514_vm11 = vcmp.gt.f32.partialorder %v8496_v62, 0.0 }
 0xb86   : > { %v8523_v41 = vmul.f32 0.01, %v8498_v23  ;;  %v8502_v48 = vadd.f32 %v8501_v5, %v8298_v9  ;;  %vm8515_vm12 = vcmp.gt.f32.partialorder %v8498_v23, 0.0 }
 0xb87   : > { %vm8516_vm13 = vcmp.gt.f32.partialorder %v8500_v17, 0.0  ;;  %v8524_v4 = vmul.f32 0.01, %v8500_v17  ;;  %v8530_v51 = vsel %vm8514_vm11, %v8496_v62, %v8522_v58 }
 0xb88   : > { %vm8517_vm14 = vcmp.gt.f32.partialorder %v8502_v48, 0.0  ;;  %v8525_v56 = vmul.f32 0.01, %v8502_v48  ;;  %v8531_v25 = vsel %vm8515_vm12, %v8498_v23, %v8523_v41 }
 0xb89   : > { %v8532_v60 = vsel %vm8516_vm13, %v8500_v17, %v8524_v4 }
 0xb8a   : > { %v8538_v46 = vpack.c.bf16 %v8532_v60, %v8530_v51  ;;  %v8505_v22 = vpop.f32.mrb[164].mxu0  ;;  %v8533_v36 = vsel %vm8517_vm14, %v8502_v48, %v8525_v56 }
 0xb8b   : > { %v8506_v40 = vadd.f32 %v8505_v22, %v8294_v0  ;;  %v8507_v35 = vpop.f32.mrb[165].mxu0  ;;  %v8539_v24 = vpack.c.bf16 %v8533_v36, %v8531_v25 }
 0xb8c   : > { %v8508_v43 = vadd.f32 %v8507_v35, %v8298_v9  ;;  %v8509_v53 = vpop.f32.mrb[166].mxu0 }
 0xb8d   : > { %v8526_v6 = vmul.f32 0.01, %v8506_v40  ;;  %v8510_v49 = vadd.f32 %v8509_v53, %v8294_v0  ;;  %v8511_v16 = vpop.f32.mrb[167].mxu0  ;;  %8709 = vmatprep.mubr.bf16.mxu1 %v8539_v24  ;;  %vm8518_vm15 = vcmp.gt.f32.partialorder %v8506_v40, 0.0 }
 0xb8e   : > { %v8527_v8 = vmul.f32 0.01, %v8508_v43  ;;  %v8512_v61 = vadd.f32 %v8511_v16, %v8298_v9  ;;  %8710 = vmatmul.mubr.bf16.vlgmr.msra.gmra.mrb[164].mxu1 %v8538_v46  ;;  %vm8519_vm1 = vcmp.gt.f32.partialorder %v8508_v43, 0.0 }
 0xb8f   : > { %vm8520_vm2 = vcmp.gt.f32.partialorder %v8510_v49, 0.0  ;;  %v8528_v30 = vmul.f32 0.01, %v8510_v49  ;;  %v8534_v12 = vsel %vm8518_vm15, %v8506_v40, %v8526_v6 }
 0xb90   : > { %vm8521_vm3 = vcmp.gt.f32.partialorder %v8512_v61, 0.0  ;;  %v8529_v44 = vmul.f32 0.01, %v8512_v61  ;;  %v8535_v11 = vsel %vm8519_vm1, %v8508_v43, %v8527_v8 }
 0xb91   : > { %v8536_v2 = vsel %vm8520_vm2, %v8510_v49, %v8528_v30 }
 0xb92   : > { %v8537_v45 = vsel %vm8521_vm3, %v8512_v61, %v8529_v44  ;;  %v8540_v37 = vpack.c.bf16 %v8536_v2, %v8534_v12 }
 0xb93   : > { %v8541_v55 = vpack.c.bf16 %v8537_v45, %v8535_v11 }
 0xb95   : > { %8717 = vmatprep.mubr.bf16.mxu1 %v8541_v55 }
 0xb96   : > { %8718 = vmatmul.mubr.bf16.gmra.mrb[168].mxu1 %v8540_v37 }
 0xc61   : > { %v10085_v33 = vpop.f32.mrb[164].mxu1 }
 0xc62   : > { %v10086_v27 = vpop.f32.mrb[165].mxu1 }
 0xc63   : > { %v10087_v29 = vadd.f32 %v10086_v27, %v10085_v33  ;;  %v10088_v1 = vpop.f32.mrb[166].mxu1 }
 0xc64   : > { %v10089_v3 = vpop.f32.mrb[167].mxu1 }
 0xc65   : > { %v8712_v20 = vadd.f32 %v10087_v29, %v9542_v13  ;;  %v10090_v21 = vadd.f32 %v10089_v3, %v10088_v1 }
 0xc67   : > { %8726 = vst [vmem:[%s487_s23] sm:$0xff] %v8712_v20  ;;  %v8715_v15 = vadd.f32 %v10090_v21, %v9542_v13 }
 0xc69   : > { %8727 = vst [vmem:[%s487_s23 + $0x8] sm:$0xff] %v8715_v15  ;;  %v10091_v54 = vpop.f32.mrb[168].mxu1 }
 0xc6a   : > { %v10092_v63 = vpop.f32.mrb[169].mxu1 }
 0xc6b   : > { %v10093_v18 = vadd.f32 %v10092_v63, %v10091_v54  ;;  %v10094_v31 = vpop.f32.mrb[170].mxu1 }
 0xc6c   : > { %v10095_v32 = vpop.f32.mrb[171].mxu1 }
 0xc6d   : > { %v8720_v19 = vadd.f32 %v10093_v18, %v9542_v13  ;;  %v10096_v42 = vadd.f32 %v10095_v32, %v10094_v31 }
 0xc6f   : > { %8728 = vst [vmem:[%s487_s23 + $0x10] sm:$0xff] %v8720_v19  ;;  %v8723_v28 = vadd.f32 %v10096_v42, %v9542_v13 }
 0xc71   : > { %8729 = vst [vmem:[%s487_s23 + $0x18] sm:$0xff] %v8723_v28 }
 0xc72   : > { %12069 = shalt.err (!%p12066_p3)
}
 0xc73   : > { %s12070_s20 = scalar_lea.hbm %s14382_s0, 512  ;;  %s12074_s30 = scalar_lea.hbm %s14440_s15, 1024 }
 0xc74   : > { %p12071_p4 = scmp.ne.s32.totalorder %s14382_s0, %s12070_s20  ;;  %p12075_p9 = scmp.lt.u32.totalorder %s14382_s0, %s14440_s15 }
 0xc75   : > { %p12076_p10 = scmp.lt.u32.totalorder %s12074_s30, %s12070_s20  ;;  %p12078_p12 = scmp.lt.u32.totalorder %s12070_s20, %s14382_s0 }
 0xc76   : > { %p12072_p7 = pnand %p12071_p4, %p12242_p5 }
 0xc77   : > { %p12077_p11 = por %p12076_p10, %p12075_p9 }
 0xc78   : > { %p12073_p8 = pneg %p12072_p7 }
 0xc79   : > { %p12079_p13 = por %p12078_p12, %p12077_p11 }
 0xc7b   : > { %p12080_p0 = pnand %p12079_p13, %p12073_p8 }
 0xc7d   : > { %12083 = shalt.err (!%p12080_p0)
}
 0xc7e   : > { %s12122_s1 = smov 128   ;;  %s12123_s27 = smov 8  }
 0xc7f   : > { %11730 = dma.vmem_to_hbm [thread:$0]  (%p12242_p5), %s14377_s25, 512, %s14382_s0, %s14384_s24, %s12122_s1, %s12122_s1, %s12123_s27  }
 0xc80 PF: > { %p11736_p1 = scmp.ge.s32.totalorder %s12118_s21, 2  ;;  %s8759_s17 = sand.u32 1, %s12106_s18  }
 0xc81   : > { %s8760_s20 = scalar_lea.sflag [#allocation3], %s8759_s17 }
 0xc82   : > { %p11733_p2 = pnand %p11736_p1, %p12246_p6 }
 0xc84   : > { %12101 = dma.done.wait (!%p11733_p2), %s8760_s20, 512  }
 0xc85   : > { %12103 = vsyncadd (!%p11733_p2), %s8760_s20, 4294966784  ;;  %s14551_s21 = sld [smem:[#allocation6_spill]]  ;;  %s14552_s23 = sld [smem:[#allocation5_spill]] }
 0xc86   : > { %s14553_s20 = sld [smem:[#allocation7_spill]]  ;;  %s14554_s18 = smov %s12110_s19 }
 0xc8b   : > { %p25_p3 = scmp.ge.s32.totalorder %s14551_s21, 4   ;;  %s14555_s19 = smov %s14552_s23 }
 0xc8d   :  { %27 = sbr.rel (!%p25_p3) target bundleno = 6 (0x6), region = 125 }
 0xc94   :  { %8765 = vsyncpa [#allocation3], 1 }
 0xc95   :  { %8767 = vsyncpa [#allocation3 + $0x1], 1 }

</bundles_post_ra>
